<compile_context>
chip_gen: v7x
topology: tpu7x:2x2x1
jax: 0.10.0
libtpu: 0.0.40
codegen_flags: <defaults>
</compile_context>

<pallas_src>
import math
import functools

import jax
import jax.numpy as jnp
from jax.experimental import pallas as pl
from jax.experimental.pallas import tpu as pltpu

LN_EPS = 1e-5  # PyTorch nn.LayerNorm default


# ----------------------------- in-kernel helpers -----------------------------
def _layernorm(x, g, b):
    mu = jnp.mean(x, axis=-1, keepdims=True)
    var = jnp.mean((x - mu) ** 2, axis=-1, keepdims=True)
    return (x - mu) * jax.lax.rsqrt(var + LN_EPS) * g + b


def _gelu(x):
    # TODO(synk): PyTorch nn.GELU defaults to exact erf; tanh approximation
    # (~1e-3 elementwise deviation) kept for Mosaic-lowering safety.
    c = math.sqrt(2.0 / math.pi)
    return 0.5 * x * (1.0 + jnp.tanh(c * (x + 0.044715 * x * x * x)))


# --------------------------- fused encoder kernel ----------------------------
def _setr_encoder_kernel(
    patches_ref, pw_ref, pb_ref, pos_ref,
    vec_ref, wqkv_ref, wo_ref, w1_ref, w2_ref,
    flng_ref, flnb_ref,
    attn_ref, mlp_ref, out_ref,
    resid_ref,
    *, num_heads, batch_tile):
    l = pl.program_id(1)
    n_layers = pl.num_programs(1)

    Bt = batch_tile
    S, E = pos_ref.shape
    H = num_heads
    dh = E // H
    F = w1_ref.shape[2]
    scale = 1.0 / math.sqrt(dh)

    # --- layer 0: patch linear projection + learned positional encoding ------
    @pl.when(l == 0)
    def _embed():
        pw = pw_ref[...]                                   # (Pflat, E) bf16
        pb = pb_ref[...]                                   # (1, E) f32
        pos = pos_ref[...]                                 # (S, E) f32
        for b in range(Bt):                                # static, small
            xb = jnp.dot(patches_ref[b], pw,
                         preferred_element_type=jnp.float32)
            # pe_dropout has rate 0.0 -> identity
            resid_ref[b * S:(b + 1) * S, :] = xb + pb + pos

    x = resid_ref[...]                                     # (Bt*S, E) f32

    # --- packed per-layer small vectors (one DMA per grid step) --------------
    vecs = vec_ref[0]                                      # (8, Vw) f32
    ln1_g = vecs[0:1, :E]
    ln1_b = vecs[1:2, :E]
    bqkv = vecs[2:3, :3 * E]
    bo = vecs[3:4, :E]
    ln2_g = vecs[4:5, :E]
    ln2_b = vecs[5:6, :E]
    b1 = vecs[6:7, :F]
    b2 = vecs[7:8, :E]

    # --- self-attention sub-block: x + Attn(LN1(x)) ---------------------------
    h1 = _layernorm(x, ln1_g, ln1_b).astype(jnp.bfloat16)
    # fused Q/K/V projection: one (Bt*S, E) @ (E, 3E) GEMM
    qkv = jnp.dot(h1, wqkv_ref[0], preferred_element_type=jnp.float32) + bqkv
    q = (qkv[:, :E] * scale).astype(jnp.bfloat16)          # fold 1/sqrt(dh) once
    k = qkv[:, E:2 * E].astype(jnp.bfloat16)
    v = qkv[:, 2 * E:3 * E].astype(jnp.bfloat16)

    ctx_parts = []
    for b in range(Bt):                                    # static, small
        qb = q[b * S:(b + 1) * S].reshape(S, H, dh)
        kb = k[b * S:(b + 1) * S].reshape(S, H, dh)
        vb = v[b * S:(b + 1) * S].reshape(S, H, dh)
        # one batched contraction over all heads (batch dim = h), f32 accumulate
        s = jnp.einsum("qhd,khd->hqk", qb, kb,
                       preferred_element_type=jnp.float32)  # (H, S, S)
        s = s - jnp.max(s, axis=-1, keepdims=True)
        p = jnp.exp(s)
        inv = pl.reciprocal(jnp.sum(p, axis=-1, keepdims=True), approx=True)
        p = (p * inv).astype(jnp.bfloat16)                  # attn_dropout = id
        cb = jnp.einsum("hqk,khd->qhd", p, vb,
                        preferred_element_type=jnp.float32)  # (S, H, dh)
        ctx_parts.append(cb.reshape(S, E))
    ctx = ctx_parts[0] if Bt == 1 else jnp.concatenate(ctx_parts, axis=0)
    ctx = ctx.astype(jnp.bfloat16)                          # (Bt*S, E)

    attn = jnp.dot(ctx, wo_ref[0], preferred_element_type=jnp.float32) + bo
    x1 = x + attn

    # --- MLP sub-block: x1 + MLP(LN2(x1)) -------------------------------------
    h2 = _layernorm(x1, ln2_g, ln2_b).astype(jnp.bfloat16)
    m = jnp.dot(h2, w1_ref[0], preferred_element_type=jnp.float32) + b1
    m = _gelu(m).astype(jnp.bfloat16)
    m = jnp.dot(m, w2_ref[0], preferred_element_type=jnp.float32) + b2
    x2 = x1 + m
    resid_ref[...] = x2

    # intermediate outputs (bf16 writeback: halves output DMA bytes)
    for b in range(Bt):
        attn_ref[b, 0] = x1[b * S:(b + 1) * S].astype(attn_ref.dtype)
        mlp_ref[b, 0] = x2[b * S:(b + 1) * S].astype(mlp_ref.dtype)

    # --- final LayerNorm fused into the last layer step ------------------------
    @pl.when(l == n_layers - 1)
    def _finalize():
        fin = _layernorm(x2, flng_ref[...], flnb_ref[...])
        for b in range(Bt):
            out_ref[b] = fin[b * S:(b + 1) * S].astype(out_ref.dtype)


# ---------------------------------- wrapper ----------------------------------
def setr_encode(x_nchw, packed, *, patch_size, num_heads, batch_tile=None):
    """SETR.encode: returns (encoder_output, intermediate_outputs_dict)."""
    # Patch unfold/permute is pure-JAX glue (cheap reshape/transpose).
    patches = extract_patches(x_nchw, patch_size).astype(jnp.bfloat16)
    B, S, Pflat = patches.shape
    L, E, _ = packed["wo"].shape
    F = packed["w1"].shape[2]
    Vw = packed["vec"].shape[2]

    if batch_tile is None:
        # amortize each per-layer weight DMA across as many batch elements as
        # reasonable (largest divisor of B that is <= 8)
        batch_tile = max(d for d in range(1, min(B, 8) + 1) if B % d == 0)
    assert B % batch_tile == 0
    Bt = batch_tile
    G = B // Bt

    def rep(shape):                       # layer- and batch-invariant block
        n = len(shape)
        return pl.BlockSpec(shape, lambda g, l, _n=n: (0,) * _n)

    def per_layer(shape):                 # stacked on leading L axis (streamed)
        n = len(shape)
        return pl.BlockSpec((1,) + shape, lambda g, l, _n=n: (l,) + (0,) * _n)

    in_specs = [
        pl.BlockSpec((Bt, S, Pflat), lambda g, l: (g, 0, 0)),  # patches
        rep((Pflat, E)), rep((1, E)), rep((S, E)),             # proj_w/proj_b/pos
        per_layer((8, Vw)),                                    # packed vectors
        per_layer((E, 3 * E)),                                 # fused wqkv
        per_layer((E, E)),                                     # wo
        per_layer((E, F)), per_layer((F, E)),                  # w1 / w2
        rep((1, E)), rep((1, E)),                              # final LN g/b
    ]
    out_specs = (
        pl.BlockSpec((Bt, 1, S, E), lambda g, l: (g, l, 0, 0)),  # attn intmd
        pl.BlockSpec((Bt, 1, S, E), lambda g, l: (g, l, 0, 0)),  # mlp intmd
        pl.BlockSpec((Bt, S, E), lambda g, l: (g, 0, 0)),        # final output
    )
    out_shape = (
        jax.ShapeDtypeStruct((B, L, S, E), jnp.bfloat16),
        jax.ShapeDtypeStruct((B, L, S, E), jnp.bfloat16),
        jax.ShapeDtypeStruct((B, S, E), jnp.float32),
    )

    # ---- cost estimate (advisory) ----
    H = num_heads
    flops = (
        2 * B * S * Pflat * E                                    # patch embed
        + B * L * (2 * S * E * 3 * E                             # fused qkv
                   + 4 * S * S * E                               # scores + ctx
                   + 2 * S * E * E                               # out proj
                   + 4 * S * E * F)                              # mlp
    )
    transcendentals = B * L * (H * S * S + S * F + 3 * S)
    bytes_accessed = (
        G * L * 2 * (E * 3 * E + E * E + E * F + F * E)          # bf16 weights
        + G * L * 4 * 8 * Vw                                     # packed vecs
        + B * S * Pflat * 2                                      # patches in
        + 2 * (Pflat * E + S * E * 2)                            # resident embed
        + 2 * B * L * S * E * 2                                  # bf16 intmds out
        + B * S * E * 4                                          # f32 output
    )
    cost = pl.CostEstimate(flops=int(flops),
                           transcendentals=int(transcendentals),
                           bytes_accessed=int(bytes_accessed))

    # ---- VMEM budget: double-buffered streamed blocks + residents + scratch ----
    vmem_needed = (
        2 * (2 * (E * 3 * E + E * E + E * F + F * E) + 4 * 8 * Vw)   # per-layer
        + 2 * (Bt * S * Pflat * 2)                                    # patches
        + 2 * Pflat * E + 4 * (S + 3) * E                             # residents
        + 2 * (2 * Bt * S * E * 2) + 2 * Bt * S * E * 4               # outputs
        + Bt * S * E * 4                                              # scratch
    )
    vmem_limit = int(min(64 * 2**20, max(32 * 2**20, 2 * vmem_needed)))

    kern = functools.partial(_setr_encoder_kernel,
                             num_heads=num_heads, batch_tile=Bt)
    attn_i, mlp_i, out = pl.pallas_call(
        kern,
        out_shape=out_shape,
        grid=(G, L),
        in_specs=in_specs,
        out_specs=out_specs,
        scratch_shapes=[pltpu.VMEM((Bt * S, E), jnp.float32)],  # resident residual
        compiler_params=pltpu.CompilerParams(
            dimension_semantics=("parallel", "arbitrary"),
            vmem_limit_bytes=vmem_limit),
        cost_estimate=cost,
    )(patches, packed["proj_w"], packed["proj_b"], packed["pos"],
      packed["vec"], packed["wqkv"], packed["wo"], packed["w1"], packed["w2"],
      packed["final_ln_g"], packed["final_ln_b"])

    intmd = {}
    for li in range(L):
        intmd[str(2 * li)] = attn_i[:, li]       # after attention residual
        intmd[str(2 * li + 1)] = mlp_i[:, li]    # after MLP residual
    return out, intmd


# ----------------------------------- params -----------------------------------
def init_setr_params(key, *, patch_flatten_dim, seq_length, embedding_dim,
                     num_layers, expansion):
    E, F, L = embedding_dim, embedding_dim * expansion, num_layers
    counter = [0]

    def nrm(shape, dtype=jnp.float32, scale=0.02):
        counter[0] += 1
        k = jax.random.fold_in(key, counter[0])
        return (scale * jax.random.normal(k, shape)).astype(dtype)

    bf = jnp.bfloat16  # matmul weights in bf16; biases / LN / pos in f32
    return {
        "proj_w": nrm((patch_flatten_dim, E), bf),
        "proj_b": nrm((1, E)),
        "pos": nrm((seq_length, E)),                      # learned positional enc
        "final_ln_g": jnp.ones((1, E), jnp.float32),
        "final_ln_b": jnp.zeros((1, E), jnp.float32),
        "ln1_g": jnp.ones((L, E), jnp.float32),
        "ln1_b": jnp.zeros((L, E), jnp.float32),
        "wq": nrm((L, E, E), bf), "bq": nrm((L, E)),
        "wk": nrm((L, E, E), bf), "bk": nrm((L, E)),
        "wv": nrm((L, E, E), bf), "bv": nrm((L, E)),
        "wo": nrm((L, E, E), bf), "bo": nrm((L, E)),
        "ln2_g": jnp.ones((L, E), jnp.float32),
        "ln2_b": jnp.zeros((L, E), jnp.float32),
        "w1": nrm((L, E, F), bf), "b1": nrm((L, F)),
        "w2": nrm((L, F, E), bf), "b2": nrm((L, E)),
    }


def pack_setr_params(p):
    """Pack logical per-layer params into the kernel's streamed layout."""
    L, E, _ = p["wq"].shape
    F = p["w1"].shape[2]
    Vw = ((max(3 * E, F) + 127) // 128) * 128
    wqkv = jnp.concatenate([p["wq"], p["wk"], p["wv"]], axis=-1)   # (L, E, 3E)
    vec = jnp.zeros((L, 8, Vw), jnp.float32)
    vec = vec.at[:, 0, :E].set(p["ln1_g"])
    vec = vec.at[:, 1, :E].set(p["ln1_b"])
    vec = vec.at[:, 2, :E].set(p["bq"])
    vec = vec.at[:, 2, E:2 * E].set(p["bk"])
    vec = vec.at[:, 2, 2 * E:3 * E].set(p["bv"])
    vec = vec.at[:, 3, :E].set(p["bo"])
    vec = vec.at[:, 4, :E].set(p["ln2_g"])
    vec = vec.at[:, 5, :E].set(p["ln2_b"])
    vec = vec.at[:, 6, :F].set(p["b1"])
    vec = vec.at[:, 7, :E].set(p["b2"])
    return {
        "proj_w": p["proj_w"], "proj_b": p["proj_b"], "pos": p["pos"],
        "vec": vec, "wqkv": wqkv, "wo": p["wo"], "w1": p["w1"], "w2": p["w2"],
        "final_ln_g": p["final_ln_g"], "final_ln_b": p["final_ln_b"],
    }


def extract_patches(x, patch_size):
    # Matches: x.unfold(2,p,p).unfold(3,p,p).view(N,C,-1,p*p).permute(0,2,3,1)
    #           .view(N,-1,p*p*C)   (inner flatten order = (py, px, C))
    N, C, H, W = x.shape
    p = patch_size
    x = x.reshape(N, C, H // p, p, W // p, p)              # (N,C,hp,py,wp,px)
    x = jnp.transpose(x, (0, 2, 4, 3, 5, 1))               # (N,hp,wp,py,px,C)
    return x.reshape(N, (H // p) * (W // p), p * p * C)


# ------------------------------------ main -------------------------------------
if __name__ == "__main__":
    # small shapes consistent with the module's constraints
    img_size = 16
    patch_size = 4
    num_channels = 4
    embedding_dim = 128          # multiple of 128 -> lane-dense blocks
    num_heads = 4                # head dim = 32
    num_layers = 2
    expansion = 4
    batch = 2

    num_patches = (img_size // patch_size) ** 2                  # 16
    patch_flatten_dim = patch_size * patch_size * num_channels   # 64

    key = jax.random.PRNGKey(0)
    k_in, k_par = jax.random.split(key)
    x = jax.random.normal(k_in, (batch, num_channels, img_size, img_size),
                          jnp.float32)

    params = init_setr_params(
        k_par,
        patch_flatten_dim=patch_flatten_dim,
        seq_length=num_patches,
        embedding_dim=embedding_dim,
        num_layers=num_layers,
        expansion=expansion,
    )
    packed = pack_setr_params(params)

    enc_out, intmd = setr_encode(x, packed, patch_size=patch_size,
                                 num_heads=num_heads)
    jax.block_until_ready(enc_out)
    for v in intmd.values():
        jax.block_until_ready(v)

    assert enc_out.shape == (batch, num_patches, embedding_dim)
    assert enc_out.dtype == jnp.float32
    assert len(intmd) == 2 * num_layers
    for v in intmd.values():
        assert v.shape == (batch, num_patches, embedding_dim)
    assert bool(jnp.all(jnp.isfinite(enc_out)))
    print("KERNEL_OK")
</pallas_src>

<mosaic_0001>
module attributes {stable_mosaic.version = 11 : i64} {
  func.func @_setr_encoder_kernel(%arg0: i32, %arg1: i32, %arg2: memref<2x16x64xbf16, #tpu.memory_space<vmem>>, %arg3: memref<64x128xbf16, #tpu.memory_space<vmem>>, %arg4: memref<1x128xf32, #tpu.memory_space<vmem>>, %arg5: memref<16x128xf32, #tpu.memory_space<vmem>>, %arg6: memref<1x8x512xf32, #tpu.memory_space<vmem>>, %arg7: memref<1x128x384xbf16, #tpu.memory_space<vmem>>, %arg8: memref<1x128x128xbf16, #tpu.memory_space<vmem>>, %arg9: memref<1x128x512xbf16, #tpu.memory_space<vmem>>, %arg10: memref<1x512x128xbf16, #tpu.memory_space<vmem>>, %arg11: memref<1x128xf32, #tpu.memory_space<vmem>>, %arg12: memref<1x128xf32, #tpu.memory_space<vmem>>, %arg13: memref<2x1x16x128xbf16, #tpu.memory_space<vmem>>, %arg14: memref<2x1x16x128xbf16, #tpu.memory_space<vmem>>, %arg15: memref<2x16x128xf32, #tpu.memory_space<vmem>>, %arg16: memref<32x128xf32, #tpu.memory_space<vmem>>) attributes {dimension_semantics = [#tpu.dimension_semantics<parallel>, #tpu.dimension_semantics<arbitrary>], iteration_bounds = array<i64: 1, 2>, scalar_prefetch = 0 : i64, scratch_operands = 1 : i64, tpu.core_type = #tpu.core_type<tc>, window_params = [{transform_indices = @transform_0, window_bounds = array<i64: 2, 16, 64>}, {pipeline_mode = #tpu.pipeline_mode<synchronous>, transform_indices = @transform_1, window_bounds = array<i64: 64, 128>}, {pipeline_mode = #tpu.pipeline_mode<synchronous>, transform_indices = @transform_2, window_bounds = array<i64: 1, 128>}, {pipeline_mode = #tpu.pipeline_mode<synchronous>, transform_indices = @transform_3, window_bounds = array<i64: 16, 128>}, {transform_indices = @transform_4, window_bounds = array<i64: 1, 8, 512>}, {transform_indices = @transform_5, window_bounds = array<i64: 1, 128, 384>}, {transform_indices = @transform_6, window_bounds = array<i64: 1, 128, 128>}, {transform_indices = @transform_7, window_bounds = array<i64: 1, 128, 512>}, {transform_indices = @transform_8, window_bounds = array<i64: 1, 512, 128>}, {pipeline_mode = #tpu.pipeline_mode<synchronous>, transform_indices = @transform_9, window_bounds = array<i64: 1, 128>}, {pipeline_mode = #tpu.pipeline_mode<synchronous>, transform_indices = @transform_10, window_bounds = array<i64: 1, 128>}, {transform_indices = @transform_11, window_bounds = array<i64: 2, 1, 16, 128>}, {transform_indices = @transform_12, window_bounds = array<i64: 2, 1, 16, 128>}, {transform_indices = @transform_13, window_bounds = array<i64: 2, 16, 128>}]} {
    %c0_i32 = arith.constant 0 : i32
    %0 = arith.cmpi eq, %arg1, %c0_i32 : i32
    %1 = arith.extui %0 : i1 to i32
    %c0_i32_0 = arith.constant 0 : i32
    %2 = arith.cmpi ne, %1, %c0_i32_0 : i32
    scf.if %2 {
      %c0_61 = arith.constant 0 : index
      %c0_62 = arith.constant 0 : index
      %172 = vector.load %arg3[%c0_61, %c0_62] : memref<64x128xbf16, #tpu.memory_space<vmem>>, vector<64x128xbf16>
      %c0_63 = arith.constant 0 : index
      %c0_64 = arith.constant 0 : index
      %173 = vector.load %arg4[%c0_63, %c0_64] : memref<1x128xf32, #tpu.memory_space<vmem>>, vector<1x128xf32>
      %c0_65 = arith.constant 0 : index
      %c0_66 = arith.constant 0 : index
      %174 = vector.load %arg5[%c0_65, %c0_66] : memref<16x128xf32, #tpu.memory_space<vmem>>, vector<16x128xf32>
      %c0_67 = arith.constant 0 : index
      %c0_68 = arith.constant 0 : index
      %c0_69 = arith.constant 0 : index
      %175 = vector.load %arg2[%c0_67, %c0_68, %c0_69] : memref<2x16x64xbf16, #tpu.memory_space<vmem>>, vector<1x16x64xbf16>
      %176 = vector.shape_cast %175 : vector<1x16x64xbf16> to vector<16x64xbf16>
      %cst_70 = arith.constant dense<0.000000e+00> : vector<16x128xf32>
      %177 = tpu.matmul %176, %172, %cst_70 {dimension_numbers = #tpu.dot_dimension_numbers<[1], [0], [0], [1], [0, 0, 1, 1], [], []>} : vector<16x64xbf16>, vector<64x128xbf16>, vector<16x128xf32> -> vector<16x128xf32>
      %178 = vector.broadcast %173 : vector<1x128xf32> to vector<16x128xf32>
      %179 = arith.addf %177, %178 : vector<16x128xf32>
      %180 = arith.addf %179, %174 : vector<16x128xf32>
      %c0_71 = arith.constant 0 : index
      %c0_72 = arith.constant 0 : index
      %181 = vector.load %arg16[%c0_71, %c0_72] : memref<32x128xf32, #tpu.memory_space<vmem>>, vector<16x128xf32>
      tpu.vector_store %arg16[%c0_71, %c0_72], %180 {strides = array<i32>} : memref<32x128xf32, #tpu.memory_space<vmem>>, vector<16x128xf32>,
      %c1_73 = arith.constant 1 : index
      %c0_74 = arith.constant 0 : index
      %c0_75 = arith.constant 0 : index
      %182 = vector.load %arg2[%c1_73, %c0_74, %c0_75] : memref<2x16x64xbf16, #tpu.memory_space<vmem>>, vector<1x16x64xbf16>
      %183 = vector.shape_cast %182 : vector<1x16x64xbf16> to vector<16x64xbf16>
      %cst_76 = arith.constant dense<0.000000e+00> : vector<16x128xf32>
      %184 = tpu.matmul %183, %172, %cst_76 {dimension_numbers = #tpu.dot_dimension_numbers<[1], [0], [0], [1], [0, 0, 1, 1], [], []>} : vector<16x64xbf16>, vector<64x128xbf16>, vector<16x128xf32> -> vector<16x128xf32>
      %185 = vector.broadcast %173 : vector<1x128xf32> to vector<16x128xf32>
      %186 = arith.addf %184, %185 : vector<16x128xf32>
      %187 = arith.addf %186, %174 : vector<16x128xf32>
      %c16 = arith.constant 16 : index
      %c0_77 = arith.constant 0 : index
      %188 = vector.load %arg16[%c16, %c0_77] : memref<32x128xf32, #tpu.memory_space<vmem>>, vector<16x128xf32>
      tpu.vector_store %arg16[%c16, %c0_77], %187 {strides = array<i32>} : memref<32x128xf32, #tpu.memory_space<vmem>>, vector<16x128xf32>,
    } else {
    }
    %c0 = arith.constant 0 : index
    %c0_1 = arith.constant 0 : index
    %3 = vector.load %arg16[%c0, %c0_1] : memref<32x128xf32, #tpu.memory_space<vmem>>, vector<32x128xf32>
    %c0_2 = arith.constant 0 : index
    %c0_3 = arith.constant 0 : index
    %c0_4 = arith.constant 0 : index
    %4 = vector.load %arg6[%c0_2, %c0_3, %c0_4] : memref<1x8x512xf32, #tpu.memory_space<vmem>>, vector<1x8x512xf32>
    %5 = vector.shape_cast %4 : vector<1x8x512xf32> to vector<8x512xf32>
    %6 = vector.extract_strided_slice %5 {offsets = [0, 0], sizes = [1, 128], strides = [1, 1]} : vector<8x512xf32> to vector<1x128xf32>
    %7 = vector.extract_strided_slice %5 {offsets = [1, 0], sizes = [1, 128], strides = [1, 1]} : vector<8x512xf32> to vector<1x128xf32>
    %8 = vector.extract_strided_slice %5 {offsets = [2, 0], sizes = [1, 384], strides = [1, 1]} : vector<8x512xf32> to vector<1x384xf32>
    %9 = vector.extract_strided_slice %5 {offsets = [3, 0], sizes = [1, 128], strides = [1, 1]} : vector<8x512xf32> to vector<1x128xf32>
    %10 = vector.extract_strided_slice %5 {offsets = [4, 0], sizes = [1, 128], strides = [1, 1]} : vector<8x512xf32> to vector<1x128xf32>
    %11 = vector.extract_strided_slice %5 {offsets = [5, 0], sizes = [1, 128], strides = [1, 1]} : vector<8x512xf32> to vector<1x128xf32>
    %12 = vector.extract_strided_slice %5 {offsets = [6, 0], sizes = [1, 512], strides = [1, 1]} : vector<8x512xf32> to vector<1x512xf32>
    %13 = vector.extract_strided_slice %5 {offsets = [7, 0], sizes = [1, 128], strides = [1, 1]} : vector<8x512xf32> to vector<1x128xf32>
    %cst = arith.constant dense<0.000000e+00> : vector<32xf32>
    %14 = vector.multi_reduction <add>, %3, %cst [1] : vector<32x128xf32> to vector<32xf32>
    %15 = vector.shape_cast %14 : vector<32xf32> to vector<32x1xf32>
    %cst_5 = arith.constant 1.280000e+02 : f32
    %16 = vector.broadcast %cst_5 : f32 to vector<32x1xf32>
    %17 = arith.divf %15, %16 : vector<32x1xf32>
    %18 = vector.broadcast %17 : vector<32x1xf32> to vector<32x128xf32>
    %19 = arith.subf %3, %18 : vector<32x128xf32>
    %20 = arith.mulf %19, %19 : vector<32x128xf32>
    %cst_6 = arith.constant dense<0.000000e+00> : vector<32xf32>
    %21 = vector.multi_reduction <add>, %20, %cst_6 [1] : vector<32x128xf32> to vector<32xf32>
    %22 = vector.shape_cast %21 : vector<32xf32> to vector<32x1xf32>
    %cst_7 = arith.constant 1.280000e+02 : f32
    %23 = vector.broadcast %cst_7 : f32 to vector<32x1xf32>
    %24 = arith.divf %22, %23 : vector<32x1xf32>
    %25 = vector.broadcast %17 : vector<32x1xf32> to vector<32x128xf32>
    %26 = arith.subf %3, %25 : vector<32x128xf32>
    %cst_8 = arith.constant 9.99999974E-6 : f32
    %27 = vector.broadcast %cst_8 : f32 to vector<32x1xf32>
    %28 = arith.addf %24, %27 : vector<32x1xf32>
    %29 = math.rsqrt %28 : vector<32x1xf32>
    %30 = vector.broadcast %29 : vector<32x1xf32> to vector<32x128xf32>
    %31 = arith.mulf %26, %30 : vector<32x128xf32>
    %32 = vector.broadcast %6 : vector<1x128xf32> to vector<32x128xf32>
    %33 = arith.mulf %31, %32 : vector<32x128xf32>
    %34 = vector.broadcast %7 : vector<1x128xf32> to vector<32x128xf32>
    %35 = arith.addf %33, %34 : vector<32x128xf32>
    %36 = arith.truncf %35 : vector<32x128xf32> to vector<32x128xbf16>
    %c0_9 = arith.constant 0 : index
    %c0_10 = arith.constant 0 : index
    %c0_11 = arith.constant 0 : index
    %37 = vector.load %arg7[%c0_9, %c0_10, %c0_11] : memref<1x128x384xbf16, #tpu.memory_space<vmem>>, vector<1x128x384xbf16>
    %38 = vector.shape_cast %37 : vector<1x128x384xbf16> to vector<128x384xbf16>
    %cst_12 = arith.constant dense<0.000000e+00> : vector<32x384xf32>
    %39 = tpu.matmul %36, %38, %cst_12 {dimension_numbers = #tpu.dot_dimension_numbers<[1], [0], [0], [1], [0, 0, 1, 1], [], []>} : vector<32x128xbf16>, vector<128x384xbf16>, vector<32x384xf32> -> vector<32x384xf32>
    %40 = vector.broadcast %8 : vector<1x384xf32> to vector<32x384xf32>
    %41 = arith.addf %39, %40 : vector<32x384xf32>
    %42 = vector.extract_strided_slice %41 {offsets = [0, 0], sizes = [32, 128], strides = [1, 1]} : vector<32x384xf32> to vector<32x128xf32>
    %cst_13 = arith.constant 0.176776692 : f32
    %43 = vector.broadcast %cst_13 : f32 to vector<32x128xf32>
    %44 = arith.mulf %42, %43 : vector<32x128xf32>
    %45 = arith.truncf %44 : vector<32x128xf32> to vector<32x128xbf16>
    %46 = vector.extract_strided_slice %41 {offsets = [0, 128], sizes = [32, 128], strides = [1, 1]} : vector<32x384xf32> to vector<32x128xf32>
    %47 = arith.truncf %46 : vector<32x128xf32> to vector<32x128xbf16>
    %48 = vector.extract_strided_slice %41 {offsets = [0, 256], sizes = [32, 128], strides = [1, 1]} : vector<32x384xf32> to vector<32x128xf32>
    %49 = arith.truncf %48 : vector<32x128xf32> to vector<32x128xbf16>
    %50 = vector.extract_strided_slice %45 {offsets = [0, 0], sizes = [16, 128], strides = [1, 1]} : vector<32x128xbf16> to vector<16x128xbf16>
    %51 = vector.shape_cast %50 : vector<16x128xbf16> to vector<16x4x32xbf16>
    %52 = vector.extract_strided_slice %47 {offsets = [0, 0], sizes = [16, 128], strides = [1, 1]} : vector<32x128xbf16> to vector<16x128xbf16>
    %53 = vector.shape_cast %52 : vector<16x128xbf16> to vector<16x4x32xbf16>
    %54 = vector.extract_strided_slice %49 {offsets = [0, 0], sizes = [16, 128], strides = [1, 1]} : vector<32x128xbf16> to vector<16x128xbf16>
    %55 = vector.shape_cast %54 : vector<16x128xbf16> to vector<16x4x32xbf16>
    "tpu.trace_start"() <{level = 10 : i32, message = "qhd,khd->hqk"}> : () -> ()
    %cst_14 = arith.constant dense<0.000000e+00> : vector<4x16x16xf32>
    %56 = tpu.matmul %51, %53, %cst_14 {dimension_numbers = #tpu.dot_dimension_numbers<[2], [2], [0], [0], [0, 1, 0, 0, 1, 0], [1], [1]>} : vector<16x4x32xbf16>, vector<16x4x32xbf16>, vector<4x16x16xf32> -> vector<4x16x16xf32>
    "tpu.trace_stop"() : () -> ()
    %cst_15 = arith.constant dense<0xFF800000> : vector<4x16xf32>
    %57 = vector.multi_reduction <maximumf>, %56, %cst_15 [2] : vector<4x16x16xf32> to vector<4x16xf32>
    %58 = vector.shape_cast %57 : vector<4x16xf32> to vector<4x16x1xf32>
    %59 = vector.broadcast %58 : vector<4x16x1xf32> to vector<4x16x16xf32>
    %60 = arith.subf %56, %59 : vector<4x16x16xf32>
    %61 = math.exp %60 : vector<4x16x16xf32>
    %cst_16 = arith.constant dense<0.000000e+00> : vector<4x16xf32>
    %62 = vector.multi_reduction <add>, %61, %cst_16 [2] : vector<4x16x16xf32> to vector<4x16xf32>
    %63 = vector.shape_cast %62 : vector<4x16xf32> to vector<4x16x1xf32>
    %64 = tpu.reciprocal %63 {approx = true} : vector<4x16x1xf32> -> vector<4x16x1xf32>
    %65 = vector.broadcast %64 : vector<4x16x1xf32> to vector<4x16x16xf32>
    %66 = arith.mulf %61, %65 : vector<4x16x16xf32>
    %67 = arith.truncf %66 : vector<4x16x16xf32> to vector<4x16x16xbf16>
    "tpu.trace_start"() <{level = 10 : i32, message = "hqk,khd->qhd"}> : () -> ()
    %cst_17 = arith.constant dense<0.000000e+00> : vector<4x32x16xf32>
    %68 = tpu.matmul %55, %67, %cst_17 {dimension_numbers = #tpu.dot_dimension_numbers<[0], [2], [2], [1], [0, 1, 0, 2, 1, 1], [1], [0]>} : vector<16x4x32xbf16>, vector<4x16x16xbf16>, vector<4x32x16xf32> -> vector<4x32x16xf32>
    %69 = tpu.transpose %68, [2, 0, 1] : vector<4x32x16xf32> -> vector<16x4x32xf32>
    "tpu.trace_stop"() : () -> ()
    %70 = vector.shape_cast %69 : vector<16x4x32xf32> to vector<16x128xf32>
    %71 = vector.extract_strided_slice %45 {offsets = [16, 0], sizes = [16, 128], strides = [1, 1]} : vector<32x128xbf16> to vector<16x128xbf16>
    %72 = vector.shape_cast %71 : vector<16x128xbf16> to vector<16x4x32xbf16>
    %73 = vector.extract_strided_slice %47 {offsets = [16, 0], sizes = [16, 128], strides = [1, 1]} : vector<32x128xbf16> to vector<16x128xbf16>
    %74 = vector.shape_cast %73 : vector<16x128xbf16> to vector<16x4x32xbf16>
    %75 = vector.extract_strided_slice %49 {offsets = [16, 0], sizes = [16, 128], strides = [1, 1]} : vector<32x128xbf16> to vector<16x128xbf16>
    %76 = vector.shape_cast %75 : vector<16x128xbf16> to vector<16x4x32xbf16>
    "tpu.trace_start"() <{level = 10 : i32, message = "qhd,khd->hqk"}> : () -> ()
    %cst_18 = arith.constant dense<0.000000e+00> : vector<4x16x16xf32>
    %77 = tpu.matmul %72, %74, %cst_18 {dimension_numbers = #tpu.dot_dimension_numbers<[2], [2], [0], [0], [0, 1, 0, 0, 1, 0], [1], [1]>} : vector<16x4x32xbf16>, vector<16x4x32xbf16>, vector<4x16x16xf32> -> vector<4x16x16xf32>
    "tpu.trace_stop"() : () -> ()
    %cst_19 = arith.constant dense<0xFF800000> : vector<4x16xf32>
    %78 = vector.multi_reduction <maximumf>, %77, %cst_19 [2] : vector<4x16x16xf32> to vector<4x16xf32>
    %79 = vector.shape_cast %78 : vector<4x16xf32> to vector<4x16x1xf32>
    %80 = vector.broadcast %79 : vector<4x16x1xf32> to vector<4x16x16xf32>
    %81 = arith.subf %77, %80 : vector<4x16x16xf32>
    %82 = math.exp %81 : vector<4x16x16xf32>
    %cst_20 = arith.constant dense<0.000000e+00> : vector<4x16xf32>
    %83 = vector.multi_reduction <add>, %82, %cst_20 [2] : vector<4x16x16xf32> to vector<4x16xf32>
    %84 = vector.shape_cast %83 : vector<4x16xf32> to vector<4x16x1xf32>
    %85 = tpu.reciprocal %84 {approx = true} : vector<4x16x1xf32> -> vector<4x16x1xf32>
    %86 = vector.broadcast %85 : vector<4x16x1xf32> to vector<4x16x16xf32>
    %87 = arith.mulf %82, %86 : vector<4x16x16xf32>
    %88 = arith.truncf %87 : vector<4x16x16xf32> to vector<4x16x16xbf16>
    "tpu.trace_start"() <{level = 10 : i32, message = "hqk,khd->qhd"}> : () -> ()
    %cst_21 = arith.constant dense<0.000000e+00> : vector<4x32x16xf32>
    %89 = tpu.matmul %76, %88, %cst_21 {dimension_numbers = #tpu.dot_dimension_numbers<[0], [2], [2], [1], [0, 1, 0, 2, 1, 1], [1], [0]>} : vector<16x4x32xbf16>, vector<4x16x16xbf16>, vector<4x32x16xf32> -> vector<4x32x16xf32>
    %90 = tpu.transpose %89, [2, 0, 1] : vector<4x32x16xf32> -> vector<16x4x32xf32>
    "tpu.trace_stop"() : () -> ()
    %91 = vector.shape_cast %90 : vector<16x4x32xf32> to vector<16x128xf32>
    %92 = tpu.concatenate %70, %91 in 0 : vector<16x128xf32>, vector<16x128xf32> -> vector<32x128xf32>
    %93 = arith.truncf %92 : vector<32x128xf32> to vector<32x128xbf16>
    %c0_22 = arith.constant 0 : index
    %c0_23 = arith.constant 0 : index
    %c0_24 = arith.constant 0 : index
    %94 = vector.load %arg8[%c0_22, %c0_23, %c0_24] : memref<1x128x128xbf16, #tpu.memory_space<vmem>>, vector<1x128x128xbf16>
    %95 = vector.shape_cast %94 : vector<1x128x128xbf16> to vector<128x128xbf16>
    %cst_25 = arith.constant dense<0.000000e+00> : vector<32x128xf32>
    %96 = tpu.matmul %93, %95, %cst_25 {dimension_numbers = #tpu.dot_dimension_numbers<[1], [0], [0], [1], [0, 0, 1, 1], [], []>} : vector<32x128xbf16>, vector<128x128xbf16>, vector<32x128xf32> -> vector<32x128xf32>
    %97 = vector.broadcast %9 : vector<1x128xf32> to vector<32x128xf32>
    %98 = arith.addf %96, %97 : vector<32x128xf32>
    %99 = arith.addf %3, %98 : vector<32x128xf32>
    %cst_26 = arith.constant dense<0.000000e+00> : vector<32xf32>
    %100 = vector.multi_reduction <add>, %99, %cst_26 [1] : vector<32x128xf32> to vector<32xf32>
    %101 = vector.shape_cast %100 : vector<32xf32> to vector<32x1xf32>
    %cst_27 = arith.constant 1.280000e+02 : f32
    %102 = vector.broadcast %cst_27 : f32 to vector<32x1xf32>
    %103 = arith.divf %101, %102 : vector<32x1xf32>
    %104 = vector.broadcast %103 : vector<32x1xf32> to vector<32x128xf32>
    %105 = arith.subf %99, %104 : vector<32x128xf32>
    %106 = arith.mulf %105, %105 : vector<32x128xf32>
    %cst_28 = arith.constant dense<0.000000e+00> : vector<32xf32>
    %107 = vector.multi_reduction <add>, %106, %cst_28 [1] : vector<32x128xf32> to vector<32xf32>
    %108 = vector.shape_cast %107 : vector<32xf32> to vector<32x1xf32>
    %cst_29 = arith.constant 1.280000e+02 : f32
    %109 = vector.broadcast %cst_29 : f32 to vector<32x1xf32>
    %110 = arith.divf %108, %109 : vector<32x1xf32>
    %111 = vector.broadcast %103 : vector<32x1xf32> to vector<32x128xf32>
    %112 = arith.subf %99, %111 : vector<32x128xf32>
    %cst_30 = arith.constant 9.99999974E-6 : f32
    %113 = vector.broadcast %cst_30 : f32 to vector<32x1xf32>
    %114 = arith.addf %110, %113 : vector<32x1xf32>
    %115 = math.rsqrt %114 : vector<32x1xf32>
    %116 = vector.broadcast %115 : vector<32x1xf32> to vector<32x128xf32>
    %117 = arith.mulf %112, %116 : vector<32x128xf32>
    %118 = vector.broadcast %10 : vector<1x128xf32> to vector<32x128xf32>
    %119 = arith.mulf %117, %118 : vector<32x128xf32>
    %120 = vector.broadcast %11 : vector<1x128xf32> to vector<32x128xf32>
    %121 = arith.addf %119, %120 : vector<32x128xf32>
    %122 = arith.truncf %121 : vector<32x128xf32> to vector<32x128xbf16>
    %c0_31 = arith.constant 0 : index
    %c0_32 = arith.constant 0 : index
    %c0_33 = arith.constant 0 : index
    %123 = vector.load %arg9[%c0_31, %c0_32, %c0_33] : memref<1x128x512xbf16, #tpu.memory_space<vmem>>, vector<1x128x512xbf16>
    %124 = vector.shape_cast %123 : vector<1x128x512xbf16> to vector<128x512xbf16>
    %cst_34 = arith.constant dense<0.000000e+00> : vector<32x512xf32>
    %125 = tpu.matmul %122, %124, %cst_34 {dimension_numbers = #tpu.dot_dimension_numbers<[1], [0], [0], [1], [0, 0, 1, 1], [], []>} : vector<32x128xbf16>, vector<128x512xbf16>, vector<32x512xf32> -> vector<32x512xf32>
    %126 = vector.broadcast %12 : vector<1x512xf32> to vector<32x512xf32>
    %127 = arith.addf %125, %126 : vector<32x512xf32>
    %cst_35 = arith.constant 5.000000e-01 : f32
    %128 = vector.broadcast %cst_35 : f32 to vector<32x512xf32>
    %129 = arith.mulf %128, %127 : vector<32x512xf32>
    %cst_36 = arith.constant 4.471500e-02 : f32
    %130 = vector.broadcast %cst_36 : f32 to vector<32x512xf32>
    %131 = arith.mulf %130, %127 : vector<32x512xf32>
    %132 = arith.mulf %131, %127 : vector<32x512xf32>
    %133 = arith.mulf %132, %127 : vector<32x512xf32>
    %134 = arith.addf %127, %133 : vector<32x512xf32>
    %cst_37 = arith.constant 0.797884583 : f32
    %135 = vector.broadcast %cst_37 : f32 to vector<32x512xf32>
    %136 = arith.mulf %135, %134 : vector<32x512xf32>
    %137 = math.tanh %136 : vector<32x512xf32>
    %cst_38 = arith.constant 1.000000e+00 : f32
    %138 = vector.broadcast %cst_38 : f32 to vector<32x512xf32>
    %139 = arith.addf %138, %137 : vector<32x512xf32>
    %140 = arith.mulf %129, %139 : vector<32x512xf32>
    %141 = arith.truncf %140 : vector<32x512xf32> to vector<32x512xbf16>
    %c0_39 = arith.constant 0 : index
    %c0_40 = arith.constant 0 : index
    %c0_41 = arith.constant 0 : index
    %142 = vector.load %arg10[%c0_39, %c0_40, %c0_41] : memref<1x512x128xbf16, #tpu.memory_space<vmem>>, vector<1x512x128xbf16>
    %143 = vector.shape_cast %142 : vector<1x512x128xbf16> to vector<512x128xbf16>
    %cst_42 = arith.constant dense<0.000000e+00> : vector<32x128xf32>
    %144 = tpu.matmul %141, %143, %cst_42 {dimension_numbers = #tpu.dot_dimension_numbers<[1], [0], [0], [1], [0, 0, 1, 1], [], []>} : vector<32x512xbf16>, vector<512x128xbf16>, vector<32x128xf32> -> vector<32x128xf32>
    %145 = vector.broadcast %13 : vector<1x128xf32> to vector<32x128xf32>
    %146 = arith.addf %144, %145 : vector<32x128xf32>
    %147 = arith.addf %99, %146 : vector<32x128xf32>
    %c0_43 = arith.constant 0 : index
    %c0_44 = arith.constant 0 : index
    %148 = vector.load %arg16[%c0_43, %c0_44] : memref<32x128xf32, #tpu.memory_space<vmem>>, vector<32x128xf32>
    tpu.vector_store %arg16[%c0_43, %c0_44], %147 {strides = array<i32>} : memref<32x128xf32, #tpu.memory_space<vmem>>, vector<32x128xf32>,
    %149 = vector.extract_strided_slice %99 {offsets = [0, 0], sizes = [16, 128], strides = [1, 1]} : vector<32x128xf32> to vector<16x128xf32>
    %150 = arith.truncf %149 : vector<16x128xf32> to vector<16x128xbf16>
    %c0_45 = arith.constant 0 : index
    %c0_46 = arith.constant 0 : index
    %c0_47 = arith.constant 0 : index
    %c0_48 = arith.constant 0 : index
    %151 = vector.load %arg13[%c0_45, %c0_46, %c0_47, %c0_48] : memref<2x1x16x128xbf16, #tpu.memory_space<vmem>>, vector<1x1x16x128xbf16>
    %152 = vector.shape_cast %151 : vector<1x1x16x128xbf16> to vector<16x128xbf16>
    %153 = vector.shape_cast %150 : vector<16x128xbf16> to vector<1x1x16x128xbf16>
    tpu.vector_store %arg13[%c0_45, %c0_46, %c0_47, %c0_48], %153 {strides = array<i32>} : memref<2x1x16x128xbf16, #tpu.memory_space<vmem>>, vector<1x1x16x128xbf16>,
    %154 = vector.extract_strided_slice %147 {offsets = [0, 0], sizes = [16, 128], strides = [1, 1]} : vector<32x128xf32> to vector<16x128xf32>
    %155 = arith.truncf %154 : vector<16x128xf32> to vector<16x128xbf16>
    %c0_49 = arith.constant 0 : index
    %c0_50 = arith.constant 0 : index
    %c0_51 = arith.constant 0 : index
    %c0_52 = arith.constant 0 : index
    %156 = vector.load %arg14[%c0_49, %c0_50, %c0_51, %c0_52] : memref<2x1x16x128xbf16, #tpu.memory_space<vmem>>, vector<1x1x16x128xbf16>
    %157 = vector.shape_cast %156 : vector<1x1x16x128xbf16> to vector<16x128xbf16>
    %158 = vector.shape_cast %155 : vector<16x128xbf16> to vector<1x1x16x128xbf16>
    tpu.vector_store %arg14[%c0_49, %c0_50, %c0_51, %c0_52], %158 {strides = array<i32>} : memref<2x1x16x128xbf16, #tpu.memory_space<vmem>>, vector<1x1x16x128xbf16>,
    %159 = vector.extract_strided_slice %99 {offsets = [16, 0], sizes = [16, 128], strides = [1, 1]} : vector<32x128xf32> to vector<16x128xf32>
    %160 = arith.truncf %159 : vector<16x128xf32> to vector<16x128xbf16>
    %c1 = arith.constant 1 : index
    %c0_53 = arith.constant 0 : index
    %c0_54 = arith.constant 0 : index
    %c0_55 = arith.constant 0 : index
    %161 = vector.load %arg13[%c1, %c0_53, %c0_54, %c0_55] : memref<2x1x16x128xbf16, #tpu.memory_space<vmem>>, vector<1x1x16x128xbf16>
    %162 = vector.shape_cast %161 : vector<1x1x16x128xbf16> to vector<16x128xbf16>
    %163 = vector.shape_cast %160 : vector<16x128xbf16> to vector<1x1x16x128xbf16>
    tpu.vector_store %arg13[%c1, %c0_53, %c0_54, %c0_55], %163 {strides = array<i32>} : memref<2x1x16x128xbf16, #tpu.memory_space<vmem>>, vector<1x1x16x128xbf16>,
    %164 = vector.extract_strided_slice %147 {offsets = [16, 0], sizes = [16, 128], strides = [1, 1]} : vector<32x128xf32> to vector<16x128xf32>
    %165 = arith.truncf %164 : vector<16x128xf32> to vector<16x128xbf16>
    %c1_56 = arith.constant 1 : index
    %c0_57 = arith.constant 0 : index
    %c0_58 = arith.constant 0 : index
    %c0_59 = arith.constant 0 : index
    %166 = vector.load %arg14[%c1_56, %c0_57, %c0_58, %c0_59] : memref<2x1x16x128xbf16, #tpu.memory_space<vmem>>, vector<1x1x16x128xbf16>
    %167 = vector.shape_cast %166 : vector<1x1x16x128xbf16> to vector<16x128xbf16>
    %168 = vector.shape_cast %165 : vector<16x128xbf16> to vector<1x1x16x128xbf16>
    tpu.vector_store %arg14[%c1_56, %c0_57, %c0_58, %c0_59], %168 {strides = array<i32>} : memref<2x1x16x128xbf16, #tpu.memory_space<vmem>>, vector<1x1x16x128xbf16>,
    %c1_i32 = arith.constant 1 : i32
    %169 = arith.cmpi eq, %arg1, %c1_i32 : i32
    %170 = arith.extui %169 : i1 to i32
    %c0_i32_60 = arith.constant 0 : i32
    %171 = arith.cmpi ne, %170, %c0_i32_60 : i32
    scf.if %171 {
      %c0_61 = arith.constant 0 : index
      %c0_62 = arith.constant 0 : index
      %172 = vector.load %arg11[%c0_61, %c0_62] : memref<1x128xf32, #tpu.memory_space<vmem>>, vector<1x128xf32>
      %c0_63 = arith.constant 0 : index
      %c0_64 = arith.constant 0 : index
      %173 = vector.load %arg12[%c0_63, %c0_64] : memref<1x128xf32, #tpu.memory_space<vmem>>, vector<1x128xf32>
      %cst_65 = arith.constant dense<0.000000e+00> : vector<32xf32>
      %174 = vector.multi_reduction <add>, %147, %cst_65 [1] : vector<32x128xf32> to vector<32xf32>
      %175 = vector.shape_cast %174 : vector<32xf32> to vector<32x1xf32>
      %cst_66 = arith.constant 1.280000e+02 : f32
      %176 = vector.broadcast %cst_66 : f32 to vector<32x1xf32>
      %177 = arith.divf %175, %176 : vector<32x1xf32>
      %178 = vector.broadcast %177 : vector<32x1xf32> to vector<32x128xf32>
      %179 = arith.subf %147, %178 : vector<32x128xf32>
      %180 = arith.mulf %179, %179 : vector<32x128xf32>
      %cst_67 = arith.constant dense<0.000000e+00> : vector<32xf32>
      %181 = vector.multi_reduction <add>, %180, %cst_67 [1] : vector<32x128xf32> to vector<32xf32>
      %182 = vector.shape_cast %181 : vector<32xf32> to vector<32x1xf32>
      %cst_68 = arith.constant 1.280000e+02 : f32
      %183 = vector.broadcast %cst_68 : f32 to vector<32x1xf32>
      %184 = arith.divf %182, %183 : vector<32x1xf32>
      %185 = vector.broadcast %177 : vector<32x1xf32> to vector<32x128xf32>
      %186 = arith.subf %147, %185 : vector<32x128xf32>
      %cst_69 = arith.constant 9.99999974E-6 : f32
      %187 = vector.broadcast %cst_69 : f32 to vector<32x1xf32>
      %188 = arith.addf %184, %187 : vector<32x1xf32>
      %189 = math.rsqrt %188 : vector<32x1xf32>
      %190 = vector.broadcast %189 : vector<32x1xf32> to vector<32x128xf32>
      %191 = arith.mulf %186, %190 : vector<32x128xf32>
      %192 = vector.broadcast %172 : vector<1x128xf32> to vector<32x128xf32>
      %193 = arith.mulf %191, %192 : vector<32x128xf32>
      %194 = vector.broadcast %173 : vector<1x128xf32> to vector<32x128xf32>
      %195 = arith.addf %193, %194 : vector<32x128xf32>
      %196 = vector.extract_strided_slice %195 {offsets = [0, 0], sizes = [16, 128], strides = [1, 1]} : vector<32x128xf32> to vector<16x128xf32>
      %c0_70 = arith.constant 0 : index
      %c0_71 = arith.constant 0 : index
      %c0_72 = arith.constant 0 : index
      %197 = vector.load %arg15[%c0_70, %c0_71, %c0_72] : memref<2x16x128xf32, #tpu.memory_space<vmem>>, vector<1x16x128xf32>
      %198 = vector.shape_cast %197 : vector<1x16x128xf32> to vector<16x128xf32>
      %199 = vector.shape_cast %196 : vector<16x128xf32> to vector<1x16x128xf32>
      tpu.vector_store %arg15[%c0_70, %c0_71, %c0_72], %199 {strides = array<i32>} : memref<2x16x128xf32, #tpu.memory_space<vmem>>, vector<1x16x128xf32>,
      %200 = vector.extract_strided_slice %195 {offsets = [16, 0], sizes = [16, 128], strides = [1, 1]} : vector<32x128xf32> to vector<16x128xf32>
      %c1_73 = arith.constant 1 : index
      %c0_74 = arith.constant 0 : index
      %c0_75 = arith.constant 0 : index
      %201 = vector.load %arg15[%c1_73, %c0_74, %c0_75] : memref<2x16x128xf32, #tpu.memory_space<vmem>>, vector<1x16x128xf32>
      %202 = vector.shape_cast %201 : vector<1x16x128xf32> to vector<16x128xf32>
      %203 = vector.shape_cast %200 : vector<16x128xf32> to vector<1x16x128xf32>
      tpu.vector_store %arg15[%c1_73, %c0_74, %c0_75], %203 {strides = array<i32>} : memref<2x16x128xf32, #tpu.memory_space<vmem>>, vector<1x16x128xf32>,
    } else {
    }
    return
  }
  func.func @transform_0(%arg0: i32, %arg1: i32) -> (i32, i32, i32) {
    %c0_i32 = arith.constant 0 : i32
    %c0_i32_0 = arith.constant 0 : i32
    %c0_i32_1 = arith.constant 0 : i32
    return %arg0, %c0_i32, %c0_i32_0 : i32, i32, i32
  }
  func.func @transform_1(%arg0: i32, %arg1: i32) -> (i32, i32) {
    %c0_i32 = arith.constant 0 : i32
    %c0_i32_0 = arith.constant 0 : i32
    %c0_i32_1 = arith.constant 0 : i32
    return %c0_i32, %c0_i32_0 : i32, i32
  }
  func.func @transform_2(%arg0: i32, %arg1: i32) -> (i32, i32) {
    %c0_i32 = arith.constant 0 : i32
    %c0_i32_0 = arith.constant 0 : i32
    %c0_i32_1 = arith.constant 0 : i32
    return %c0_i32, %c0_i32_0 : i32, i32
  }
  func.func @transform_3(%arg0: i32, %arg1: i32) -> (i32, i32) {
    %c0_i32 = arith.constant 0 : i32
    %c0_i32_0 = arith.constant 0 : i32
    %c0_i32_1 = arith.constant 0 : i32
    return %c0_i32, %c0_i32_0 : i32, i32
  }
  func.func @transform_4(%arg0: i32, %arg1: i32) -> (i32, i32, i32) {
    %c0_i32 = arith.constant 0 : i32
    %c0_i32_0 = arith.constant 0 : i32
    %c0_i32_1 = arith.constant 0 : i32
    return %arg1, %c0_i32, %c0_i32_0 : i32, i32, i32
  }
  func.func @transform_5(%arg0: i32, %arg1: i32) -> (i32, i32, i32) {
    %c0_i32 = arith.constant 0 : i32
    %c0_i32_0 = arith.constant 0 : i32
    %c0_i32_1 = arith.constant 0 : i32
    return %arg1, %c0_i32, %c0_i32_0 : i32, i32, i32
  }
  func.func @transform_6(%arg0: i32, %arg1: i32) -> (i32, i32, i32) {
    %c0_i32 = arith.constant 0 : i32
    %c0_i32_0 = arith.constant 0 : i32
    %c0_i32_1 = arith.constant 0 : i32
    return %arg1, %c0_i32, %c0_i32_0 : i32, i32, i32
  }
  func.func @transform_7(%arg0: i32, %arg1: i32) -> (i32, i32, i32) {
    %c0_i32 = arith.constant 0 : i32
    %c0_i32_0 = arith.constant 0 : i32
    %c0_i32_1 = arith.constant 0 : i32
    return %arg1, %c0_i32, %c0_i32_0 : i32, i32, i32
  }
  func.func @transform_8(%arg0: i32, %arg1: i32) -> (i32, i32, i32) {
    %c0_i32 = arith.constant 0 : i32
    %c0_i32_0 = arith.constant 0 : i32
    %c0_i32_1 = arith.constant 0 : i32
    return %arg1, %c0_i32, %c0_i32_0 : i32, i32, i32
  }
  func.func @transform_9(%arg0: i32, %arg1: i32) -> (i32, i32) {
    %c0_i32 = arith.constant 0 : i32
    %c0_i32_0 = arith.constant 0 : i32
    %c0_i32_1 = arith.constant 0 : i32
    return %c0_i32, %c0_i32_0 : i32, i32
  }
  func.func @transform_10(%arg0: i32, %arg1: i32) -> (i32, i32) {
    %c0_i32 = arith.constant 0 : i32
    %c0_i32_0 = arith.constant 0 : i32
    %c0_i32_1 = arith.constant 0 : i32
    return %c0_i32, %c0_i32_0 : i32, i32
  }
  func.func @transform_11(%arg0: i32, %arg1: i32) -> (i32, i32, i32, i32) {
    %c0_i32 = arith.constant 0 : i32
    %c0_i32_0 = arith.constant 0 : i32
    %c0_i32_1 = arith.constant 0 : i32
    return %arg0, %arg1, %c0_i32, %c0_i32_0 : i32, i32, i32, i32
  }
  func.func @transform_12(%arg0: i32, %arg1: i32) -> (i32, i32, i32, i32) {
    %c0_i32 = arith.constant 0 : i32
    %c0_i32_0 = arith.constant 0 : i32
    %c0_i32_1 = arith.constant 0 : i32
    return %arg0, %arg1, %c0_i32, %c0_i32_0 : i32, i32, i32, i32
  }
  func.func @transform_13(%arg0: i32, %arg1: i32) -> (i32, i32, i32) {
    %c0_i32 = arith.constant 0 : i32
    %c0_i32_0 = arith.constant 0 : i32
    %c0_i32_1 = arith.constant 0 : i32
    return %arg0, %c0_i32, %c0_i32_0 : i32, i32, i32
  }
}

</mosaic_0001>

<bundles_post_ra>
// kernel: tpu_custom_call.1
= control target key start
LH: loop header
LB: loop body
LE: loop exit
PB: predicated region body
PF: predicated region fallthrough
CT: control target
= control target key end

     0   :  { %s7500_s0 = inlined_call_operand.hbm [shape: bf16[2,16,64], index: 0, kind: input, shape index: {}]   ;;  %s7501_s1 = inlined_call_operand.hbm [shape: bf16[64,128], index: 1, kind: input, shape index: {}]   ;;  %s7502_s2 = inlined_call_operand.vmem [shape: f32[1,128], index: 2, kind: input, shape index: {}]   ;;  %s7503_s3 = inlined_call_operand.hbm [shape: f32[16,128], index: 3, kind: input, shape index: {}]   ;;  %s7504_s4 = inlined_call_operand.hbm [shape: f32[2,8,512], index: 4, kind: input, shape index: {}]   ;;  %s7505_s5 = inlined_call_operand.hbm [shape: bf16[2,128,384], index: 5, kind: input, shape index: {}]   ;;  %s7506_s6 = inlined_call_operand.hbm [shape: bf16[2,128,128], index: 6, kind: input, shape index: {}]   ;;  %s7507_s7 = inlined_call_operand.hbm [shape: bf16[2,128,512], index: 7, kind: input, shape index: {}]   ;;  %s7508_s8 = inlined_call_operand.hbm [shape: bf16[2,512,128], index: 8, kind: input, shape index: {}]   ;;  %s7509_s9 = inlined_call_operand.vmem [shape: f32[1,128], index: 9, kind: input, shape index: {}]   ;;  %s7510_s10 = inlined_call_operand.vmem [shape: f32[1,128], index: 10, kind: input, shape index: {}]   ;;  %s7511_s11 = inlined_call_operand.hbm [shape: bf16[2,2,16,128], index: 11, kind: output, shape index: {0}]   ;;  %s7512_s12 = inlined_call_operand.hbm [shape: bf16[2,2,16,128], index: 12, kind: output, shape index: {1}]   ;;  %s7513_s13 = inlined_call_operand.hbm [shape: f32[2,16,128], index: 13, kind: output, shape index: {2}]  }
   0x1   :  { %7542 = sst [smem:[#allocation42_spill]] %s7501_s1 }
   0x2   :  { %7543 = sst [smem:[#allocation43_spill]] %s7502_s2 }
   0x3   :  { %7544 = sst [smem:[#allocation44_spill]] %s7504_s4 }
   0x4   :  { %7545 = sst [smem:[#allocation45_spill]] %s7506_s6 }
   0x5   :  { %7546 = sst [smem:[#allocation46_spill]] %s7509_s9 }
   0x6   :  { %7547 = sst [smem:[#allocation47_spill]] %s7510_s10 }
   0x7   :  { %7548 = sst [smem:[#allocation48_spill]] %s7511_s11 }
   0x8   :  { %7549 = sst [smem:[#allocation49_spill]] %s7512_s12 }
   0x9   :  { %7550 = sst [smem:[#allocation50_spill]] %s7513_s13 }
   0xa   :  { %19 = vsyncpa [#allocation4], 0 }
   0xb   :  { %20 = vsyncpa [#allocation7], 0 }
   0xc   :  { %21 = vsyncpa [#allocation10], 0 }
   0xd   :  { %23 = vsyncpa [#allocation10 + $0x1], 0 }
   0xe   :  { %24 = vsyncpa [#allocation13], 0 }
   0xf   :  { %26 = vsyncpa [#allocation13 + $0x1], 0 }
  0x10   :  { %27 = vsyncpa [#allocation16], 0 }
  0x11   :  { %29 = vsyncpa [#allocation16 + $0x1], 0 }
  0x12   :  { %30 = vsyncpa [#allocation5], 0 }
  0x13   :  { %32 = vsyncpa [#allocation5 + $0x1], 0 }
  0x14   :  { %33 = vsyncpa [#allocation19], 0 }
  0x15   :  { %35 = vsyncpa [#allocation19 + $0x1], 0  ;;  %s6341_s25 = smov 0   ;;  %s6343_s26 = smov 0  }
  0x16   :  { %s6345_s27 = smov 0   ;;  %s6347_s28 = smov 0  }
  0x17   :  { %s6349_s29 = smov 0   ;;  %s6351_s30 = smov 0  }
  0x18 LB: > { %7551 = sst [smem:[#allocation33_spill]] %s6206_s25  ;;  %s6372_s14 = sadd.s32 4294967295, %s6226_s30   ;;  %s6226_s30 = sphi %s6351_s30, %s41_s30   ;;  %s6222_s29 = sphi %s6349_s29, %s7617_s29   ;;  %s6218_s28 = sphi %s6347_s28, %s7616_s28   ;;  %s6214_s27 = sphi %s6345_s27, %s7612_s27   ;;  %s6210_s26 = sphi %s6343_s26, %s7615_s26   ;;  %s6206_s25 = sphi %s6341_s25, %s7614_s25  }
  0x19   : > { %7552 = sst [smem:[#allocation34_spill]] %s6214_s27  ;;  %s7514_s15 = sadd.s32 4294967294, %s6226_s30  }
  0x1a   : > { %7553 = sst [smem:[#allocation35_spill]] %s6218_s28  ;;  %p162_p0 = scmp.ne.s32.totalorder %s6210_s26, %s6206_s25 }
  0x1b   : > { %7554 = sst [smem:[#allocation36_spill]] %s6226_s30  ;;  %p7518_p1 = scmp.eq.s32.totalorder %s6372_s14, 0 }
  0x1c   : > { %p340_p3 = scmp.eq.s32.totalorder %s7514_s15, 1  ;;  %p4886_p5 = scmp.ge.s32.totalorder %s6226_s30, 1 }
  0x1d   : > { %p6383_p4 = por %p7518_p1, %p162_p0  ;;  %p401_p7 = scmp.lt.s32.totalorder %s6226_s30, 3 }
  0x1e   : > { %p6388_p6 = por %p340_p3, %p162_p0  ;;  %s6228_s19 = smov [#allocation6]  }
  0x1f   : > { %s7555_s16 = scalar_select %p6383_p4, 1, 0 }
  0x20   : > { %s7557_s17 = scalar_select %p6388_p6, 1, 0 }
  0x21   : > { %7556 = sst [smem:[#allocation37_spill]] %s7555_s16  ;;  %p6393_p8 = pnand %p4886_p5, %p401_p7 }
  0x22   : > { %7558 = sst [smem:[#allocation38_spill]] %s7557_s17  ;;  %s430_s20 = sshll.u32 %s6228_s19, 4  ;;  %s431_s20 = int_to_ptr.vmem [resolvable:$true] %s430_s20 }
  0x23   : > { %s7559_s18 = scalar_select %p6393_p8, 1, 0 }
  0x24   : > { %p5476_p10 = pneg %p6393_p8  ;;  %s50_s22 = sadd.s32 1, %s6222_s29 }
  0x25   : > { %s7561_s1 = sld [smem:[#allocation42_spill]] }
  0x26   : > { %p6402_p11 = pnand %p5476_p10, %p7518_p1 }
  0x28   : > { %s7560_s21 = scalar_select %p6402_p11, 1, 0 }
  0x29   : > { %p6415_p13 = pneg %p6402_p11 }
  0x2b   : > { %s5888_s15 = scalar_lea.hbm %s7561_s1, 512 }
  0x2c   : > { %p5889_p12 = scmp.ne.s32.totalorder %s7561_s1, %s5888_s15  ;;  %p5895_p5 = scmp.lt.u32.totalorder %s5888_s15, %s7561_s1 }
  0x2d   : > { %s7562_s13 = scalar_select %p6415_p13, 1, 0 }
  0x2e   : > { %p5891_p0 = pnand %p6415_p13, %p5889_p12 }
  0x30   : > { %p5892_p3 = pneg %p5891_p0 }
  0x32   : > { %p5897_p7 = pnand %p5895_p5, %p5892_p3 }
  0x34   : > { %5900 = shalt.err (!%p5897_p7)
}
  0x35   : > { %s5901_s23 = scalar_lea.vmem %s431_s20, 512  ;;  %p5909_p2 = scmp.lt.s32.totalorder %s431_s20, %s431_s20 }
  0x36   : > { %p5902_p10 = scmp.ne.s32.totalorder %s431_s20, %s5901_s23  ;;  %p5910_p6 = scmp.lt.s32.totalorder %s5901_s23, %s5901_s23 }
  0x38   : > { %p5904_p9 = pnand %p5902_p10, %p6415_p13  ;;  %p5911_p4 = por %p5910_p6, %p5909_p2 }
  0x3a   : > { %p5905_p1 = pneg %p5904_p9 }
  0x3c   : > { %p5912_p8 = pnand %p5911_p4, %p5905_p1 }
  0x3e   : > { %5915 = shalt.err (!%p5912_p8)
}
  0x3f   : > { %s7521_s25 = smov 64   ;;  %s7523_s12 = smov 4  }
  0x40   : > { %5482 = dma.hbm_to_vmem [thread:$0]  (!%p6402_p11), %s7561_s1, 512, %s431_s20, [#allocation7], %s7521_s25, %s7521_s25, %s7523_s12  }
  0x41   : > { %p51_p1 = scmp.ge.s32.totalorder %s50_s22, 2  ;;  %s149_s24 = sadd.s32 1, %s6214_s27 }
  0x42   : > { %p156_p2 = scmp.ne.s32.totalorder %s6214_s27, %s6210_s26  ;;  %p157_p4 = scmp.eq.s32.totalorder %s6226_s30, 0 }
  0x43   : > { %s7619_s22 = smov (%p51_p1, %s50_s22), 0  ;;  %p7565_p8 = scmp.eq.s32.totalorder %s6372_s14, 1 }
  0x44   : > { %7563 = sst [smem:[#allocation39_spill]] %s7619_s22  ;;  %p6440_p6 = por %p157_p4, %p156_p2 }
  0x45   : > { %p6446_p9 = por %p7565_p8, %p156_p2  ;;  %s146_s15 = ssub.s32 %s6222_s29, %s7619_s22 }
  0x46   : > { %p5512_p12 = scmp.lt.s32.totalorder %s6226_s30, 2  ;;  %p147_p0 = scmp.eq.s32.totalorder %s146_s15, 0 }
  0x47   : > { %s7566_s23 = scalar_select %p6446_p9, 1, 0 }
  0x48   : > { %s6455_s17 = sand.u32 1, %s6214_s27   ;;  %s5077_s1 = sshll.u32 %s6222_s29, 9 }
  0x49   : > { %7567 = sst [smem:[#allocation40_spill]] %s7566_s23  ;;  %s4891_s12 = sshll.u32 %s6455_s17, 5 }
  0x4a   : > { %s6458_s25 = scalar_select %p147_p0, %s6214_s27, %s149_s24  }
  0x4b   : > { %s7569_s4 = sld [smem:[#allocation44_spill]]  ;;  %s470_s22 = scalar_lea.vmem [#allocation9], %s4891_s12 }
  0x4c   : > { %7568 = sst [smem:[#allocation41_spill]] %s6458_s25  ;;  %s478_s15 = sshll.u32 %s470_s22, 4  ;;  %s6473_s15 = int_to_ptr.vmem [resolvable:$true] %s478_s15 }
  0x4d   : > { %p6469_p3 = pnand %p5512_p12, %p6440_p6  ;;  %s7571_s25 = sand.u32 1, %s6226_s30  }
  0x4e   : > { %s6478_s27 = scalar_lea.sflag [#allocation10], %s7571_s25 }
  0x4f   : > { %s7570_s20 = scalar_select %p6469_p3, 1, 0 }
  0x50   : > { %p6484_p7 = pneg %p6469_p3 }
  0x51   : > { %s6465_s9 = scalar_lea.hbm %s7569_s4, %s5077_s1  ;;  %s5921_s12 = scalar_lea.hbm %s7569_s4, 1024 }
  0x52   : > { %s5916_s1 = scalar_lea.hbm %s6465_s9, 512  ;;  %p5922_p2 = scmp.lt.u32.totalorder %s6465_s9, %s7569_s4 }
  0x53   : > { %p5917_p5 = scmp.ne.s32.totalorder %s6465_s9, %s5916_s1  ;;  %p5923_p4 = scmp.lt.u32.totalorder %s5921_s12, %s5916_s1 }
  0x54   : > { %s7572_s10 = scalar_select %p6484_p7, 1, 0 }
  0x55   : > { %p5919_p10 = pnand %p6484_p7, %p5917_p5  ;;  %p5924_p6 = por %p5923_p4, %p5922_p2 }
  0x56   : > { %p5925_p8 = scmp.lt.u32.totalorder %s5916_s1, %s6465_s9 }
  0x57   : > { %p5920_p1 = pneg %p5919_p10 }
  0x58   : > { %p5926_p12 = por %p5925_p8, %p5924_p6 }
  0x5a   : > { %p5927_p0 = pnand %p5926_p12, %p5920_p1 }
  0x5c   : > { %5930 = shalt.err (!%p5927_p0)
}
  0x5d   : > { %s5931_s25 = scalar_lea.vmem %s6473_s15, 512  ;;  %s6231_s11 = smov [#allocation9]  }
  0x5e   : > { %p5932_p5 = scmp.ne.s32.totalorder %s6473_s15, %s5931_s25  ;;  %s5936_s22 = sshll.u32 %s6231_s11, 4  ;;  %s5937_s22 = int_to_ptr.vmem [resolvable:$false] %s5936_s22 }
  0x5f   : > { %s5938_s24 = scalar_lea.vmem %s5937_s22, 1024  ;;  %p5939_p11 = scmp.lt.s32.totalorder %s6473_s15, %s5937_s22 }
  0x60   : > { %p5934_p10 = pnand %p5932_p5, %p6484_p7  ;;  %p5940_p13 = scmp.lt.s32.totalorder %s5938_s24, %s5931_s25 }
  0x62   : > { %p5935_p9 = pneg %p5934_p10  ;;  %p5941_p2 = por %p5940_p13, %p5939_p11 }
  0x64   : > { %p5942_p4 = pnand %p5941_p2, %p5935_p9 }
  0x66   : > { %5945 = shalt.err (!%p5942_p4)
}
  0x67   : > { %5489 = dma.hbm_to_vmem [thread:$0]  (!%p6469_p3), %s6465_s9, 512, %s6473_s15, %s6478_s27  }
  0x68   : > { %s5078_s1 = sshll.u32 %s6222_s29, 10  ;;  %s7573_s6 = sld [smem:[#allocation45_spill]] }
  0x69   : > { %s7574_s25 = sshll.u32 %s6455_s17, 6  ;;  %s7575_s4 = sand.u32 1, %s6226_s30  }
  0x6a   : > { %s510_s22 = scalar_lea.vmem [#allocation12], %s7574_s25  ;;  %s6520_s23 = scalar_lea.sflag [#allocation13], %s7575_s4 }
  0x6b   : > { %s517_s24 = sshll.u32 %s510_s22, 4  ;;  %s6516_s24 = int_to_ptr.vmem [resolvable:$true] %s517_s24 }
  0x6e   : > { %s6512_s11 = scalar_lea.hbm %s7573_s6, %s5078_s1  ;;  %s5951_s1 = scalar_lea.hbm %s7573_s6, 2048 }
  0x6f   : > { %s5946_s2 = scalar_lea.hbm %s6512_s11, 1024  ;;  %p5952_p1 = scmp.lt.u32.totalorder %s6512_s11, %s7573_s6 }
  0x70   : > { %p5947_p11 = scmp.ne.s32.totalorder %s6512_s11, %s5946_s2  ;;  %p5953_p6 = scmp.lt.u32.totalorder %s5951_s1, %s5946_s2 }
  0x71   : > { %p5955_p12 = scmp.lt.u32.totalorder %s5946_s2, %s6512_s11 }
  0x72   : > { %p5949_p13 = pnand %p5947_p11, %p6484_p7  ;;  %p5954_p8 = por %p5953_p6, %p5952_p1 }
  0x74   : > { %p5950_p9 = pneg %p5949_p13  ;;  %p5956_p0 = por %p5955_p12, %p5954_p8 }
  0x76   : > { %p5957_p5 = pnand %p5956_p0, %p5950_p9 }
  0x78   : > { %5960 = shalt.err (!%p5957_p5)
}
  0x79   : > { %s5961_s4 = scalar_lea.vmem %s6516_s24, 1024  ;;  %s6232_s25 = smov [#allocation12]  }
  0x7a   : > { %p5962_p10 = scmp.ne.s32.totalorder %s6516_s24, %s5961_s4  ;;  %s5966_s22 = sshll.u32 %s6232_s25, 4  ;;  %s5967_s22 = int_to_ptr.vmem [resolvable:$false] %s5966_s22 }
  0x7b   : > { %s5968_s9 = scalar_lea.vmem %s5967_s22, 2048  ;;  %p5969_p11 = scmp.lt.s32.totalorder %s6516_s24, %s5967_s22 }
  0x7c   : > { %p5964_p2 = pnand %p5962_p10, %p6484_p7  ;;  %p5970_p13 = scmp.lt.s32.totalorder %s5968_s9, %s5961_s4 }
  0x7e   : > { %p5965_p4 = pneg %p5964_p2  ;;  %p5971_p1 = por %p5970_p13, %p5969_p11 }
  0x80   : > { %p5972_p6 = pnand %p5971_p1, %p5965_p4 }
  0x82   : > { %5975 = shalt.err (!%p5972_p6)
}
  0x83   : > { %s7576_s2 = smov 4   ;;  %s7577_s15 = smov 64  }
  0x84   : > { %5495 = dma.hbm_to_vmem [thread:$0]  (!%p6469_p3), %s6512_s11, 1024, %s6516_s24, %s6520_s23, %s7577_s15, %s7577_s15, %s7576_s2  }
  0x85   : > { %s6233_s1 = smov [#allocation3]   ;;  %s6234_s19 = smov [#allocation8]  }
  0x86   : > { %s417_s12 = sshll.u32 %s6233_s1, 4  ;;  %s446_s25 = sshll.u32 %s6234_s19, 4  ;;  %s418_s12 = int_to_ptr.vmem [resolvable:$true] %s417_s12  ;;  %s447_s25 = int_to_ptr.vmem [resolvable:$true] %s446_s25 }
  0x87   : > { %s5976_s9 = scalar_lea.hbm %s7500_s0, 256  ;;  %p7578_p8 = scmp.ne.s32.totalorder %s7562_s13, 0 }
  0x88   : > { %p5977_p9 = scmp.ne.s32.totalorder %s7500_s0, %s5976_s9  ;;  %p5983_p5 = scmp.lt.u32.totalorder %s5976_s9, %s7500_s0 }
  0x8a   : > { %p5979_p12 = pnand %p5977_p9, %p7578_p8 }
  0x8c   : > { %p5980_p0 = pneg %p5979_p12 }
  0x8e   : > { %p5985_p10 = pnand %p5983_p5, %p5980_p0 }
  0x90   : > { %5988 = shalt.err (!%p5985_p10)
}
  0x91   : > { %s5989_s11 = scalar_lea.vmem %s418_s12, 256  ;;  %p5997_p13 = scmp.lt.s32.totalorder %s418_s12, %s418_s12 }
  0x92   : > { %p5990_p2 = scmp.ne.s32.totalorder %s418_s12, %s5989_s11  ;;  %p5998_p1 = scmp.lt.s32.totalorder %s5989_s11, %s5989_s11 }
  0x94   : > { %p5992_p4 = pnand %p5990_p2, %p7578_p8  ;;  %p5999_p6 = por %p5998_p1, %p5997_p13 }
  0x96   : > { %p5993_p11 = pneg %p5992_p4 }
  0x98   : > { %p6000_p3 = pnand %p5999_p6, %p5993_p11 }
  0x9a   : > { %6003 = shalt.err (!%p6000_p3)
}
  0x9b   : > { %p7579_p9 = scmp.ne.s32.totalorder %s7560_s21, 0  ;;  %s5431_s30 = smul.u32 192, %s6455_s17 }
  0x9c   : > { %s6004_s1 = scalar_lea.hbm %s7503_s3, 256 }
  0x9d   : > { %5479 = dma.hbm_to_vmem [thread:$0]  (!%p7579_p9), %s7500_s0, 256, %s418_s12, [#allocation4], %s7577_s15, %s7577_s15, %s7576_s2  }
  0x9e   : > { %p6005_p3 = scmp.ne.s32.totalorder %s7503_s3, %s6004_s1  ;;  %p6011_p5 = scmp.lt.u32.totalorder %s6004_s1, %s7503_s3 }
  0xa0   : > { %p6007_p12 = pnand %p6005_p3, %p7578_p8 }
  0xa2   : > { %p6008_p0 = pneg %p6007_p12 }
  0xa4   : > { %p6013_p10 = pnand %p6011_p5, %p6008_p0 }
  0xa6   : > { %6016 = shalt.err (!%p6013_p10)
}
  0xa7   : > { %s6017_s12 = scalar_lea.vmem %s447_s25, 256  ;;  %p6025_p13 = scmp.lt.s32.totalorder %s447_s25, %s447_s25 }
  0xa8   : > { %p6018_p2 = scmp.ne.s32.totalorder %s447_s25, %s6017_s12  ;;  %p6026_p1 = scmp.lt.s32.totalorder %s6017_s12, %s6017_s12 }
  0xaa   : > { %p6020_p4 = pnand %p6018_p2, %p7578_p8  ;;  %p6027_p6 = por %p6026_p1, %p6025_p13 }
  0xac   : > { %p6021_p11 = pneg %p6020_p4 }
  0xae   : > { %p6028_p7 = pnand %p6027_p6, %p6021_p11 }
  0xb0   : > { %6031 = shalt.err (!%p6028_p7)
}
  0xb1   : > { %s6235_s11 = smov 128   ;;  %s6236_s6 = smov 8  }
  0xb2   : > { %5485 = dma.hbm_to_vmem [thread:$0]  (!%p7579_p9), %s7503_s3, 256, %s447_s25, [#allocation7], %s6235_s11, %s6235_s11, %s6236_s6  }
  0xb3   : > { %s5432_s24 = smul.u32 3072, %s6222_s29  ;;  %s489_s13 = scalar_lea.vmem [#allocation11], %s5431_s30 }
  0xb4   : > { %s496_s1 = sshll.u32 %s489_s13, 4  ;;  %s4898_s9 = sshll.u32 %s6455_s17, 8  ;;  %s6593_s1 = int_to_ptr.vmem [resolvable:$true] %s496_s1 }
  0xb5   : > { %s6591_s4 = scalar_lea.hbm %s7505_s5, %s5432_s24  ;;  %p7580_p8 = scmp.ne.s32.totalorder %s7572_s10, 0 }
  0xb6   : > { %s6032_s21 = scalar_lea.hbm %s6591_s4, 3072  ;;  %s6037_s12 = scalar_lea.hbm %s7505_s5, 6144 }
  0xb7   : > { %p6033_p7 = scmp.ne.s32.totalorder %s6591_s4, %s6032_s21  ;;  %p6038_p12 = scmp.lt.u32.totalorder %s6591_s4, %s7505_s5 }
  0xb8   : > { %p6039_p0 = scmp.lt.u32.totalorder %s6037_s12, %s6032_s21  ;;  %p6041_p10 = scmp.lt.u32.totalorder %s6032_s21, %s6591_s4 }
  0xb9   : > { %p6035_p3 = pnand %p6033_p7, %p7580_p8 }
  0xba   : > { %p6040_p5 = por %p6039_p0, %p6038_p12 }
  0xbb   : > { %p6036_p9 = pneg %p6035_p3 }
  0xbc   : > { %p6042_p2 = por %p6041_p10, %p6040_p5 }
  0xbe   : > { %p6043_p4 = pnand %p6042_p2, %p6036_p9 }
  0xc0   : > { %6046 = shalt.err (!%p6043_p4)
}
  0xc1   : > { %s6047_s28 = scalar_lea.vmem %s6593_s1, 3072  ;;  %s6237_s16 = smov [#allocation11]  }
  0xc2   : > { %p6048_p11 = scmp.ne.s32.totalorder %s6593_s1, %s6047_s28  ;;  %s6052_s24 = sshll.u32 %s6237_s16, 4  ;;  %s6053_s24 = int_to_ptr.vmem [resolvable:$false] %s6052_s24 }
  0xc3   : > { %s6054_s13 = scalar_lea.vmem %s6053_s24, 6144  ;;  %p6055_p6 = scmp.lt.s32.totalorder %s6593_s1, %s6053_s24 }
  0xc4   : > { %p6050_p13 = pnand %p6048_p11, %p7580_p8  ;;  %p6056_p7 = scmp.lt.s32.totalorder %s6054_s13, %s6047_s28 }
  0xc6   : > { %p6051_p1 = pneg %p6050_p13  ;;  %p6057_p3 = por %p6056_p7, %p6055_p6 }
  0xc8   : > { %p6058_p12 = pnand %p6057_p3, %p6051_p1 }
  0xca   : > { %6061 = shalt.err (!%p6058_p12)
}
  0xcb   : > { %s6238_s19 = smov 192   ;;  %s6239_s22 = smov 12  }
  0xcc   : > { %p7581_p9 = scmp.ne.s32.totalorder %s7570_s20, 0  ;;  %s5079_s21 = sshll.u32 %s6222_s29, 12 }
  0xcd   : > { %s6624_s12 = scalar_lea.hbm %s7507_s7, %s5079_s21  ;;  %s531_s11 = scalar_lea.vmem [#allocation14], %s4898_s9 }
  0xce   : > { %5492 = dma.hbm_to_vmem [thread:$0]  (!%p7581_p9), %s6591_s4, 3072, %s6593_s1, %s6478_s27, %s6238_s19, %s6238_s19, %s6239_s22  }
  0xcf   : > { %s538_s6 = sshll.u32 %s531_s11, 4  ;;  %s6062_s28 = scalar_lea.hbm %s6624_s12, 4096  ;;  %s6628_s6 = int_to_ptr.vmem [resolvable:$true] %s538_s6 }
  0xd0   : > { %p6063_p0 = scmp.ne.s32.totalorder %s6624_s12, %s6062_s28  ;;  %s6067_s4 = scalar_lea.hbm %s7507_s7, 8192 }
  0xd1   : > { %p6068_p2 = scmp.lt.u32.totalorder %s6624_s12, %s7507_s7  ;;  %p6069_p4 = scmp.lt.u32.totalorder %s6067_s4, %s6062_s28 }
  0xd2   : > { %p6065_p5 = pnand %p6063_p0, %p7580_p8  ;;  %p6071_p13 = scmp.lt.u32.totalorder %s6062_s28, %s6624_s12 }
  0xd3   : > { %p6070_p11 = por %p6069_p4, %p6068_p2 }
  0xd4   : > { %p6066_p10 = pneg %p6065_p5 }
  0xd5   : > { %p6072_p1 = por %p6071_p13, %p6070_p11 }
  0xd7   : > { %p6073_p6 = pnand %p6072_p1, %p6066_p10 }
  0xd9   : > { %6076 = shalt.err (!%p6073_p6)
}
  0xda   : > { %s6077_s13 = scalar_lea.vmem %s6628_s6, 4096  ;;  %s6240_s19 = smov [#allocation14]  }
  0xdb   : > { %p6078_p7 = scmp.ne.s32.totalorder %s6628_s6, %s6077_s13  ;;  %s6082_s22 = sshll.u32 %s6240_s19, 4  ;;  %s6083_s22 = int_to_ptr.vmem [resolvable:$false] %s6082_s22 }
  0xdc   : > { %s6084_s25 = scalar_lea.vmem %s6083_s22, 8192  ;;  %p6085_p0 = scmp.lt.s32.totalorder %s6628_s6, %s6083_s22 }
  0xdd   : > { %p6080_p3 = pnand %p6078_p7, %p7580_p8  ;;  %p6086_p5 = scmp.lt.s32.totalorder %s6084_s25, %s6077_s13 }
  0xdf   : > { %p6081_p12 = pneg %p6080_p3  ;;  %p6087_p2 = por %p6086_p5, %p6085_p0 }
  0xe1   : > { %p6088_p4 = pnand %p6087_p2, %p6081_p12 }
  0xe3   : > { %6091 = shalt.err (!%p6088_p4)
}
  0xe4   : > { %s6241_s30 = smov 256   ;;  %s6242_s11 = smov 16  }
  0xe5   : > { %5498 = dma.hbm_to_vmem [thread:$0]  (!%p7581_p9), %s6624_s12, 4096, %s6628_s6, %s6520_s23, %s6241_s30, %s6241_s30, %s6242_s11  }
  0xe6   : > { %s6657_s1 = scalar_lea.hbm %s7508_s8, %s5079_s21  ;;  %s552_s4 = scalar_lea.vmem [#allocation15], %s4898_s9 }
  0xe7   : > { %s559_s16 = sshll.u32 %s552_s4, 4  ;;  %s549_s24 = scalar_lea.sflag [#allocation16], %s6455_s17  ;;  %s6661_s16 = int_to_ptr.vmem [resolvable:$true] %s559_s16 }
  0xe8   : > { %s6092_s13 = scalar_lea.hbm %s6657_s1, 4096  ;;  %s6097_s21 = scalar_lea.hbm %s7508_s8, 8192 }
  0xe9   : > { %p6093_p10 = scmp.ne.s32.totalorder %s6657_s1, %s6092_s13  ;;  %p6098_p1 = scmp.lt.u32.totalorder %s6657_s1, %s7508_s8 }
  0xea   : > { %p6099_p6 = scmp.lt.u32.totalorder %s6097_s21, %s6092_s13  ;;  %p6101_p3 = scmp.lt.u32.totalorder %s6092_s13, %s6657_s1 }
  0xeb   : > { %p6095_p11 = pnand %p6093_p10, %p7580_p8 }
  0xec   : > { %p6100_p7 = por %p6099_p6, %p6098_p1 }
  0xed   : > { %p6096_p13 = pneg %p6095_p11 }
  0xee   : > { %p6102_p12 = por %p6101_p3, %p6100_p7 }
  0xf0   : > { %p6103_p0 = pnand %p6102_p12, %p6096_p13 }
  0xf2   : > { %6106 = shalt.err (!%p6103_p0)
}
  0xf3   : > { %s6107_s9 = scalar_lea.vmem %s6661_s16, 4096  ;;  %s6243_s22 = smov [#allocation15]  }
  0xf4   : > { %p6108_p5 = scmp.ne.s32.totalorder %s6661_s16, %s6107_s9  ;;  %s6112_s25 = sshll.u32 %s6243_s22, 4  ;;  %s6113_s25 = int_to_ptr.vmem [resolvable:$false] %s6112_s25 }
  0xf5   : > { %s6114_s30 = scalar_lea.vmem %s6113_s25, 8192  ;;  %p6115_p10 = scmp.lt.s32.totalorder %s6661_s16, %s6113_s25 }
  0xf6   : > { %p6110_p2 = pnand %p6108_p5, %p7580_p8  ;;  %p6116_p11 = scmp.lt.s32.totalorder %s6114_s30, %s6107_s9 }
  0xf8   : > { %p6111_p4 = pneg %p6110_p2  ;;  %p6117_p1 = por %p6116_p11, %p6115_p10 }
  0xfa   : > { %p6118_p6 = pnand %p6117_p1, %p6111_p4 }
  0xfc   : > { %6121 = shalt.err (!%p6118_p6)
}
  0xfd   : > { %5501 = dma.hbm_to_vmem [thread:$0]  (!%p7581_p9), %s6657_s1, 4096, %s6661_s16, %s549_s24, %s7577_s15, %s7577_s15, %s7576_s2  }
  0xfe   : > { %p7582_p8 = scmp.ne.s32.totalorder %s7559_s18, 0 }
  0xff   : > { %p7583_p13 = scmp.eq.s32.totalorder (!%p7582_p8), %s6372_s14, 0 }
 0x100   : > { %571 = sbr.rel (%p7582_p8) target bundleno = 4373 (0x1115), region = 64 }
 0x107   : > { %6173 = dma.done.wait (%p7583_p13), [#allocation4], 256   ;;  %p7584_p7 = pmov %p7583_p13 }
 0x109   : > { %6175 = vsyncadd (%p7584_p7), [#allocation4], 4294967040  ;;  %p7585_p3 = pmov %p7584_p7 }
 0x10b   : > { %6177 = dma.done.wait (%p7585_p3), [#allocation7], 768   ;;  %p7586_p12 = pmov %p7585_p3 }
 0x10c   : > { %s7587_s20 = sld [smem:[#allocation37_spill]]  ;;  %s6701_s17 = sand.u32 1, %s6372_s14  }
 0x10d   : > { %6179 = vsyncadd (%p7586_p12), [#allocation7], 4294966528  ;;  %s6704_s18 = sand.u32 1, %s6210_s26   ;;  %s586_s2 = scalar_lea.sflag [#allocation10], %s6701_s17 }
 0x10e   : > { %s4908_s10 = sshll.u32 %s6704_s18, 5 }
 0x10f   : > { %s6708_s15 = scalar_lea.vmem [#allocation9], %s4908_s10 }
 0x112   : > { %p7588_p9 = scmp.ne.s32.totalorder %s7587_s20, 0 }
 0x114   : > { %6181 = dma.done.wait (%p7588_p9), %s586_s2, 3584  }
 0x115   : > { %6183 = vsyncadd (%p7588_p9), %s586_s2, 4294963712  ;;  %s5433_s11 = smul.u32 192, %s6704_s18  ;;  %s4909_s28 = sshll.u32 %s6704_s18, 6 }
 0x116   : > { %s604_s1 = scalar_lea.sflag [#allocation13], %s6701_s17  ;;  %s6719_s4 = scalar_lea.vmem [#allocation12], %s4909_s28 }
 0x117   : > { %s6716_s27 = scalar_lea.vmem [#allocation11], %s5433_s11 }
 0x118   : > { %6185 = dma.done.wait (%p7588_p9), %s604_s1, 5120  }
 0x119   : > { %6187 = vsyncadd (%p7588_p9), %s604_s1, 4294962176  ;;  %s4910_s16 = sshll.u32 %s6704_s18, 8  ;;  %s622_s13 = scalar_lea.sflag [#allocation16], %s6704_s18 }
 0x11a   : > { %s6726_s24 = scalar_lea.vmem [#allocation14], %s4910_s16  ;;  %s6729_s23 = scalar_lea.vmem [#allocation15], %s4910_s16 }
 0x11b   : > { %6189 = dma.done.wait (%p7588_p9), %s622_s13, 4096  }
 0x11c   : > { %6191 = vsyncadd (%p7588_p9), %s622_s13, 4294963200  ;;  %s4912_s12 = sshll.u32 %s6704_s18, 4  ;;  %s7589_s19 = sld [smem:[#allocation35_spill]] }
 0x11d   : > { %s6736_s21 = scalar_lea.vmem [#allocation17], %s4912_s12  ;;  %s6738_s6 = scalar_lea.vmem [#allocation18], %s4912_s12 }
 0x122   : > { %p4914_p0 = scmp.ne.s32.totalorder %s7589_s19, 0 }
 0x123   : > { %v5605_v0 = vld [vmem:[#allocation6] sm:$0xff] (!%p4914_p0)   ;;  %v6244_v1 = vmov (!%p4914_p0), 0.0   ;;  %v5606_v2 = vld [vmem:[#allocation6 + $0x8] sm:$0xff] (!%p4914_p0)   ;;  %vm6245_vm0 = vmmov (!%p4914_p0), 0   ;;  %v5607_v3 = vld [vmem:[#allocation6 + $0x10] sm:$0xff] (!%p4914_p0)   ;;  %vm750_vm1 = vcmask (!%p4914_p0), 523264  }
 0x124   : > { %701 = sbr.rel (%p4914_p0) target bundleno = 527 (0x20f), region = 100  ;;  %5247 = vmatprep.subr.bf16.mxu0 (!%p4914_p0), %v6244_v1  ;;  %5259 = vmatprep.subr.bf16.mxu1 (!%p4914_p0), %v6244_v1  ;;  %v5608_v4 = vld [vmem:[#allocation6 + $0x18] sm:$0xff] (!%p4914_p0)   ;;  %v5609_v5 = vld [vmem:[#allocation3] sm:$0xff] (!%p4914_p0)   ;;  %s7590_s25 = sld [smem:[#allocation43_spill]] (!%p4914_p0)  ;;  %v711_v8 = vld [vmem:[#allocation8] sm:$0xff] (!%p4914_p0) }
 0x125   : > { %5248 = vmatpush3.bf16.msra.mxu0 (!%p4914_p0), %v5605_v0  ;;  %5260 = vmatpush3.bf16.msra.mxu1 (!%p4914_p0), %v5605_v0  ;;  %v5610_v6 = vld [vmem:[#allocation3 + $0x8] sm:$0xff] (!%p4914_p0)   ;;  %v712_v15 = vld [vmem:[#allocation8 + $0x8] sm:$0xff] (!%p4914_p0) }
 0x126   : > { %5249 = vmatprep.subr.bf16.mxu0 (!%p4914_p0), %v6244_v1  ;;  %5261 = vmatprep.subr.bf16.mxu1 (!%p4914_p0), %v6244_v1 }
 0x127   : > { %5255 = vmatprep.mubr.msk.bf16.mxu0 (!%p4914_p0), %vm6245_vm0, %v6244_v1  ;;  %5267 = vmatprep.mubr.msk.bf16.mxu1 (!%p4914_p0), %vm6245_vm0, %v6244_v1 }
 0x129   : > { %5250 = vmatpush3.bf16.msra.mxu0 (!%p4914_p0), %v5606_v2  ;;  %5262 = vmatpush3.bf16.msra.mxu1 (!%p4914_p0), %v5606_v2 }
 0x12a   : > { %5251 = vmatprep.subr.bf16.mxu0 (!%p4914_p0), %v6244_v1  ;;  %5263 = vmatprep.subr.bf16.mxu1 (!%p4914_p0), %v6244_v1  ;;  %v4915_v7 = vld [vmem:[%s7590_s25] ss:$0 sm:$0xff] (!%p4914_p0) }
 0x12d   : > { %5252 = vmatpush3.bf16.msra.mxu0 %v5607_v3  ;;  %5264 = vmatpush3.bf16.msra.mxu1 %v5607_v3 }
 0x12e   : > { %5253 = vmatprep.subr.bf16.mxu0 %v6244_v1  ;;  %5265 = vmatprep.subr.bf16.mxu1 %v6244_v1 }
 0x131   : > { %5254 = vmatpush3.bf16.msra.mxu0 %v5608_v4  ;;  %5266 = vmatpush3.bf16.msra.mxu1 %v5608_v4 }
 0x134   : > { %5256 = vmatmul.mubr.msk.bf16.vlgmr.msra.gmra.mrb[0].mxu0 %vm750_vm1, %v5609_v5  ;;  %5268 = vmatmul.mubr.msk.bf16.vlgmr.msra.gmra.mrb[0].mxu1 %vm750_vm1, %v5610_v6 }
 0x207   : > { %v788_v9 = vpop.f32.mrb[0].mxu0  ;;  %v844_v10 = vpop.f32.mrb[0].mxu1 }
 0x208   : > { %v789_v11 = vadd.f32 %v4915_v7, %v788_v9  ;;  %v845_v12 = vadd.f32 %v4915_v7, %v844_v10  ;;  %v5257_v13 = vpop.f32.mrb[1].mxu0  ;;  %v5269_v14 = vpop.f32.mrb[1].mxu1 }
 0x209   : > { %v791_v16 = vpop.f32.mrb[2].mxu0  ;;  %v847_v17 = vpop.f32.mrb[2].mxu1 }
 0x20a   : > { %v795_v18 = vadd.f32 %v789_v11, %v711_v8  ;;  %v851_v19 = vadd.f32 %v845_v12, %v711_v8  ;;  %v792_v20 = vadd.f32 %v4915_v7, %v791_v16  ;;  %v848_v21 = vadd.f32 %v4915_v7, %v847_v17  ;;  %v5258_v22 = vpop.f32.mrb[3].mxu0  ;;  %v5270_v23 = vpop.f32.mrb[3].mxu1 }
 0x20c   : > { %797 = vst [vmem:[#allocation2] sm:$0xff] %v795_v18  ;;  %853 = vst [vmem:[#allocation2 + $0x10] sm:$0xff] %v851_v19  ;;  %v796_v24 = vadd.f32 %v792_v20, %v712_v15  ;;  %v852_v25 = vadd.f32 %v848_v21, %v712_v15 }
 0x20e   : > { %798 = vst [vmem:[#allocation2 + $0x8] sm:$0xff] %v796_v24  ;;  %854 = vst [vmem:[#allocation2 + $0x18] sm:$0xff] %v852_v25 }
 0x20f PF: > { %v5641_v29 = vld [vmem:[%s6716_s27 + $0x4] ss:$12 sps:$4 sm:$0xff]   ;;  %v5643_v30 = vld [vmem:[%s6716_s27] ss:$12 sps:$4 sm:$0xff]   ;;  %v5644_v31 = vld [vmem:[%s6716_s27 + $0x1c] ss:$12 sps:$4 sm:$0xff]   ;;  %v908_v2 = vlaneseq }
 0x210   : > { %1098 = vmatprep.subr.bf16.mxu0 %v5641_v29  ;;  %v5646_v41 = vld [vmem:[%s6716_s27 + $0x18] ss:$12 sps:$4 sm:$0xff]   ;;  %v5647_v42 = vld [vmem:[%s6716_s27 + $0x34] ss:$12 sps:$4 sm:$0xff]   ;;  %v5649_v43 = vld [vmem:[%s6716_s27 + $0x30] ss:$12 sps:$4 sm:$0xff]  }
 0x211   : > { %1099 = vmatpush1.bf16.msra.mxu0 %v5643_v30  ;;  %v5650_v44 = vld [vmem:[%s6716_s27 + $0x4c] ss:$12 sps:$4 sm:$0xff]   ;;  %v5652_v45 = vld [vmem:[%s6716_s27 + $0x48] ss:$12 sps:$4 sm:$0xff]   ;;  %v5653_v46 = vld [vmem:[%s6716_s27 + $0x64] ss:$12 sps:$4 sm:$0xff]  }
 0x212   : > { %1100 = vmatprep.subr.bf16.mxu0 %v5644_v31  ;;  %v5655_v47 = vld [vmem:[%s6716_s27 + $0x60] ss:$12 sps:$4 sm:$0xff]   ;;  %v5656_v48 = vld [vmem:[%s6716_s27 + $0x7c] ss:$12 sps:$4 sm:$0xff]   ;;  %v6246_v49 = vmov 0   ;;  %v6776_v5 = vshrl.u32 %v908_v2, 7 }
 0x213   : > { %v855_v26 = vld [vmem:[#allocation2] sm:$0xff]  ;;  %v857_v28 = vld [vmem:[#allocation2 + $0x10] sm:$0xff]  ;;  %1130 = vmatprep.mubr.bf16.mxu0 %v6246_v49  ;;  %v5662_v53 = vld [vmem:[%s6716_s27 + $0xac] ss:$12 sps:$4 sm:$0xff]   ;;  %s6247_s30 = smov 64   ;;  %s6248_s20 = smov 96  }
 0x214   : > { %863 = vadd.xlane.f32.xlu0 %v855_v26  ;;  %v5658_v50 = vld [vmem:[%s6716_s27 + $0x78] ss:$12 sps:$4 sm:$0xff]   ;;  %v5659_v51 = vld [vmem:[%s6716_s27 + $0x94] ss:$12 sps:$4 sm:$0xff]   ;;  %v5661_v52 = vld [vmem:[%s6716_s27 + $0x90] ss:$12 sps:$4 sm:$0xff]  }
 0x215   : > { %v856_v27 = vld [vmem:[#allocation2 + $0x8] sm:$0xff]  ;;  %v858_v40 = vld [vmem:[#allocation2 + $0x18] sm:$0xff]  ;;  %1101 = vmatpush1.bf16.msra.mxu0 %v5646_v41  ;;  %v910_v9 = vsub.s32 0, %v6776_v5  ;;  %v859_v10 = vld [vmem:[%s6708_s15] sm:$0xff]  ;;  %v918_v15 = vsub.s32 1, %v6776_v5  ;;  %s6250_s10 = smov 32  }
 0x216   : > { %1102 = vmatprep.subr.bf16.mxu0 %v5647_v42  ;;  %v5664_v54 = vld [vmem:[%s6716_s27 + $0xa8] ss:$12 sps:$4 sm:$0xff]   ;;  %v5666_v58 = vld [vmem:[%s6716_s27 + $0x20] ss:$12 sps:$4 sm:$0xff]   ;;  %v5667_v60 = vld [vmem:[%s6716_s27 + $0x38] ss:$12 sps:$4 sm:$0xff]  }
 0x217   : > { %v5665_v56 = vld [vmem:[%s6716_s27 + $0x8] ss:$12 sps:$4 sm:$0xff]   ;;  %v911_v14 = vrot.slane %v859_v10, %v910_v9  ;;  %v919_v19 = vrot.slane %v859_v10, %v918_v15  ;;  %v5668_v24 = vld [vmem:[%s6716_s27 + $0x50] ss:$12 sps:$4 sm:$0xff]   ;;  %vm6251_vm2 = vmmov 0   ;;  %vm1301_vm3 = vcmask 261120  }
 0x218   : > { %865 = vadd.xlane.f32.xlu0 %v856_v27  ;;  %5271 = vmatprep.subr.bf16.mxu1 %v5665_v56  ;;  %v5669_v25 = vld [vmem:[%s6716_s27 + $0x68] ss:$12 sps:$4 sm:$0xff]   ;;  %vm1478_vm4 = vcmask 130048   ;;  %vm2293_vm5 = vcmask 523264   ;;  %vm2296_vm6 = vcmask 785408   ;;  %s7591_s2 = sld [smem:[#allocation35_spill]] }
 0x219   : > { %1103 = vmatpush1.bf16.msra.mxu0 %v5649_v43  ;;  %5272 = vmatpush3.bf16.msra.mxu1 %v5665_v56 }
 0x21a   : > { %1104 = vmatprep.subr.bf16.mxu0 %v5650_v44  ;;  %5273 = vmatprep.subr.bf16.mxu1 %v5666_v58  ;;  %v960_v44 = vsub.s32 2, %v6776_v5 }
 0x21c   : > { %867 = vadd.xlane.f32.xlu0 %v857_v28 }
 0x21d   : > { %1105 = vmatpush1.bf16.msra.mxu0 %v5652_v45  ;;  %5274 = vmatpush3.bf16.msra.mxu1 %v5666_v58  ;;  %v961_v45 = vrot.slane %v859_v10, %v960_v44 }
 0x21e   : > { %1106 = vmatprep.subr.bf16.mxu0 %v5653_v46  ;;  %5275 = vmatprep.subr.bf16.mxu1 %v5667_v60  ;;  %v860_v46 = vld [vmem:[%s6708_s15 + $0x8] sm:$0xff]  ;;  %p5064_p5 = scmp.ne.s32.totalorder %s7591_s2, 1 }
 0x21f   : > { %s7592_s28 = sld [smem:[#allocation46_spill]] (!%p5064_p5) }
 0x221   : > { %1107 = vmatpush1.bf16.msra.mxu0 %v5655_v47  ;;  %5276 = vmatpush3.bf16.msra.mxu1 %v5667_v60 }
 0x222   : > { %1108 = vmatprep.subr.bf16.mxu0 %v5656_v48  ;;  %5277 = vmatprep.subr.bf16.mxu1 %v5668_v24  ;;  %v965_v48 = vrot.slane %v860_v46, %v960_v44 }
 0x225   : > { %1109 = vmatpush1.bf16.msra.mxu0 %v5658_v50  ;;  %5278 = vmatpush3.bf16.msra.mxu1 %v5668_v24 }
 0x226   : > { %1110 = vmatprep.subr.bf16.mxu0 %v5659_v51  ;;  %5279 = vmatprep.subr.bf16.mxu1 %v5669_v25 }
 0x229   : > { %1111 = vmatpush1.bf16.msra.mxu0 %v5661_v52  ;;  %5280 = vmatpush3.bf16.msra.mxu1 %v5669_v25 }
 0x22a   : > { %1112 = vmatprep.subr.bf16.mxu0 %v5662_v53 }
 0x22d   : > { %1113 = vmatpush1.bf16.msra.mxu0 %v5664_v54 }
 0x2a1   : > { %v864_v32 = vpop.xlane.xlu0 %863 }
 0x2a2   : > { %v872_v33 = vmul.f32 0.0078125, %v864_v32 }
 0x2a4   : > { %v6747_v34 = vsub.f32 %v855_v26, %v872_v33  ;;  %v5670_v26 = vld [vmem:[%s6716_s27 + $0x80] ss:$12 sps:$4 sm:$0xff]  }
 0x2a5   : > { %v866_v35 = vpop.xlane.xlu0 %865  ;;  %5281 = vmatprep.subr.bf16.mxu1 %v5670_v26 }
 0x2a6   : > { %v873_v36 = vmul.f32 0.0078125, %v866_v35  ;;  %v880_v37 = vmul.f32 %v6747_v34, %v6747_v34  ;;  %5282 = vmatpush3.bf16.msra.mxu1 %v5670_v26 }
 0x2a8   : > { %884 = vadd.xlane.f32.xlu1 %v880_v37  ;;  %v6751_v38 = vsub.f32 %v856_v27, %v873_v36  ;;  %v5671_v27 = vld [vmem:[%s6716_s27 + $0x98] ss:$12 sps:$4 sm:$0xff]  }
 0x2a9   : > { %v868_v55 = vpop.xlane.xlu0 %867  ;;  %5283 = vmatprep.subr.bf16.mxu1 %v5671_v27 }
 0x2aa   : > { %v881_v39 = vmul.f32 %v6751_v38, %v6751_v38  ;;  %v874_v57 = vmul.f32 0.0078125, %v868_v55  ;;  %5284 = vmatpush3.bf16.msra.mxu1 %v5671_v27 }
 0x2ac   : > { %886 = vadd.xlane.f32.xlu1 %v881_v39  ;;  %v6771_v59 = vsub.f32 %v857_v28, %v874_v57  ;;  %v5672_v28 = vld [vmem:[%s6716_s27 + $0xb0] ss:$12 sps:$4 sm:$0xff]  }
 0x2ad   : > { %5285 = vmatprep.subr.bf16.mxu1 %v5672_v28 }
 0x2ae   : > { %v882_v61 = vmul.f32 %v6771_v59, %v6771_v59  ;;  %5286 = vmatpush3.bf16.msra.mxu1 %v5672_v28 }
 0x2b0   : > { %869 = vadd.xlane.f32.xlu1 %v858_v40  ;;  %888 = vadd.xlane.f32.xlu0 %v882_v61  ;;  %v6249_v61 = vmov 0.0  }
 0x2b1   : > { %5291 = vmatprep.subr.bf16.mxu0 %v6249_v61  ;;  %5307 = vmatprep.subr.bf16.mxu1 %v6249_v61 }
 0x335   : > { %v885_v62 = vpop.xlane.xlu1 %884 }
 0x336   : > { %v892_v63 = vmul.f32 0.0078125, %v885_v62 }
 0x338   : > { %v896_v0 = vadd.f32 1e-05, %v892_v63 }
 0x339   : > { %v887_v1 = vpop.xlane.xlu1 %886 }
 0x33a   : > { %5761 = vrsqrt.f32 %v896_v0  ;;  %v893_v3 = vmul.f32 0.0078125, %v887_v1 }
 0x33c   : > { %v897_v4 = vadd.f32 1e-05, %v893_v3  ;;  %v861_v3 = vld [vmem:[%s6708_s15 + $0x10] sm:$0xff] }
 0x33d   : > { %v870_v6 = vpop.xlane.xlu1 %869  ;;  %v889_v29 = vpop.xlane.xlu0 %888 }
 0x33e   : > { %5763 = vrsqrt.f32 %v897_v4  ;;  %v875_v7 = vmul.f32 0.0078125, %v870_v6  ;;  %v894_v30 = vmul.f32 0.0078125, %v889_v29  ;;  %v969_v4 = vrot.slane %v861_v3, %v960_v44 }
 0x340   : > { %v879_v8 = vsub.f32 %v858_v40, %v875_v7  ;;  %v898_v31 = vadd.f32 1e-05, %v894_v30 }
 0x342   : > { %v883_v11 = vmul.f32 %v879_v8, %v879_v8  ;;  %5765 = vrsqrt.f32 %v898_v31 }
 0x344   : > { %v5762_v12 = vpop.eup %5761  ;;  %890 = vadd.xlane.f32.xlu1 %v883_v11 }
 0x345   : > { %v904_v13 = vmul.f32 %v5762_v12, %v6747_v34 }
 0x347   : > { %v912_v18 = vmul.f32 %v911_v14, %v904_v13 }
 0x348   : > { %v5764_v16 = vpop.eup %5763 }
 0x349   : > { %v905_v17 = vmul.f32 %v5764_v16, %v6751_v38  ;;  %v920_v21 = vadd.f32 %v919_v19, %v912_v18 }
 0x34b   : > { %v913_v20 = vmul.f32 %v911_v14, %v905_v17 }
 0x34c   : > { %v5766_v35 = vpop.eup %5765 }
 0x34d   : > { %v921_v22 = vadd.f32 %v919_v19, %v913_v20  ;;  %v906_v36 = vmul.f32 %v5766_v35, %v6771_v59 }
 0x34f   : > { %v924_v23 = vpack.c.bf16 %v921_v22, %v920_v21  ;;  %v914_v37 = vmul.f32 %v911_v14, %v906_v36 }
 0x351   : > { %1131 = vmatmul.mubr.bf16.vlgmr.msra.gmra.mrb[0].mxu0 %v924_v23  ;;  %5287 = vmatprep.mubr.bf16.mxu1 %v924_v23  ;;  %v922_v41 = vadd.f32 %v919_v19, %v914_v37 }
 0x352   : > { %1140 = vmatprep.mubr.bf16.mxu0 %v6246_v49 }
 0x3d1   : > { %v891_v32 = vpop.xlane.xlu1 %890 }
 0x3d2   : > { %v895_v33 = vmul.f32 0.0078125, %v891_v32 }
 0x3d4   : > { %v899_v34 = vadd.f32 1e-05, %v895_v33 }
 0x3d6   : > { %5767 = vrsqrt.f32 %v899_v34 }
 0x3e0   : > { %v5768_v38 = vpop.eup %5767 }
 0x3e1   : > { %v907_v39 = vmul.f32 %v5768_v38, %v879_v8 }
 0x3e3   : > { %v915_v40 = vmul.f32 %v911_v14, %v907_v39 }
 0x3e5   : > { %v923_v42 = vadd.f32 %v919_v19, %v915_v40 }
 0x3e7   : > { %v925_v43 = vpack.c.bf16 %v923_v42, %v922_v41 }
 0x3e9   : > { %5288 = vmatmul.mubr.bf16.vlgmr.msra.gmra.mrb[0].mxu1 %v925_v43  ;;  %1141 = vmatmul.mubr.bf16.gmra.mrb[4].mxu0 %v925_v43 }
 0x3ea   : > { %5295 = vmatprep.mubr.msk.bf16.mxu0 %vm6251_vm2, %v6249_v61  ;;  %5311 = vmatprep.mubr.msk.bf16.mxu1 %vm6251_vm2, %v6249_v61 }
 0x424   : > { %v1132_v47 = vpop.f32.mrb[0].mxu0 }
 0x425   : > { %v1133_v50 = vadd.f32 %v1132_v47, %v961_v45  ;;  %v1134_v51 = vpop.f32.mrb[1].mxu0 }
 0x426   : > { %v1136_v52 = vpop.f32.mrb[2].mxu0  ;;  %v1135_v55 = vadd.f32 %v1134_v51, %v965_v48 }
 0x427   : > { %v1137_v53 = vadd.f32 %v1136_v52, %v961_v45  ;;  %v1138_v54 = vpop.f32.mrb[3].mxu0  ;;  %v1200_v57 = vmul.f32 0.17677669, %v1133_v50 }
 0x428   : > { %v1139_v56 = vadd.f32 %v1138_v54, %v965_v48 }
 0x429   : > { %v1201_v58 = vmul.f32 0.17677669, %v1137_v53 }
 0x42a   : > { %v1206_v59 = vpack.c.bf16 %v1139_v56, %v1135_v55 }
 0x42b   : > { %v1204_v60 = vpack.c.bf16 %v1201_v58, %v1200_v57 }
 0x42c   : > { %1221 = vrot.lane.b32.xlu1 %v1206_v59, %s6247_s30  ;;  %1218 = vrot.lane.b32.xlu0 %v1206_v59, %s6248_s20 }
 0x430   : > { %1224 = vrot.lane.b32.xlu1 %v1206_v59, %s6250_s10 }
 0x434   : > { %1211 = vrot.lane.b32.xlu1 %v1204_v60, %s6248_s20 }
 0x438   : > { %1213 = vrot.lane.b32.xlu1 %v1204_v60, %s6247_s30 }
 0x43c   : > { %1215 = vrot.lane.b32.xlu1 %v1204_v60, %s6250_s10 }
 0x44a   : > { %1237 = vxpose.xlu0.c.b16.start.end [1/1] (short) (narrow) %v1206_v59, 32 }
 0x49e   : > { %v1222_v62 = vpop.permute.xlu1 %1221  ;;  %v1219_v63 = vpop.permute.xlu0 %1218 }
 0x49f   : > { %1269 = vxpose.xlu0.c.b16.start.end [1/1] (short) (narrow) %v1222_v62, 32  ;;  %1253 = vxpose.xlu1.c.b16.start.end [1/1] (short) (narrow) %v1219_v63, 32 }
 0x4a2   : > { %v1225_v0 = vpop.permute.xlu1 %1224 }
 0x4a4   : > { %1285 = vxpose.xlu0.c.b16.start.end [1/1] (short) (narrow) %v1225_v0, 32 }
 0x4a6   : > { %v1212_v28 = vpop.permute.xlu1 %1211 }
 0x4aa   : > { %v1214_v29 = vpop.permute.xlu1 %1213 }
 0x4ae   : > { %v1216_v30 = vpop.permute.xlu1 %1215 }
 0x4b0   : > { %v1245_v1 = vpop.trf.xlu0 }
 0x4b1   : > { %5292 = vmatpush3.bf16.msra.mxu0 %v1245_v1 }
 0x4b2   : > { %5293 = vmatprep.subr.bf16.mxu0 %v6249_v61 }
 0x4b4   : > { %v1246_v2 = vpop.trf.xlu0 }
 0x4b5   : > { %5294 = vmatpush3.bf16.msra.mxu0 %v1246_v2 }
 0x4b6   : > { %5299 = vmatprep.subr.bf16.mxu0 %v6249_v61 }
 0x4b8   : > { %5296 = vmatmul.mubr.msk.bf16.vlgmr.msra.gmra.mrb[8].mxu0 %vm1301_vm3, %v1204_v60 }
 0x4b9   : > { %5303 = vmatprep.mubr.msk.bf16.mxu0 %vm6251_vm2, %v6249_v61 }
 0x4bc   : > { %v5289_v6 = vpop.f32.mrb[0].mxu1  ;;  %v1142_v7 = vpop.f32.mrb[4].mxu0 }
 0x4bd   : > { %v1194_v8 = vadd.f32 %v5289_v6, %v969_v4  ;;  %v1185_v9 = vpop.f32.mrb[1].mxu1  ;;  %v1143_v10 = vadd.f32 %v1142_v7, %v961_v45  ;;  %v1144_v11 = vpop.f32.mrb[5].mxu0 }
 0x4be   : > { %v1186_v12 = vadd.f32 %v1185_v9, %v969_v4  ;;  %v5290_v13 = vpop.f32.mrb[2].mxu1  ;;  %v1145_v14 = vadd.f32 %v1144_v11, %v965_v48  ;;  %v1146_v15 = vpop.f32.mrb[6].mxu0 }
 0x4bf   : > { %v1197_v16 = vadd.f32 %v5290_v13, %v969_v4  ;;  %v1188_v17 = vpop.f32.mrb[3].mxu1  ;;  %v1202_v18 = vmul.f32 0.17677669, %v1143_v10  ;;  %v1147_v19 = vadd.f32 %v1146_v15, %v961_v45  ;;  %v1148_v20 = vpop.f32.mrb[7].mxu0 }
 0x4c0   : > { %v1189_v21 = vadd.f32 %v1188_v17, %v969_v4  ;;  %v1149_v22 = vadd.f32 %v1148_v20, %v965_v48 }
 0x4c1   : > { %v6810_v23 = vpack.c.bf16 %v1197_v16, %v1194_v8  ;;  %v1203_v24 = vmul.f32 0.17677669, %v1147_v19 }
 0x4c2   : > { %v6812_v25 = vpack.c.bf16 %v1189_v21, %v1186_v12  ;;  %v6814_v26 = vpack.c.bf16 %v1149_v22, %v1145_v14 }
 0x4c3   : > { %v6816_v27 = vpack.c.bf16 %v1203_v24, %v1202_v18 }
 0x4c4   : > { %1571 = vxpose.xlu1.c.b16.start.end [1/1] (short) (narrow) %v6812_v25, 32 }
 0x4cc   : > { %1228 = vrot.lane.b32.xlu1 %v6812_v25, %s6248_s20 }
 0x505   : > { %v1261_v31 = vpop.trf.xlu1  ;;  %v1277_v32 = vpop.trf.xlu0 }
 0x506   : > { %5300 = vmatpush3.bf16.msra.mxu0 %v1261_v31  ;;  %5308 = vmatpush3.bf16.msra.mxu1 %v1277_v32 }
 0x507   : > { %5301 = vmatprep.subr.bf16.mxu0 %v6249_v61  ;;  %5309 = vmatprep.subr.bf16.mxu1 %v6249_v61 }
 0x509   : > { %v1262_v33 = vpop.trf.xlu1  ;;  %v1278_v34 = vpop.trf.xlu0 }
 0x50a   : > { %5302 = vmatpush3.bf16.msra.mxu0 %v1262_v33  ;;  %5310 = vmatpush3.bf16.msra.mxu1 %v1278_v34 }
 0x50b   : > { %5315 = vmatprep.subr.bf16.mxu0 %v6249_v61 }
 0x50d   : > { %5304 = vmatmul.mubr.msk.bf16.vlgmr.msra.gmra.mrb[12].mxu0 %vm1301_vm3, %v1212_v28  ;;  %5312 = vmatmul.mubr.msk.bf16.vlgmr.msra.gmra.mrb[4].mxu1 %vm1301_vm3, %v1214_v29  ;;  %v1293_v35 = vpop.trf.xlu0 }
 0x50e   : > { %5316 = vmatpush3.bf16.msra.mxu0 %v1293_v35  ;;  %5319 = vmatprep.mubr.msk.bf16.mxu0 %vm6251_vm2, %v6249_v61 }
 0x50f   : > { %5317 = vmatprep.subr.bf16.mxu0 %v6249_v61 }
 0x511   : > { %v1294_v36 = vpop.trf.xlu0 }
 0x512   : > { %5318 = vmatpush3.bf16.msra.mxu0 %v1294_v36 }
 0x515   : > { %5320 = vmatmul.mubr.msk.bf16.vlgmr.msra.gmra.mrb[16].mxu0 %vm1301_vm3, %v1216_v30 }
 0x52a   : > { %v1579_v37 = vpop.trf.xlu1 }
 0x52b   : > { %5325 = vmatprep.mubr.msk.bf16.mxu1 %vm1478_vm4, %v1579_v37 }
 0x52e   : > { %v6847_v0 = vpop.trf.xlu1 }
 0x53e   : > { %v1229_v1 = vpop.permute.xlu1 %1228 }
 0x58b   : > { %v1339_v38 = vpop.f32.mrb[8].mxu0 }
 0x58c   : > { %v5297_v39 = vpop.f32.mrb[9].mxu0  ;;  %v1479_v40 = vsel %vm1478_vm4, %v1339_v38, -inf }
 0x58d   : > { %1480 = vmax.xlane.f32.xlu0 %v1479_v40  ;;  %v1342_v41 = vpop.f32.mrb[10].mxu0 }
 0x58e   : > { %v5298_v42 = vpop.f32.mrb[11].mxu0  ;;  %v1482_v43 = vsel %vm1478_vm4, %v1342_v41, -inf }
 0x58f   : > { %1483 = vmax.xlane.f32.xlu1 %v1482_v43 }
 0x5e0   : > { %v1383_v44 = vpop.f32.mrb[12].mxu0  ;;  %v1427_v45 = vpop.f32.mrb[4].mxu1 }
 0x5e1   : > { %v5305_v46 = vpop.f32.mrb[13].mxu0  ;;  %v5313_v47 = vpop.f32.mrb[5].mxu1  ;;  %v1485_v48 = vsel %vm1478_vm4, %v1383_v44, -inf  ;;  %v1491_v50 = vsel %vm1478_vm4, %v1427_v45, -inf }
 0x5e2   : > { %1486 = vmax.xlane.f32.xlu0 %v1485_v48  ;;  %v1386_v51 = vpop.f32.mrb[14].mxu0  ;;  %1492 = vmax.xlane.f32.xlu1 %v1491_v50  ;;  %v1430_v52 = vpop.f32.mrb[6].mxu1 }
 0x5e3   : > { %v5306_v53 = vpop.f32.mrb[15].mxu0  ;;  %v5314_v54 = vpop.f32.mrb[7].mxu1  ;;  %v1488_v55 = vsel %vm1478_vm4, %v1386_v51, -inf  ;;  %v1494_v58 = vsel %vm1478_vm4, %v1430_v52, -inf }
 0x5e6   : > { %1489 = vmax.xlane.f32.xlu0 %v1488_v55 }
 0x5e8   : > { %v1471_v56 = vpop.f32.mrb[16].mxu0 }
 0x5e9   : > { %v5321_v57 = vpop.f32.mrb[17].mxu0  ;;  %v1497_v59 = vsel %vm1478_vm4, %v1471_v56, -inf }
 0x5ea   : > { %1495 = vmax.xlane.f32.xlu0 %v1494_v58  ;;  %1498 = vmax.xlane.f32.xlu1 %v1497_v59  ;;  %v1474_v60 = vpop.f32.mrb[18].mxu0 }
 0x5eb   : > { %v5322_v62 = vpop.f32.mrb[19].mxu0  ;;  %v1500_v63 = vsel %vm1478_vm4, %v1474_v60, -inf }
 0x5ee   : > { %1501 = vmax.xlane.f32.xlu0 %v1500_v63 }
 0x5fb   : > { %1231 = vrot.lane.b32.xlu1 %v6812_v25, %s6247_s30 }
 0x5ff   : > { %2307 = vrot.lane.b32.xlu1 %v6814_v26, %s6248_s20 }
 0x603   : > { %2313 = vrot.lane.b32.xlu1 %v6814_v26, %s6250_s10 }
 0x607   : > { %2300 = vrot.lane.b32.xlu1 %v6816_v27, %s6248_s20 }
 0x61a   : > { %v1481_v2 = vpop.xlane.xlu0 %1480 }
 0x61b   : > { %1587 = vxpose.xlu0.c.b16.start.end [1/1] (short) (narrow) %v1229_v1, 32  ;;  %v1503_v3 = vsub.f32 %v1339_v38, %v1481_v2 }
 0x61c   : > { %v1484_v4 = vpop.xlane.xlu1 %1483 }
 0x61d   : > { %v1511_v6 = vmul.f32 1.442695, %v1503_v3  ;;  %v1504_v7 = vsub.f32 %v1342_v41, %v1484_v4 }
 0x61f   : > { %5769 = vpow2.f32 %v1511_v6  ;;  %v1513_v8 = vmul.f32 1.442695, %v1504_v7 }
 0x621   : > { %5771 = vpow2.f32 %v1513_v8 }
 0x628   : > { %1234 = vrot.lane.b32.xlu0 %v6812_v25, %s6250_s10 }
 0x629   : > { %v6853_v9 = vpop.eup %5769 }
 0x62a   : > { %v1527_v10 = vsel %vm1478_vm4, %v6853_v9, 0.0 }
 0x62b   : > { %v6857_v11 = vpop.eup %5771 }
 0x62c   : > { %2310 = vrot.lane.b32.xlu0 %v6814_v26, %s6247_s30  ;;  %v1530_v12 = vsel %vm1478_vm4, %v6857_v11, 0.0 }
 0x64b   : > { %1528 = vadd.xlane.f32.xlu0 %v1527_v10 }
 0x64f   : > { %1531 = vadd.xlane.f32.xlu0 %v1530_v12 }
 0x66f   : > { %v1493_v13 = vpop.xlane.xlu1 %1492  ;;  %v1487_v14 = vpop.xlane.xlu0 %1486 }
 0x670   : > { %v1507_v15 = vsub.f32 %v1427_v45, %v1493_v13  ;;  %v1505_v16 = vsub.f32 %v1383_v44, %v1487_v14 }
 0x672   : > { %v1519_v17 = vmul.f32 1.442695, %v1507_v15  ;;  %v1515_v18 = vmul.f32 1.442695, %v1505_v16 }
 0x673   : > { %v1490_v19 = vpop.xlane.xlu0 %1489 }
 0x674   : > { %5773 = vpow2.f32 %v1519_v17  ;;  %v1506_v20 = vsub.f32 %v1386_v51, %v1490_v19 }
 0x675   : > { %5775 = vpow2.f32 %v1515_v18 }
 0x676   : > { %v1517_v21 = vmul.f32 1.442695, %v1506_v20 }
 0x677   : > { %v1499_v22 = vpop.xlane.xlu1 %1498  ;;  %v1496_v24 = vpop.xlane.xlu0 %1495 }
 0x678   : > { %5777 = vpow2.f32 %v1517_v21  ;;  %v1509_v25 = vsub.f32 %v1471_v56, %v1499_v22  ;;  %v1508_v28 = vsub.f32 %v1430_v52, %v1496_v24 }
 0x67a   : > { %v1523_v29 = vmul.f32 1.442695, %v1509_v25  ;;  %v1521_v30 = vmul.f32 1.442695, %v1508_v28 }
 0x67b   : > { %v1502_v31 = vpop.xlane.xlu0 %1501  ;;  %v1232_v50 = vpop.permute.xlu1 %1231 }
 0x67c   : > { %5779 = vpow2.f32 %v1523_v29  ;;  %v1510_v32 = vsub.f32 %v1474_v60, %v1502_v31 }
 0x67d   : > { %5781 = vpow2.f32 %v1521_v30 }
 0x67e   : > { %v6861_v33 = vpop.eup %5773  ;;  %v1525_v34 = vmul.f32 1.442695, %v1510_v32 }
 0x67f   : > { %v5776_v35 = vpop.eup %5775  ;;  %v1539_v36 = vsel %vm1478_vm4, %v6861_v33, 0.0  ;;  %v2308_v51 = vpop.permute.xlu1 %2307 }
 0x680   : > { %5783 = vpow2.f32 %v1525_v34  ;;  %1540 = vadd.xlane.f32.xlu1 %v1539_v36  ;;  %v1533_v37 = vsel %vm1478_vm4, %v5776_v35, 0.0 }
 0x681   : > { %1534 = vadd.xlane.f32.xlu0 %v1533_v37  ;;  %v1595_v38 = vpop.trf.xlu0 }
 0x682   : > { %v5778_v39 = vpop.eup %5777  ;;  %5331 = vmatprep.mubr.msk.bf16.mxu0 %vm1478_vm4, %v1595_v38 }
 0x683   : > { %v1536_v40 = vsel %vm1478_vm4, %v5778_v39, 0.0  ;;  %v2314_v53 = vpop.permute.xlu1 %2313 }
 0x685   : > { %1537 = vadd.xlane.f32.xlu0 %v1536_v40  ;;  %v6878_v47 = vpop.trf.xlu0 }
 0x686   : > { %v6868_v41 = vpop.eup %5779 }
 0x687   : > { %v5782_v42 = vpop.eup %5781  ;;  %v1545_v43 = vsel %vm1478_vm4, %v6868_v41, 0.0  ;;  %v6887_v62 = vpop.permute.xlu1 %2300 }
 0x688   : > { %1546 = vadd.xlane.f32.xlu1 %v1545_v43  ;;  %v1542_v44 = vsel %vm1478_vm4, %v5782_v42, 0.0 }
 0x689   : > { %1543 = vadd.xlane.f32.xlu0 %v1542_v44 }
 0x68a   : > { %v5784_v45 = vpop.eup %5783 }
 0x68b   : > { %v1548_v46 = vsel %vm1478_vm4, %v5784_v45, 0.0 }
 0x68c   : > { %1549 = vadd.xlane.f32.xlu1 %v1548_v46 }
 0x69a   : > { %v1235_v48 = vpop.permute.xlu0 %1234 }
 0x69d   : > { %2304 = vrot.lane.b32.xlu1 %v6816_v27, %s6250_s10 }
 0x69e   : > { %v2311_v52 = vpop.permute.xlu0 %2310 }
 0x69f   : > { %2302 = vrot.lane.b32.xlu0 %v6816_v27, %s6247_s30 }
 0x6bd   : > { %1619 = vxpose.xlu0.c.b16.start.end [1/1] (short) (narrow) %v1235_v48, 32 }
 0x6c0   : > { %1603 = vxpose.xlu1.c.b16.start.end [1/1] (short) (narrow) %v1232_v50, 32 }
 0x6c2   : > { %2326 = vxpose.xlu0.c.b16.start.end [1/1] (short) (narrow) %v6814_v26, 32 }
 0x6c5   : > { %2342 = vxpose.xlu1.c.b16.start.end [1/1] (short) (narrow) %v2308_v51, 32 }
 0x6c7   : > { %2358 = vxpose.xlu0.c.b16.start.end [1/1] (short) (narrow) %v2311_v52, 32 }
 0x6ca   : > { %2374 = vxpose.xlu1.c.b16.start.end [1/1] (short) (narrow) %v2314_v53, 32 }
 0x6d8   : > { %v1529_v54 = vpop.xlane.xlu0 %1528 }
 0x6d9   : > { %5785 = vrcp.f32 %v1529_v54 }
 0x6dc   : > { %v1532_v55 = vpop.xlane.xlu0 %1531 }
 0x6dd   : > { %5787 = vrcp.f32 %v1532_v55 }
 0x6e3   : > { %v5786_v56 = vpop.eup %5785 }
 0x6e4   : > { %v1559_v58 = vmul.f32 %v5786_v56, %v6853_v9 }
 0x6e7   : > { %v5788_v57 = vpop.eup %5787 }
 0x6e8   : > { %v1560_v59 = vmul.f32 %v5788_v57, %v6857_v11 }
 0x6ea   : > { %v1567_v60 = vpack.c.bf16 %v1560_v59, %v1559_v58 }
 0x6ec   : > { %5423 = vmatprep.subr.msk.bf16.mxu1 %vm1478_vm4, %v1567_v60  ;;  %v1642_v26 = vsel %vm1478_vm4, %v1567_v60, 0 }
 0x6ed   : > { %5324 = vmatpush3.bf16.xpose.msra.mxu1 %v1642_v26 }
 0x6f4   : > { %5326 = vmatmul.mubr.msk.bf16.vlgmr.msra.gmra.mrb[8].mxu1 %vm1478_vm4, %v6847_v0 }
 0x70d   : > { %v1541_v1 = vpop.xlane.xlu1 %1540 }
 0x70e   : > { %v1535_v63 = vpop.xlane.xlu0 %1534 }
 0x70f   : > { %5789 = vrcp.f32 %v1535_v63 }
 0x712   : > { %v1538_v2 = vpop.xlane.xlu0 %1537 }
 0x713   : > { %5791 = vrcp.f32 %v1538_v2 }
 0x714   : > { %5793 = vrcp.f32 %v1541_v1 }
 0x715   : > { %v1547_v3 = vpop.xlane.xlu1 %1546 }
 0x716   : > { %v1544_v4 = vpop.xlane.xlu0 %1543 }
 0x717   : > { %5795 = vrcp.f32 %v1544_v4 }
 0x718   : > { %5797 = vrcp.f32 %v1547_v3 }
 0x719   : > { %v1550_v6 = vpop.xlane.xlu1 %1549  ;;  %v5790_v7 = vpop.eup %5789 }
 0x71a   : > { %5799 = vrcp.f32 %v1550_v6  ;;  %v1561_v9 = vmul.f32 %v5790_v7, %v5776_v35  ;;  %v2303_v0 = vpop.permute.xlu0 %2302 }
 0x71d   : > { %v5792_v8 = vpop.eup %5791  ;;  %v2305_v15 = vpop.permute.xlu1 %2304 }
 0x71e   : > { %v1562_v10 = vmul.f32 %v5792_v8, %v5778_v39  ;;  %v5794_v11 = vpop.eup %5793 }
 0x71f   : > { %v1563_v17 = vmul.f32 %v5794_v11, %v6861_v33 }
 0x720   : > { %v1568_v12 = vpack.c.bf16 %v1562_v10, %v1561_v9 }
 0x721   : > { %v5796_v13 = vpop.eup %5795 }
 0x722   : > { %v5798_v14 = vpop.eup %5797  ;;  %5424 = vmatprep.subr.msk.bf16.mxu0 %vm1478_vm4, %v1568_v12  ;;  %v1700_v16 = vsel %vm1478_vm4, %v1568_v12, 0  ;;  %v1564_v18 = vmul.f32 %v5796_v13, %v5782_v42 }
 0x723   : > { %5330 = vmatpush3.bf16.xpose.msra.mxu0 %v1700_v16  ;;  %v1627_v19 = vpop.trf.xlu0  ;;  %v1565_v22 = vmul.f32 %v5798_v14, %v6868_v41 }
 0x724   : > { %v5800_v20 = vpop.eup %5799  ;;  %v1569_v21 = vpack.c.bf16 %v1564_v18, %v1563_v17 }
 0x725   : > { %v1566_v24 = vmul.f32 %v5800_v20, %v5784_v45 }
 0x726   : > { %5425 = vmatprep.subr.msk.bf16.mxu1 %vm1478_vm4, %v1569_v21  ;;  %v1758_v25 = vsel %vm1478_vm4, %v1569_v21, 0  ;;  %v1611_v28 = vpop.trf.xlu1 }
 0x727   : > { %5336 = vmatpush3.bf16.xpose.msra.mxu1 %v1758_v25  ;;  %v1570_v29 = vpack.c.bf16 %v1566_v24, %v1565_v22  ;;  %v1628_v30 = vpop.trf.xlu0  ;;  %5337 = vmatprep.mubr.msk.bf16.mxu1 %vm1478_vm4, %v1611_v28 }
 0x728   : > { %5347 = vmatprep.subr.bf16.mxu1 %v6249_v61 }
 0x729   : > { %5426 = vmatprep.subr.msk.bf16.mxu0 %vm1478_vm4, %v1570_v29  ;;  %v1816_v31 = vsel %vm1478_vm4, %v1570_v29, 0 }
 0x72a   : > { %5332 = vmatmul.mubr.msk.bf16.vlgmr.msra.gmra.mrb[20].mxu0 %vm1478_vm4, %v6878_v47  ;;  %v1612_v32 = vpop.trf.xlu1 }
 0x72b   : > { %5342 = vmatpush3.bf16.xpose.msra.mxu0 %v1816_v31  ;;  %5343 = vmatprep.mubr.msk.bf16.mxu0 %vm1478_vm4, %v1627_v19  ;;  %v2334_v33 = vpop.trf.xlu0 }
 0x72c   : > { %5355 = vmatprep.subr.bf16.mxu0 %v6249_v61 }
 0x72e   : > { %5338 = vmatmul.mubr.msk.bf16.vlgmr.msra.gmra.mrb[12].mxu1 %vm1478_vm4, %v1612_v32  ;;  %v2350_v34 = vpop.trf.xlu1 }
 0x72f   : > { %5348 = vmatpush3.bf16.msra.mxu1 %v2334_v33  ;;  %v2335_v35 = vpop.trf.xlu0  ;;  %5351 = vmatprep.mubr.msk.bf16.mxu1 %vm6251_vm2, %v6249_v61 }
 0x730   : > { %5349 = vmatprep.subr.bf16.mxu1 %v6249_v61 }
 0x732   : > { %5344 = vmatmul.mubr.msk.bf16.vlgmr.msra.gmra.mrb[24].mxu0 %vm1478_vm4, %v1628_v30  ;;  %v2351_v36 = vpop.trf.xlu1 }
 0x733   : > { %5350 = vmatpush3.bf16.msra.mxu1 %v2335_v35  ;;  %5356 = vmatpush3.bf16.msra.mxu0 %v2350_v34  ;;  %v2366_v37 = vpop.trf.xlu0 }
 0x734   : > { %5357 = vmatprep.subr.bf16.mxu0 %v6249_v61  ;;  %5363 = vmatprep.subr.bf16.mxu1 %v6249_v61 }
 0x735   : > { %5359 = vmatprep.mubr.msk.bf16.mxu0 %vm6251_vm2, %v6249_v61 }
 0x736   : > { %5352 = vmatmul.mubr.msk.bf16.vlgmr.msra.gmra.mrb[16].mxu1 %vm1301_vm3, %v6816_v27  ;;  %v2382_v38 = vpop.trf.xlu1 }
 0x737   : > { %5358 = vmatpush3.bf16.msra.mxu0 %v2351_v36  ;;  %5364 = vmatpush3.bf16.msra.mxu1 %v2366_v37  ;;  %v2367_v39 = vpop.trf.xlu0 }
 0x738   : > { %5365 = vmatprep.subr.bf16.mxu1 %v6249_v61  ;;  %5371 = vmatprep.subr.bf16.mxu0 %v6249_v61 }
 0x739   : > { %5367 = vmatprep.mubr.msk.bf16.mxu1 %vm6251_vm2, %v6249_v61 }
 0x73a   : > { %5360 = vmatmul.mubr.msk.bf16.vlgmr.msra.gmra.mrb[28].mxu0 %vm1301_vm3, %v6887_v62  ;;  %v2383_v40 = vpop.trf.xlu1 }
 0x73b   : > { %5366 = vmatpush3.bf16.msra.mxu1 %v2367_v39  ;;  %5372 = vmatpush3.bf16.msra.mxu0 %v2382_v38 }
 0x73c   : > { %5373 = vmatprep.subr.bf16.mxu0 %v6249_v61  ;;  %5375 = vmatprep.mubr.msk.bf16.mxu0 %vm6251_vm2, %v6249_v61 }
 0x73e   : > { %5368 = vmatmul.mubr.msk.bf16.vlgmr.msra.gmra.mrb[20].mxu1 %vm1301_vm3, %v2303_v0 }
 0x73f   : > { %5374 = vmatpush3.bf16.msra.mxu0 %v2383_v40 }
 0x742   : > { %5376 = vmatmul.mubr.msk.bf16.vlgmr.msra.gmra.mrb[32].mxu0 %vm1301_vm3, %v2305_v15 }
 0x7c7   : > { %v6925_v27 = vpop.f32.mrb[8].mxu1 }
 0x7c8   : > { %v6927_v41 = vpop.f32.mrb[9].mxu1 }
 0x7c9   : > { %v6929_v42 = vpop.f32.mrb[10].mxu1 }
 0x7ca   : > { %v6931_v43 = vpop.f32.mrb[11].mxu1 }
 0x7fd   : > { %v6933_v44 = vpop.f32.mrb[20].mxu0 }
 0x7fe   : > { %v6935_v45 = vpop.f32.mrb[21].mxu0 }
 0x7ff   : > { %v6937_v46 = vpop.f32.mrb[22].mxu0 }
 0x800   : > { %v6939_v61 = vpop.f32.mrb[23].mxu0 }
 0x801   : > { %v6941_v47 = vpop.f32.mrb[12].mxu1 }
 0x802   : > { %v6943_v48 = vpop.f32.mrb[13].mxu1 }
 0x803   : > { %v6945_v50 = vpop.f32.mrb[14].mxu1 }
 0x804   : > { %v6947_v51 = vpop.f32.mrb[15].mxu1 }
 0x805   : > { %v6949_v52 = vpop.f32.mrb[24].mxu0 }
 0x806   : > { %v6951_v53 = vpop.f32.mrb[25].mxu0 }
 0x807   : > { %v6953_v54 = vpop.f32.mrb[26].mxu0 }
 0x808   : > { %v6955_v55 = vpop.f32.mrb[27].mxu0 }
 0x809   : > { %v2427_v56 = vpop.f32.mrb[16].mxu1 }
 0x80a   : > { %v5353_v57 = vpop.f32.mrb[17].mxu1  ;;  %v2566_v58 = vsel %vm1478_vm4, %v2427_v56, -inf }
 0x80b   : > { %2567 = vmax.xlane.f32.xlu0 %v2566_v58  ;;  %v2430_v59 = vpop.f32.mrb[18].mxu1 }
 0x80c   : > { %v5354_v60 = vpop.f32.mrb[19].mxu1  ;;  %v2569_v26 = vsel %vm1478_vm4, %v2430_v59, -inf }
 0x80d   : > { %v2471_v62 = vpop.f32.mrb[28].mxu0  ;;  %2570 = vmax.xlane.f32.xlu1 %v2569_v26 }
 0x80e   : > { %v5361_v63 = vpop.f32.mrb[29].mxu0  ;;  %v2572_v1 = vsel %vm1478_vm4, %v2471_v62, -inf }
 0x80f   : > { %v2474_v2 = vpop.f32.mrb[30].mxu0  ;;  %2573 = vmax.xlane.f32.xlu0 %v2572_v1 }
 0x810   : > { %v5362_v3 = vpop.f32.mrb[31].mxu0  ;;  %v2575_v4 = vsel %vm1478_vm4, %v2474_v2, -inf }
 0x811   : > { %2576 = vmax.xlane.f32.xlu1 %v2575_v4  ;;  %v2515_v6 = vpop.f32.mrb[20].mxu1 }
 0x812   : > { %v5369_v7 = vpop.f32.mrb[21].mxu1  ;;  %v2578_v8 = vsel %vm1478_vm4, %v2515_v6, -inf }
 0x813   : > { %2579 = vmax.xlane.f32.xlu0 %v2578_v8  ;;  %v6962_v9 = vpop.f32.mrb[22].mxu1 }
 0x814   : > { %v5370_v10 = vpop.f32.mrb[23].mxu1  ;;  %v2581_v11 = vsel %vm1478_vm4, %v6962_v9, -inf }
 0x815   : > { %v2559_v0 = vpop.f32.mrb[32].mxu0  ;;  %2582 = vmax.xlane.f32.xlu1 %v2581_v11 }
 0x816   : > { %v5377_v12 = vpop.f32.mrb[33].mxu0  ;;  %v2584_v13 = vsel %vm1478_vm4, %v2559_v0, -inf }
 0x817   : > { %v2562_v14 = vpop.f32.mrb[34].mxu0  ;;  %2585 = vmax.xlane.f32.xlu0 %v2584_v13 }
 0x818   : > { %v5378_v15 = vpop.f32.mrb[35].mxu0  ;;  %v2587_v16 = vsel %vm1478_vm4, %v2562_v14, -inf }
 0x819   : > { %2588 = vmax.xlane.f32.xlu1 %v2587_v16 }
 0x82d   : > { %2317 = vrot.lane.b32.xlu0 %v6810_v23, %s6248_s20 }
 0x831   : > { %2323 = vrot.lane.b32.xlu0 %v6810_v23, %s6250_s10 }
 0x898   : > { %v2568_v17 = vpop.xlane.xlu0 %2567 }
 0x899   : > { %v2590_v18 = vsub.f32 %v2427_v56, %v2568_v17 }
 0x89a   : > { %v2571_v19 = vpop.xlane.xlu1 %2570 }
 0x89b   : > { %v2598_v20 = vmul.f32 1.442695, %v2590_v18  ;;  %v2591_v21 = vsub.f32 %v2430_v59, %v2571_v19 }
 0x89c   : > { %v2574_v22 = vpop.xlane.xlu0 %2573 }
 0x89d   : > { %5801 = vpow2.f32 %v2598_v20  ;;  %v2600_v24 = vmul.f32 1.442695, %v2591_v21  ;;  %v2592_v25 = vsub.f32 %v2471_v62, %v2574_v22 }
 0x89e   : > { %v2577_v28 = vpop.xlane.xlu1 %2576 }
 0x89f   : > { %5803 = vpow2.f32 %v2600_v24  ;;  %v2602_v29 = vmul.f32 1.442695, %v2592_v25  ;;  %v2593_v30 = vsub.f32 %v2474_v2, %v2577_v28 }
 0x8a0   : > { %v2580_v31 = vpop.xlane.xlu0 %2579 }
 0x8a1   : > { %v2594_v32 = vsub.f32 %v2515_v6, %v2580_v31  ;;  %5805 = vpow2.f32 %v2602_v29  ;;  %v2604_v34 = vmul.f32 1.442695, %v2593_v30 }
 0x8a2   : > { %v2583_v33 = vpop.xlane.xlu1 %2582 }
 0x8a3   : > { %v2606_v35 = vmul.f32 1.442695, %v2594_v32  ;;  %v2595_v10 = vsub.f32 %v6962_v9, %v2583_v33 }
 0x8a4   : > { %v2586_v36 = vpop.xlane.xlu0 %2585 }
 0x8a5   : > { %5807 = vpow2.f32 %v2606_v35  ;;  %v2596_v37 = vsub.f32 %v2559_v0, %v2586_v36  ;;  %v2608_v11 = vmul.f32 1.442695, %v2595_v10 }
 0x8a6   : > { %v2589_v38 = vpop.xlane.xlu1 %2588  ;;  %5809 = vpow2.f32 %v2604_v34 }
 0x8a7   : > { %v5802_v39 = vpop.eup %5801  ;;  %v2610_v40 = vmul.f32 1.442695, %v2596_v37  ;;  %v2597_v56 = vsub.f32 %v2562_v14, %v2589_v38 }
 0x8a8   : > { %v2614_v57 = vsel %vm1478_vm4, %v5802_v39, 0.0  ;;  %v2318_v13 = vpop.permute.xlu0 %2317 }
 0x8a9   : > { %v5804_v58 = vpop.eup %5803  ;;  %5811 = vpow2.f32 %v2610_v40  ;;  %v2612_v59 = vmul.f32 1.442695, %v2597_v56  ;;  %2615 = vadd.xlane.f32.xlu1 %v2614_v57 }
 0x8aa   : > { %v2617_v60 = vsel %vm1478_vm4, %v5804_v58, 0.0 }
 0x8ab   : > { %5813 = vpow2.f32 %v2612_v59  ;;  %v6974_v26 = vpop.eup %5805 }
 0x8ac   : > { %v2620_v63 = vsel %vm1478_vm4, %v6974_v26, 0.0  ;;  %5815 = vpow2.f32 %v2608_v11 }
 0x8ad   : > { %2618 = vadd.xlane.f32.xlu1 %v2617_v60 }
 0x8af   : > { %v6976_v62 = vpop.eup %5807 }
 0x8b0   : > { %v2626_v1 = vsel %vm1478_vm4, %v6976_v62, 0.0  ;;  %v5810_v2 = vpop.eup %5809 }
 0x8b1   : > { %2621 = vadd.xlane.f32.xlu1 %v2620_v63  ;;  %2627 = vadd.xlane.f32.xlu0 %v2626_v1  ;;  %v2623_v4 = vsel %vm1478_vm4, %v5810_v2, 0.0 }
 0x8b3   : > { %v6982_v3 = vpop.eup %5811 }
 0x8b4   : > { %v2632_v6 = vsel %vm1478_vm4, %v6982_v3, 0.0 }
 0x8b5   : > { %v5814_v7 = vpop.eup %5813  ;;  %2624 = vadd.xlane.f32.xlu1 %v2623_v4  ;;  %2633 = vadd.xlane.f32.xlu0 %v2632_v6 }
 0x8b6   : > { %v2635_v8 = vsel %vm1478_vm4, %v5814_v7, 0.0  ;;  %v6991_v0 = vpop.eup %5815 }
 0x8b7   : > { %v2629_v12 = vsel %vm1478_vm4, %v6991_v0, 0.0 }
 0x8b9   : > { %2636 = vadd.xlane.f32.xlu0 %v2635_v8  ;;  %v6252_v8 = vmov 1983009808  }
 0x8ba   : > { %v1998_v10 = vunpack.c.l.s4 %v6252_v8 }
 0x8c6   : > { %2320 = vrot.lane.b32.xlu1 %v6810_v23, %s6247_s30 }
 0x8e6   : > { %2658 = vxpose.xlu0.c.b16.start.end [1/1] (short) (narrow) %v6810_v23, 32  ;;  %v2324_v23 = vpop.permute.xlu0 %2323 }
 0x8ea   : > { %2630 = vadd.xlane.f32.xlu1 %v2629_v12 }
 0x917   : > { %2674 = vxpose.xlu1.c.b16.start.end [1/1] (short) (narrow) %v2318_v13, 32 }
 0x925   : > { %1867 = vxpose.xlu1.b32.start [1/4] (short) (narrow) %v6927_v41, 16 }
 0x929   : > { %1868 = vxpose.xlu1.b32.cont [2/4] (short) (narrow) %v6931_v43, 16 }
 0x92d   : > { %1869 = vxpose.xlu1.b32.cont [3/4] (short) (narrow) %v6925_v27, 16 }
 0x931   : > { %1870 = vxpose.xlu1.b32.end [4/4] (short) (narrow) %v6929_v42, 16 }
 0x935   : > { %1963 = vxpose.xlu1.b32.start [1/4] (short) (narrow) %v6951_v53, 16 }
 0x936   : > { %v2616_v9 = vpop.xlane.xlu1 %2615 }
 0x937   : > { %5817 = vrcp.f32 %v2616_v9  ;;  %v1999_v9 = vunpack.c.0.s8 %v1998_v10 }
 0x939   : > { %1964 = vxpose.xlu1.b32.cont [2/4] (short) (narrow) %v6955_v55, 16 }
 0x93a   : > { %v2619_v14 = vpop.xlane.xlu1 %2618 }
 0x93b   : > { %5819 = vrcp.f32 %v2619_v14 }
 0x93d   : > { %1965 = vxpose.xlu1.b32.cont [3/4] (short) (narrow) %v6949_v52, 16 }
 0x93e   : > { %v2622_v15 = vpop.xlane.xlu1 %2621  ;;  %v2628_v16 = vpop.xlane.xlu0 %2627 }
 0x93f   : > { %5821 = vrcp.f32 %v2622_v15 }
 0x941   : > { %1966 = vxpose.xlu1.b32.end [4/4] (short) (narrow) %v6953_v54, 16  ;;  %v5818_v43 = vpop.eup %5817 }
 0x942   : > { %v2625_v41 = vpop.xlane.xlu1 %2624  ;;  %v2634_v27 = vpop.xlane.xlu0 %2633  ;;  %v2646_v18 = vmul.f32 %v5818_v43, %v5802_v39 }
 0x943   : > { %5823 = vrcp.f32 %v2625_v41  ;;  %v7034_v41 = vsub.s32 %v1999_v9, %v6776_v5 }
 0x944   : > { %5825 = vrcp.f32 %v2634_v27  ;;  %v6253_v27 = vmov 1934713408  }
 0x945   : > { %v5820_v42 = vpop.eup %5819  ;;  %v2030_v43 = vunpack.c.l.s4 %v6253_v27 }
 0x946   : > { %v2321_v53 = vpop.permute.xlu1 %2320  ;;  %v2637_v17 = vpop.xlane.xlu0 %2636  ;;  %v2647_v55 = vmul.f32 %v5820_v42, %v5804_v58 }
 0x947   : > { %5827 = vrcp.f32 %v2637_v17  ;;  %2690 = vxpose.xlu0.c.b16.start.end [1/1] (short) (narrow) %v2321_v53, 32 }
 0x948   : > { %v2654_v19 = vpack.c.bf16 %v2647_v55, %v2646_v18  ;;  %5829 = vrcp.f32 %v2628_v16 }
 0x949   : > { %v5822_v20 = vpop.eup %5821 }
 0x94a   : > { %5427 = vmatprep.subr.msk.bf16.mxu1 %vm1478_vm4, %v2654_v19  ;;  %v2729_v52 = vsel %vm1478_vm4, %v2654_v19, 0  ;;  %v2648_v22 = vmul.f32 %v5822_v20, %v6974_v26 }
 0x94b   : > { %5380 = vmatpush3.bf16.xpose.msra.mxu1 %v2729_v52 }
 0x94c   : > { %2706 = vxpose.xlu0.c.b16.start.end [1/1] (short) (narrow) %v2324_v23, 32  ;;  %v2666_v54 = vpop.trf.xlu0 }
 0x94d   : > { %v5824_v21 = vpop.eup %5823  ;;  %5381 = vmatprep.mubr.msk.bf16.mxu1 %vm1478_vm4, %v2666_v54 }
 0x94e   : > { %v2649_v24 = vmul.f32 %v5824_v21, %v5810_v2  ;;  %v5826_v25 = vpop.eup %5825 }
 0x94f   : > { %v2652_v32 = vmul.f32 %v5826_v25, %v6982_v3 }
 0x950   : > { %v2655_v28 = vpack.c.bf16 %v2649_v24, %v2648_v22  ;;  %v2667_v29 = vpop.trf.xlu0  ;;  %v2031_v22 = vunpack.c.0.s8 %v2030_v43 }
 0x951   : > { %v5828_v30 = vpop.eup %5827 }
 0x952   : > { %5428 = vmatprep.subr.msk.bf16.mxu0 %vm1478_vm4, %v2655_v28  ;;  %v2787_v31 = vsel %vm1478_vm4, %v2655_v28, 0  ;;  %v2653_v33 = vmul.f32 %v5828_v30, %v5814_v7  ;;  %5382 = vmatmul.mubr.msk.bf16.vlgmr.msra.gmra.mrb[24].mxu1 %vm1478_vm4, %v2667_v29  ;;  %v5830_v36 = vpop.eup %5829 }
 0x953   : > { %5386 = vmatpush3.bf16.xpose.msra.mxu0 %v2787_v31 }
 0x954   : > { %1899 = vxpose.xlu0.b32.start [1/4] (short) (narrow) %v6935_v45, 16  ;;  %v2657_v34 = vpack.c.bf16 %v2653_v33, %v2652_v32 }
 0x956   : > { %5430 = vmatprep.subr.msk.bf16.mxu0 %vm1478_vm4, %v2657_v34 }
 0x958   : > { %1900 = vxpose.xlu0.b32.cont [2/4] (short) (narrow) %v6939_v61, 16 }
 0x95c   : > { %1901 = vxpose.xlu0.b32.cont [3/4] (short) (narrow) %v6933_v44, 16  ;;  %v2903_v44 = vsel %vm1478_vm4, %v2657_v34, 0  ;;  %v7045_v34 = vsub.s32 %v2031_v22, %v6776_v5 }
 0x960   : > { %1902 = vxpose.xlu0.b32.end [4/4] (short) (narrow) %v6937_v46, 16  ;;  %v2650_v46 = vmul.f32 %v5830_v36, %v6976_v62 }
 0x964   : > { %1931 = vxpose.xlu0.b32.start [1/4] (short) (narrow) %v6943_v48, 16 }
 0x968   : > { %1932 = vxpose.xlu0.b32.cont [2/4] (short) (narrow) %v6947_v51, 16 }
 0x96c   : > { %1933 = vxpose.xlu0.b32.cont [3/4] (short) (narrow) %v6941_v47, 16 }
 0x970   : > { %1934 = vxpose.xlu0.b32.end [4/4] (short) (narrow) %v6945_v50, 16 }
 0x977   : > { %v2631_v35 = vpop.xlane.xlu1 %2630 }
 0x978   : > { %5831 = vrcp.f32 %v2631_v35 }
 0x97d   : > { %v2682_v45 = vpop.trf.xlu1 }
 0x97e   : > { %5387 = vmatprep.mubr.msk.bf16.mxu0 %vm1478_vm4, %v2682_v45 }
 0x981   : > { %v2683_v61 = vpop.trf.xlu1 }
 0x982   : > { %v5832_v37 = vpop.eup %5831  ;;  %5388 = vmatmul.mubr.msk.bf16.vlgmr.msra.gmra.mrb[36].mxu0 %vm1478_vm4, %v2683_v61 }
 0x983   : > { %5398 = vmatpush3.bf16.xpose.msra.mxu0 %v2903_v44  ;;  %v2651_v47 = vmul.f32 %v5832_v37, %v6991_v0 }
 0x985   : > { %v2656_v48 = vpack.c.bf16 %v2651_v47, %v2650_v46 }
 0x987   : > { %5429 = vmatprep.subr.msk.bf16.mxu1 %vm1478_vm4, %v2656_v48  ;;  %v2845_v50 = vsel %vm1478_vm4, %v2656_v48, 0 }
 0x988   : > { %5392 = vmatpush3.bf16.xpose.msra.mxu1 %v2845_v50 }
 0x9a5   : > { %v1883_v1 = vpop.trf.xlu1 }
 0x9a9   : > { %v1884_v3 = vpop.trf.xlu1 }
 0x9ad   : > { %v2698_v51 = vpop.trf.xlu0 }
 0x9ae   : > { %5393 = vmatprep.mubr.msk.bf16.mxu1 %vm1478_vm4, %v2698_v51 }
 0x9b1   : > { %v2699_v38 = vpop.trf.xlu0 }
 0x9b2   : > { %5394 = vmatmul.mubr.msk.bf16.vlgmr.msra.gmra.mrb[28].mxu1 %vm1478_vm4, %v2699_v38 }
 0x9b5   : > { %v2714_v39 = vpop.trf.xlu0  ;;  %v1979_v0 = vpop.trf.xlu1 }
 0x9b6   : > { %5399 = vmatprep.mubr.msk.bf16.mxu0 %vm1478_vm4, %v2714_v39 }
 0x9b9   : > { %v2715_v40 = vpop.trf.xlu0  ;;  %v1980_v14 = vpop.trf.xlu1 }
 0x9ba   : > { %5400 = vmatmul.mubr.msk.bf16.vlgmr.msra.gmra.mrb[40].mxu0 %vm1478_vm4, %v2715_v40 }
 0x9bb   : > { %3809 = vmatprep.mubr.bf16.mxu0 %v6246_v49 }
 0x9d4   : > { %v1915_v2 = vpop.trf.xlu0 }
 0x9d5   : > { %v2011_v17 = vcombine.low %v1915_v2, %v1979_v0  ;;  %v2012_v18 = vcombine.high %v1915_v2, %v1979_v0 }
 0x9d7   : > { %v2019_v24 = vrot.slane %v2011_v17, %v7034_v41  ;;  %v2026_v25 = vrot.slane %v2012_v18, %v7034_v41 }
 0x9d8   : > { %v1916_v4 = vpop.trf.xlu0 }
 0x9d9   : > { %v2079_v52 = vcombine.low %v1916_v4, %v1980_v14  ;;  %v2080_v20 = vcombine.high %v1916_v4, %v1980_v14 }
 0x9db   : > { %v2087_v30 = vrot.slane %v2079_v52, %v7034_v41  ;;  %v2094_v31 = vrot.slane %v2080_v20, %v7034_v41 }
 0x9e4   : > { %v1947_v13 = vpop.trf.xlu0 }
 0x9e5   : > { %v1995_v55 = vcombine.low %v1883_v1, %v1947_v13  ;;  %v1996_v19 = vcombine.high %v1883_v1, %v1947_v13 }
 0x9e7   : > { %v2003_v28 = vrot.slane %v1995_v55, %v7034_v41  ;;  %v2010_v29 = vrot.slane %v1996_v19, %v7034_v41 }
 0x9e8   : > { %v1948_v16 = vpop.trf.xlu0 }
 0x9e9   : > { %v2063_v54 = vcombine.low %v1884_v3, %v1948_v16  ;;  %v2064_v21 = vcombine.high %v1884_v3, %v1948_v16  ;;  %v2027_v35 = vcombine.low %v2003_v28, %v2019_v24  ;;  %v2028_v45 = vcombine.high %v2003_v28, %v2019_v24 }
 0x9ea   : > { %v2043_v36 = vcombine.low %v2010_v29, %v2026_v25  ;;  %v2044_v61 = vcombine.high %v2010_v29, %v2026_v25  ;;  %v5673_v29 = vld [vmem:[%s6719_s4] sm:$0xff]  }
 0x9eb   : > { %v2071_v32 = vrot.slane %v2063_v54, %v7034_v41  ;;  %v2078_v33 = vrot.slane %v2064_v21, %v7034_v41  ;;  %v2035_v48 = vrot.slane %v2027_v35, %v7045_v34  ;;  %v2042_v50 = vrot.slane %v2028_v45, %v7045_v34  ;;  %5403 = vmatprep.subr.bf16.mxu1 %v5673_v29  ;;  %v5676_v35 = vld [vmem:[%s6719_s4 + $0x18] sm:$0xff]   ;;  %v5677_v45 = vld [vmem:[%s6719_s4 + $0x20] sm:$0xff]  }
 0x9ec   : > { %v2051_v51 = vrot.slane %v2043_v36, %v7045_v34  ;;  %v2058_v38 = vrot.slane %v2044_v61, %v7045_v34  ;;  %5404 = vmatpush3.bf16.msra.mxu1 %v5673_v29  ;;  %v5678_v36 = vld [vmem:[%s6719_s4 + $0x28] sm:$0xff]  }
 0x9ed   : > { %v2095_v37 = vcombine.low %v2071_v32, %v2087_v30  ;;  %v2096_v44 = vcombine.high %v2071_v32, %v2087_v30  ;;  %v2111_v46 = vcombine.low %v2078_v33, %v2094_v31  ;;  %v2112_v47 = vcombine.high %v2078_v33, %v2094_v31  ;;  %v5674_v30 = vld [vmem:[%s6719_s4 + $0x8] sm:$0xff]   ;;  %v5675_v33 = vld [vmem:[%s6719_s4 + $0x10] sm:$0xff]  }
 0x9ee   : > { %5405 = vmatprep.subr.bf16.mxu1 %v5674_v30 }
 0x9ef   : > { %v2103_v39 = vrot.slane %v2095_v37, %v7045_v34  ;;  %v2110_v40 = vrot.slane %v2096_v44, %v7045_v34 }
 0x9f0   : > { %5406 = vmatpush3.bf16.msra.mxu1 %v5674_v30 }
 0x9f1   : > { %5407 = vmatprep.subr.bf16.mxu1 %v5675_v33 }
 0x9f4   : > { %5408 = vmatpush3.bf16.msra.mxu1 %v5675_v33  ;;  %v5679_v33 = vld [vmem:[%s6719_s4 + $0x30] sm:$0xff]  }
 0x9f5   : > { %5409 = vmatprep.subr.bf16.mxu1 %v5676_v35 }
 0x9f8   : > { %5410 = vmatpush3.bf16.msra.mxu1 %v5676_v35 }
 0x9f9   : > { %5411 = vmatprep.subr.bf16.mxu1 %v5677_v45 }
 0x9fc   : > { %5412 = vmatpush3.bf16.msra.mxu1 %v5677_v45 }
 0x9fd   : > { %5413 = vmatprep.subr.bf16.mxu1 %v5678_v36 }
 0xa00   : > { %5414 = vmatpush3.bf16.msra.mxu1 %v5678_v36 }
 0xa01   : > { %5415 = vmatprep.subr.bf16.mxu1 %v5679_v33 }
 0xa04   : > { %5416 = vmatpush3.bf16.msra.mxu1 %v5679_v33 }
 0xa25   : > { %v5383_v56 = vpop.f32.mrb[24].mxu1 }
 0xa26   : > { %v2765_v57 = vpop.f32.mrb[25].mxu1 }
 0xa27   : > { %2954 = vxpose.xlu0.b32.start [1/4] (short) (narrow) %v2765_v57, 16  ;;  %v5384_v58 = vpop.f32.mrb[26].mxu1  ;;  %v2126_v57 = vrot.slane %v2112_v47, %v7045_v34 }
 0xa28   : > { %v2768_v59 = vpop.f32.mrb[27].mxu1 }
 0xa2b   : > { %2955 = vxpose.xlu0.b32.cont [2/4] (short) (narrow) %v2768_v59, 16  ;;  %v4960_v59 = vcombine.high %v2035_v48, %v2042_v50 }
 0xa2d   : > { %v2146_v4 = vrot.slane %v4960_v59, %v7034_v41 }
 0xa2f   : > { %2956 = vxpose.xlu0.b32.cont [3/4] (short) (narrow) %v5383_v56, 16  ;;  %v2119_v56 = vrot.slane %v2111_v46, %v7045_v34 }
 0xa31   : > { %v2215_v1 = vcombine.low %v2119_v56, %v2126_v57  ;;  %v4963_v2 = vcombine.high %v2119_v56, %v2126_v57 }
 0xa33   : > { %2957 = vxpose.xlu0.b32.end [4/4] (short) (narrow) %v5384_v58, 16  ;;  %v2131_v58 = vcombine.low %v2035_v48, %v2042_v50  ;;  %v2230_v0 = vrot.slane %v4963_v2, %v7034_v41 }
 0xa35   : > { %v2138_v3 = vrot.slane %v2131_v58, %v7034_v41 }
 0xa37   : > { %v2163_v14 = vcombine.low %v2138_v3, %v2146_v4 }
 0xa39   : > { %v7068_v18 = vrot.slane %v2163_v14, %v7045_v34 }
 0xa55   : > { %v5389_v60 = vpop.f32.mrb[36].mxu0 }
 0xa56   : > { %v2823_v26 = vpop.f32.mrb[37].mxu0 }
 0xa57   : > { %2986 = vxpose.xlu1.b32.start [1/4] (short) (narrow) %v2823_v26, 16  ;;  %v5390_v62 = vpop.f32.mrb[38].mxu0  ;;  %v4961_v26 = vcombine.high %v2051_v51, %v2058_v38 }
 0xa58   : > { %v2826_v63 = vpop.f32.mrb[39].mxu0 }
 0xa5b   : > { %2987 = vxpose.xlu1.b32.cont [2/4] (short) (narrow) %v2826_v63, 16  ;;  %v4962_v63 = vcombine.high %v2103_v39, %v2110_v40 }
 0xa5d   : > { %v2214_v10 = vrot.slane %v4962_v63, %v7034_v41 }
 0xa5f   : > { %2988 = vxpose.xlu1.b32.cont [3/4] (short) (narrow) %v5389_v60, 16  ;;  %v2147_v60 = vcombine.low %v2051_v51, %v2058_v38 }
 0xa63   : > { %2989 = vxpose.xlu1.b32.end [4/4] (short) (narrow) %v5390_v62, 16  ;;  %v2199_v62 = vcombine.low %v2103_v39, %v2110_v40 }
 0xa65   : > { %v2206_v8 = vrot.slane %v2199_v62, %v7034_v41 }
 0xa67   : > { %v2232_v9 = vcombine.high %v2206_v8, %v2214_v10  ;;  %v2231_v16 = vcombine.low %v2206_v8, %v2214_v10 }
 0xa69   : > { %v7074_v19 = vrot.slane %v2231_v16, %v7045_v34 }
 0xa85   : > { %v5395_v6 = vpop.f32.mrb[28].mxu1 }
 0xa86   : > { %v2881_v7 = vpop.f32.mrb[29].mxu1 }
 0xa87   : > { %3018 = vxpose.xlu0.b32.start [1/4] (short) (narrow) %v2881_v7, 16  ;;  %v5396_v11 = vpop.f32.mrb[30].mxu1  ;;  %v2162_v7 = vrot.slane %v4961_v26, %v7034_v41 }
 0xa88   : > { %v2884_v12 = vpop.f32.mrb[31].mxu1 }
 0xa8b   : > { %3019 = vxpose.xlu0.b32.cont [2/4] (short) (narrow) %v2884_v12, 16  ;;  %v2164_v12 = vcombine.high %v2138_v3, %v2146_v4 }
 0xa8d   : > { %v5401_v23 = vpop.f32.mrb[40].mxu0  ;;  %v2178_v43 = vrot.slane %v2164_v12, %v7045_v34 }
 0xa8e   : > { %v2939_v15 = vpop.f32.mrb[41].mxu0 }
 0xa8f   : > { %3020 = vxpose.xlu0.b32.cont [3/4] (short) (narrow) %v5395_v6, 16  ;;  %3050 = vxpose.xlu1.b32.start [1/4] (short) (narrow) %v2939_v15, 16  ;;  %v5402_v42 = vpop.f32.mrb[42].mxu0  ;;  %v2154_v6 = vrot.slane %v2147_v60, %v7034_v41 }
 0xa90   : > { %v2942_v53 = vpop.f32.mrb[43].mxu0 }
 0xa91   : > { %v2180_v13 = vcombine.high %v2154_v6, %v2162_v7  ;;  %v2179_v15 = vcombine.low %v2154_v6, %v2162_v7 }
 0xa93   : > { %3021 = vxpose.xlu0.b32.end [4/4] (short) (narrow) %v5396_v11, 16  ;;  %3051 = vxpose.xlu1.b32.cont [2/4] (short) (narrow) %v2942_v53, 16  ;;  %v2222_v11 = vrot.slane %v2215_v1, %v7034_v41  ;;  %v2246_v53 = vrot.slane %v2232_v9, %v7045_v34  ;;  %v7071_v55 = vrot.slane %v2179_v15, %v7045_v34 }
 0xa95   : > { %v2247_v27 = vcombine.low %v2222_v11, %v2230_v0  ;;  %v2196_v21 = vcombine.high %v7068_v18, %v7071_v55 }
 0xa97   : > { %3052 = vxpose.xlu1.b32.cont [3/4] (short) (narrow) %v5401_v23, 16  ;;  %v2248_v23 = vcombine.high %v2222_v11, %v2230_v0  ;;  %v7077_v52 = vrot.slane %v2247_v27, %v7045_v34 }
 0xa99   : > { %v2262_v17 = vrot.slane %v2248_v23, %v7045_v34  ;;  %v2264_v22 = vcombine.high %v7074_v19, %v7077_v52 }
 0xa9b   : > { %3053 = vxpose.xlu1.b32.end [4/4] (short) (narrow) %v5402_v42, 16  ;;  %v2194_v42 = vrot.slane %v2180_v13, %v7045_v34  ;;  %v2265_v54 = vcombine.low %v2246_v53, %v2262_v17  ;;  %v2266_v28 = vcombine.high %v2246_v53, %v2262_v17  ;;  %v5611_v31 = vpack.i.bf16 %v2264_v22, %v2196_v21 }
 0xa9d   : > { %v2197_v20 = vcombine.low %v2178_v43, %v2194_v42  ;;  %v2198_v25 = vcombine.high %v2178_v43, %v2194_v42 }
 0xa9f   : > { %v5616_v24 = vpack.i.bf16 %v2265_v54, %v2197_v20  ;;  %v5621_v32 = vpack.i.bf16 %v2266_v28, %v2198_v25 }
 0xaa7   : > { %v2970_v61 = vpop.trf.xlu0 }
 0xaab   : > { %v2971_v44 = vpop.trf.xlu0 }
 0xab9   : > { %5617 = vrot.lane.b32.xlu1 %v5616_v24, %s6247_s30 }
 0xabc   : > { %5612 = vrot.lane.b32.xlu0 %v5611_v31, %s6250_s10 }
 0xabd   : > { %5622 = vrot.lane.b32.xlu1 %v5621_v32, %s6248_s20 }
 0xad7   : > { %v3002_v37 = vpop.trf.xlu1 }
 0xadb   : > { %v3003_v46 = vpop.trf.xlu1 }
 0xb07   : > { %v3034_v47 = vpop.trf.xlu0 }
 0xb08   : > { %v3082_v48 = vcombine.low %v2970_v61, %v3034_v47  ;;  %v3083_v50 = vcombine.high %v2970_v61, %v3034_v47 }
 0xb0a   : > { %v3090_v56 = vrot.slane %v3082_v48, %v7034_v41  ;;  %v3097_v57 = vrot.slane %v3083_v50, %v7034_v41 }
 0xb0b   : > { %v3035_v38 = vpop.trf.xlu0 }
 0xb0c   : > { %v3150_v60 = vcombine.low %v2971_v44, %v3035_v38  ;;  %v3151_v26 = vcombine.high %v2971_v44, %v3035_v38 }
 0xb0e   : > { %v3158_v0 = vrot.slane %v3150_v60, %v7034_v41  ;;  %v3165_v12 = vrot.slane %v3151_v26, %v7034_v41 }
 0xb0f   : > { %v3066_v51 = vpop.trf.xlu1 }
 0xb10   : > { %v3098_v39 = vcombine.low %v3002_v37, %v3066_v51  ;;  %v3099_v40 = vcombine.high %v3002_v37, %v3066_v51 }
 0xb12   : > { %v3106_v58 = vrot.slane %v3098_v39, %v7034_v41  ;;  %v3113_v59 = vrot.slane %v3099_v40, %v7034_v41  ;;  %v5680_v40 = vld [vmem:[%s6719_s4 + $0x38] sm:$0xff]   ;;  %s7593_s4 = sld [smem:[#allocation47_spill]] (!%p5064_p5) }
 0xb13   : > { %v3067_v62 = vpop.trf.xlu1  ;;  %5417 = vmatprep.subr.bf16.mxu1 %v5680_v40 }
 0xb14   : > { %v3114_v63 = vcombine.low %v3090_v56, %v3106_v58  ;;  %v3115_v1 = vcombine.high %v3090_v56, %v3106_v58  ;;  %v3130_v2 = vcombine.low %v3097_v57, %v3113_v59  ;;  %v3131_v3 = vcombine.high %v3097_v57, %v3113_v59  ;;  %5418 = vmatpush3.bf16.msra.mxu1 %v5680_v40 }
 0xb15   : > { %v3166_v4 = vcombine.low %v3003_v46, %v3067_v62  ;;  %v3167_v6 = vcombine.high %v3003_v46, %v3067_v62 }
 0xb16   : > { %v3122_v7 = vrot.slane %v3114_v63, %v7045_v34  ;;  %v3129_v8 = vrot.slane %v3115_v1, %v7045_v34  ;;  %v3138_v10 = vrot.slane %v3130_v2, %v7045_v34  ;;  %v3145_v11 = vrot.slane %v3131_v3, %v7045_v34 }
 0xb17   : > { %v3174_v13 = vrot.slane %v3166_v4, %v7034_v41  ;;  %v3181_v9 = vrot.slane %v3167_v6, %v7034_v41 }
 0xb18   : > { %v3218_v23 = vcombine.low %v3122_v7, %v3129_v8  ;;  %v4976_v14 = vcombine.high %v3122_v7, %v3129_v8  ;;  %v3234_v15 = vcombine.low %v3138_v10, %v3145_v11  ;;  %v4977_v16 = vcombine.high %v3138_v10, %v3145_v11 }
 0xb19   : > { %v3182_v27 = vcombine.low %v3158_v0, %v3174_v13  ;;  %v3183_v43 = vcombine.high %v3158_v0, %v3174_v13  ;;  %v3198_v42 = vcombine.low %v3165_v12, %v3181_v9  ;;  %v3199_v53 = vcombine.high %v3165_v12, %v3181_v9 }
 0xb1a   : > { %v3225_v17 = vrot.slane %v3218_v23, %v7034_v41  ;;  %v3233_v20 = vrot.slane %v4976_v14, %v7034_v41  ;;  %v3241_v54 = vrot.slane %v3234_v15, %v7034_v41  ;;  %v3249_v21 = vrot.slane %v4977_v16, %v7034_v41 }
 0xb1b   : > { %v3190_v22 = vrot.slane %v3182_v27, %v7045_v34  ;;  %v3197_v24 = vrot.slane %v3183_v43, %v7045_v34  ;;  %v3206_v25 = vrot.slane %v3198_v42, %v7045_v34  ;;  %v3213_v28 = vrot.slane %v3199_v53, %v7045_v34 }
 0xb1c   : > { %v3251_v29 = vcombine.high %v3225_v17, %v3233_v20  ;;  %v3267_v30 = vcombine.high %v3241_v54, %v3249_v21  ;;  %v3250_v31 = vcombine.low %v3225_v17, %v3233_v20  ;;  %v3266_v32 = vcombine.low %v3241_v54, %v3249_v21 }
 0xb1d   : > { %v3286_v35 = vcombine.low %v3190_v22, %v3197_v24  ;;  %v4978_v45 = vcombine.high %v3190_v22, %v3197_v24  ;;  %v3302_v36 = vcombine.low %v3206_v25, %v3213_v28  ;;  %v4979_v61 = vcombine.high %v3206_v25, %v3213_v28 }
 0xb1e   : > { %v7114_v37 = vrot.slane %v3250_v31, %v7045_v34  ;;  %v7117_v44 = vrot.slane %v3266_v32, %v7045_v34  ;;  %v3265_v51 = vrot.slane %v3251_v29, %v7045_v34  ;;  %v3281_v38 = vrot.slane %v3267_v30, %v7045_v34 }
 0xb1f   : > { %v3293_v46 = vrot.slane %v3286_v35, %v7034_v41  ;;  %v3301_v47 = vrot.slane %v4978_v45, %v7034_v41  ;;  %v3309_v48 = vrot.slane %v3302_v36, %v7034_v41  ;;  %v3317_v50 = vrot.slane %v4979_v61, %v7034_v41 }
 0xb20   : > { %v3282_v39 = vcombine.low %v7114_v37, %v7117_v44  ;;  %v3285_v63 = vcombine.high %v3265_v51, %v3281_v38  ;;  %v3283_v2 = vcombine.high %v7114_v37, %v7117_v44  ;;  %v3284_v10 = vcombine.low %v3265_v51, %v3281_v38  ;;  %v7156_v44 = vld [vmem:[%s6708_s15] sm:$0xff] }
 0xb21   : > { %v3319_v56 = vcombine.high %v3293_v46, %v3301_v47  ;;  %v3335_v57 = vcombine.high %v3309_v48, %v3317_v50  ;;  %v3318_v58 = vcombine.low %v3293_v46, %v3301_v47  ;;  %v3334_v59 = vcombine.low %v3309_v48, %v3317_v50 }
 0xb22   : > { %v2195_v13 = vcombine.low %v7068_v18, %v7071_v55  ;;  %v2263_v23 = vcombine.low %v7074_v19, %v7077_v52  ;;  %v3404_v37 = vsub.s32 3, %v6776_v5 }
 0xb23   : > { %v3333_v60 = vrot.slane %v3319_v56, %v7045_v34  ;;  %v3349_v26 = vrot.slane %v3335_v57, %v7045_v34  ;;  %v3326_v41 = vrot.slane %v3318_v58, %v7045_v34  ;;  %v3342_v62 = vrot.slane %v3334_v59, %v7045_v34  ;;  %v5874_v56 = vld [vmem:[#allocation2] sm:$0xff]  ;;  %v5875_v59 = vld [vmem:[#allocation2 + $0x10] sm:$0xff] }
 0xb24   : > { %v3405_v46 = vrot.slane %v7156_v44, %v3404_v37  ;;  %v5722_v37 = vld [vmem:[%s6726_s24 + $0xcc] ss:$16 sps:$4 sm:$0xff]  }
 0xb25   : > { %v3353_v1 = vcombine.high %v3333_v60, %v3349_v26  ;;  %v3351_v3 = vcombine.high %v3326_v41, %v3342_v62  ;;  %v3350_v4 = vcombine.low %v3326_v41, %v3342_v62  ;;  %v3352_v8 = vcombine.low %v3333_v60, %v3349_v26  ;;  %v5876_v26 = vld [vmem:[#allocation2 + $0x18] sm:$0xff]  ;;  %v5877_v62 = vld [vmem:[#allocation2 + $0x8] sm:$0xff] }
 0xb27   : > { %v5636_v6 = vpack.i.bf16 %v3353_v1, %v3285_v63  ;;  %v5626_v7 = vpack.i.bf16 %v3351_v3, %v3283_v2  ;;  %v5631_v0 = vpack.i.bf16 %v3352_v8, %v3284_v10  ;;  %v5681_v3 = vld [vmem:[%s6726_s24] ss:$16 sps:$4 sm:$0xff]   ;;  %v5689_v8 = vld [vmem:[%s6726_s24 + $0x24] ss:$16 sps:$4 sm:$0xff]   ;;  %v5692_v10 = vld [vmem:[%s6726_s24 + $0x2c] ss:$16 sps:$4 sm:$0xff]  }
 0xb29   : > { %5637 = vrot.lane.b32.xlu0 %v5636_v6, %s6248_s20  ;;  %5627 = vrot.lane.b32.xlu1 %v5626_v7, %s6250_s10  ;;  %v5684_v6 = vld [vmem:[%s6726_s24 + $0x8] ss:$16 sps:$4 sm:$0xff]   ;;  %v5686_v7 = vld [vmem:[%s6726_s24 + $0xc] ss:$16 sps:$4 sm:$0xff]  }
 0xb2a   : > { %3830 = vmatprep.subr.bf16.mxu1 %v5686_v7 }
 0xb2b   : > { %v5618_v11 = vpop.permute.xlu1 %5617 }
 0xb2c   : > { %v5620_v34 = vunpack.i.h.bf16 %v5618_v11  ;;  %v5619_v12 = vunpack.i.l.bf16 %v5618_v11  ;;  %v5687_v11 = vld [vmem:[%s6726_s24 + $0x20] ss:$16 sps:$4 sm:$0xff]  }
 0xb2d   : > { %5632 = vrot.lane.b32.xlu1 %v5631_v0, %s6247_s30  ;;  %v5690_v0 = vld [vmem:[%s6726_s24 + $0x28] ss:$16 sps:$4 sm:$0xff]  }
 0xb2e   : > { %v5613_v9 = vpop.permute.xlu0 %5612 }
 0xb2f   : > { %v5615_v14 = vunpack.i.h.bf16 %v5613_v9  ;;  %v5614_v15 = vunpack.i.l.bf16 %v5613_v9  ;;  %v5623_v16 = vpop.permute.xlu1 %5622 }
 0xb30   : > { %v5625_v27 = vunpack.i.h.bf16 %v5623_v16  ;;  %v5624_v43 = vunpack.i.l.bf16 %v5623_v16 }
 0xb31   : > { %v2292_v42 = vsel %vm1301_vm3, %v2263_v23, %v5615_v14  ;;  %v2291_v53 = vsel %vm1301_vm3, %v2195_v13, %v5614_v15 }
 0xb32   : > { %v2294_v17 = vsel %vm2293_vm5, %v2291_v53, %v5619_v12  ;;  %v2295_v20 = vsel %vm2293_vm5, %v2292_v42, %v5620_v34 }
 0xb33   : > { %v2297_v18 = vsel %vm2296_vm6, %v2294_v17, %v5624_v43  ;;  %v2298_v55 = vsel %vm2296_vm6, %v2295_v20, %v5625_v27 }
 0xb34   : > { %v3384_v19 = vpack.c.bf16 %v2298_v55, %v2297_v18 }
 0xb36   : > { %5419 = vmatprep.mubr.bf16.mxu1 %v3384_v19  ;;  %v5695_v19 = vld [vmem:[%s6726_s24 + $0x44] ss:$16 sps:$4 sm:$0xff]  }
 0xb9b   : > { %v5628_v52 = vpop.permute.xlu1 %5627  ;;  %v5638_v22 = vpop.permute.xlu0 %5637 }
 0xb9c   : > { %v5630_v54 = vunpack.i.h.bf16 %v5628_v52  ;;  %v5629_v21 = vunpack.i.l.bf16 %v5628_v52  ;;  %v5640_v31 = vunpack.i.h.bf16 %v5638_v22  ;;  %v5639_v32 = vunpack.i.l.bf16 %v5638_v22  ;;  %v5698_v52 = vld [vmem:[%s6726_s24 + $0x4c] ss:$16 sps:$4 sm:$0xff]   ;;  %v5701_v22 = vld [vmem:[%s6726_s24 + $0x64] ss:$16 sps:$4 sm:$0xff]  }
 0xb9e   : > { %v3378_v29 = vsel %vm1301_vm3, %v3282_v39, %v5629_v21  ;;  %v3379_v30 = vsel %vm1301_vm3, %v3350_v4, %v5630_v54  ;;  %v5683_v4 = vld [vmem:[%s6726_s24 + $0x4] ss:$16 sps:$4 sm:$0xff]   ;;  %v5693_v54 = vld [vmem:[%s6726_s24 + $0x40] ss:$16 sps:$4 sm:$0xff]   ;;  %v5696_v21 = vld [vmem:[%s6726_s24 + $0x48] ss:$16 sps:$4 sm:$0xff]  }
 0xb9f   : > { %v5633_v24 = vpop.permute.xlu1 %5632  ;;  %3777 = vmatprep.subr.bf16.mxu0 %v5683_v4  ;;  %v3553_v4 = vsub.s32 4, %v6776_v5 }
 0xba0   : > { %v5635_v25 = vunpack.i.h.bf16 %v5633_v24  ;;  %v5634_v28 = vunpack.i.l.bf16 %v5633_v24  ;;  %3778 = vmatpush1.bf16.msra.mxu0 %v5681_v3  ;;  %v5704_v24 = vld [vmem:[%s6726_s24 + $0x6c] ss:$16 sps:$4 sm:$0xff]  }
 0xba1   : > { %3779 = vmatprep.subr.bf16.mxu0 %v5689_v8  ;;  %v3554_v8 = vrot.slane %v7156_v44, %v3553_v4  ;;  %v5878_v4 = vld [vmem:[%s6708_s15 + $0x10] sm:$0xff] }
 0xba2   : > { %v3380_v33 = vsel %vm2293_vm5, %v3378_v29, %v5634_v28  ;;  %v3381_v35 = vsel %vm2293_vm5, %v3379_v30, %v5635_v25  ;;  %v5699_v25 = vld [vmem:[%s6726_s24 + $0x60] ss:$16 sps:$4 sm:$0xff]   ;;  %v5702_v28 = vld [vmem:[%s6726_s24 + $0x68] ss:$16 sps:$4 sm:$0xff]   ;;  %v5707_v29 = vld [vmem:[%s6726_s24 + $0x84] ss:$16 sps:$4 sm:$0xff]  }
 0xba3   : > { %v3382_v45 = vsel %vm2296_vm6, %v3380_v33, %v5639_v32  ;;  %v3383_v36 = vsel %vm2296_vm6, %v3381_v35, %v5640_v31  ;;  %v5710_v30 = vld [vmem:[%s6726_s24 + $0x8c] ss:$16 sps:$4 sm:$0xff]   ;;  %v5705_v31 = vld [vmem:[%s6726_s24 + $0x80] ss:$16 sps:$4 sm:$0xff]   ;;  %v5708_v32 = vld [vmem:[%s6726_s24 + $0x88] ss:$16 sps:$4 sm:$0xff]  }
 0xba4   : > { %v3385_v61 = vpack.c.bf16 %v3383_v36, %v3382_v45  ;;  %3780 = vmatpush1.bf16.msra.mxu0 %v5687_v11  ;;  %v5713_v33 = vld [vmem:[%s6726_s24 + $0xa4] ss:$16 sps:$4 sm:$0xff]   ;;  %v5716_v35 = vld [vmem:[%s6726_s24 + $0xac] ss:$16 sps:$4 sm:$0xff]   ;;  %v5711_v45 = vld [vmem:[%s6726_s24 + $0xa0] ss:$16 sps:$4 sm:$0xff]  }
 0xba5   : > { %3781 = vmatprep.subr.bf16.mxu0 %v5695_v19  ;;  %v5714_v36 = vld [vmem:[%s6726_s24 + $0xa8] ss:$16 sps:$4 sm:$0xff]  }
 0xba6   : > { %5420 = vmatmul.mubr.bf16.vlgmr.msra.gmra.mrb[32].mxu1 %v3385_v61  ;;  %v5719_v61 = vld [vmem:[%s6726_s24 + $0xc4] ss:$16 sps:$4 sm:$0xff]  }
 0xba7   : > { %3862 = vmatprep.mubr.bf16.mxu1 %v6246_v49  ;;  %3831 = vmatpush1.bf16.msra.mxu1 %v5684_v6 }
 0xba8   : > { %3832 = vmatprep.subr.bf16.mxu1 %v5692_v10  ;;  %3782 = vmatpush1.bf16.msra.mxu0 %v5693_v54  ;;  %v3561_v10 = vsub.s32 5, %v6776_v5  ;;  %v5729_v54 = vld [vmem:[%s6729_s23 + $0x40] sm:$0xff]  }
 0xba9   : > { %3783 = vmatprep.subr.bf16.mxu0 %v5701_v22  ;;  %v5732_v22 = vld [vmem:[%s6729_s23 + $0x80] sm:$0xff]  }
 0xbab   : > { %3833 = vmatpush1.bf16.msra.mxu1 %v5690_v0 }
 0xbac   : > { %3834 = vmatprep.subr.bf16.mxu1 %v5698_v52  ;;  %3784 = vmatpush1.bf16.msra.mxu0 %v5699_v25  ;;  %v5735_v25 = vld [vmem:[%s6729_s23 + $0x8] sm:$0xff]  }
 0xbad   : > { %3785 = vmatprep.subr.bf16.mxu0 %v5707_v29  ;;  %v5737_v29 = vld [vmem:[%s6729_s23 + $0x50] sm:$0xff]  }
 0xbaf   : > { %3835 = vmatpush1.bf16.msra.mxu1 %v5696_v21  ;;  %v5730_v21 = vld [vmem:[%s6729_s23 + $0xc0] sm:$0xff]  }
 0xbb0   : > { %3836 = vmatprep.subr.bf16.mxu1 %v5704_v24  ;;  %3786 = vmatpush1.bf16.msra.mxu0 %v5705_v31  ;;  %v5734_v24 = vld [vmem:[%s6729_s23 + $0xc8] sm:$0xff]   ;;  %v5739_v31 = vld [vmem:[%s6729_s23 + $0x10] sm:$0xff]  }
 0xbb1   : > { %3787 = vmatprep.subr.bf16.mxu0 %v5713_v33  ;;  %v5741_v33 = vld [vmem:[%s6729_s23 + $0x58] sm:$0xff]  }
 0xbb3   : > { %3837 = vmatpush1.bf16.msra.mxu1 %v5702_v28  ;;  %v5736_v28 = vld [vmem:[%s6729_s23 + $0x88] sm:$0xff]  }
 0xbb4   : > { %3838 = vmatprep.subr.bf16.mxu1 %v5710_v30  ;;  %3788 = vmatpush1.bf16.msra.mxu0 %v5711_v45  ;;  %v5738_v30 = vld [vmem:[%s6729_s23 + $0xd0] sm:$0xff]   ;;  %v5743_v45 = vld [vmem:[%s6729_s23 + $0x18] sm:$0xff]  }
 0xbb5   : > { %3789 = vmatprep.subr.bf16.mxu0 %v5719_v61  ;;  %v5745_v61 = vld [vmem:[%s6729_s23 + $0x60] sm:$0xff]  }
 0xbb7   : > { %3839 = vmatpush1.bf16.msra.mxu1 %v5708_v32  ;;  %v5740_v32 = vld [vmem:[%s6729_s23 + $0x90] sm:$0xff]  }
 0xbb8   : > { %3840 = vmatprep.subr.bf16.mxu1 %v5716_v35  ;;  %v5742_v35 = vld [vmem:[%s6729_s23 + $0xd8] sm:$0xff]  }
 0xbbb   : > { %3841 = vmatpush1.bf16.msra.mxu1 %v5714_v36  ;;  %v5744_v36 = vld [vmem:[%s6729_s23 + $0x98] sm:$0xff]  }
 0xbbc   : > { %3842 = vmatprep.subr.bf16.mxu1 %v5722_v37  ;;  %v5746_v37 = vld [vmem:[%s6729_s23 + $0xe0] sm:$0xff]  }
 0xc79   : > { %v5421_v47 = vpop.f32.mrb[32].mxu1 }
 0xc7a   : > { %v3497_v48 = vadd.f32 %v5421_v47, %v3405_v46  ;;  %v3488_v50 = vpop.f32.mrb[33].mxu1  ;;  %v5720_v47 = vld [vmem:[%s6726_s24 + $0xc8] ss:$16 sps:$4 sm:$0xff]  }
 0xc7b   : > { %v3489_v51 = vadd.f32 %v3488_v50, %v3405_v46  ;;  %v5422_v38 = vpop.f32.mrb[34].mxu1  ;;  %3843 = vmatpush1.bf16.msra.mxu1 %v5720_v47  ;;  %v5723_v50 = vld [vmem:[%s6726_s24 + $0xe0] ss:$16 sps:$4 sm:$0xff]  }
 0xc7c   : > { %v3500_v39 = vadd.f32 %v5422_v38, %v3405_v46  ;;  %v3491_v40 = vpop.f32.mrb[35].mxu1  ;;  %v7161_v60 = vadd.f32 %v5875_v59, %v3497_v48  ;;  %v5725_v48 = vld [vmem:[%s6726_s24 + $0xe4] ss:$16 sps:$4 sm:$0xff]   ;;  %v5728_v38 = vld [vmem:[%s6726_s24 + $0xec] ss:$16 sps:$4 sm:$0xff]  }
 0xc7d   : > { %v7159_v57 = vadd.f32 %v5874_v56, %v3489_v51  ;;  %v3492_v58 = vadd.f32 %v3491_v40, %v3405_v46  ;;  %v5717_v46 = vld [vmem:[%s6726_s24 + $0xc0] ss:$16 sps:$4 sm:$0xff]   ;;  %v5726_v51 = vld [vmem:[%s6726_s24 + $0xe8] ss:$16 sps:$4 sm:$0xff]   ;;  %3844 = vmatprep.subr.bf16.mxu1 %v5728_v38 }
 0xc7e   : > { %v7163_v41 = vadd.f32 %v5876_v26, %v3500_v39  ;;  %3790 = vmatpush1.bf16.msra.mxu0 %v5717_v46  ;;  %v5747_v46 = vld [vmem:[%s6729_s23 + $0x20] sm:$0xff]   ;;  %v5752_v38 = vld [vmem:[%s6729_s23 + $0xa8] sm:$0xff]  }
 0xc7f   : > { %v7165_v63 = vadd.f32 %v5877_v62, %v3492_v58  ;;  %3507 = vadd.xlane.f32.xlu1 %v7159_v57  ;;  %3791 = vmatprep.subr.bf16.mxu0 %v5725_v48  ;;  %v5748_v47 = vld [vmem:[%s6729_s23 + $0xa0] sm:$0xff]   ;;  %v5749_v48 = vld [vmem:[%s6729_s23 + $0x68] sm:$0xff]  }
 0xc80   : > { %v5104_v1 = vpack.c.bf16 %v7163_v41, %v7161_v60  ;;  %3845 = vmatpush1.bf16.msra.mxu1 %v5726_v51  ;;  %v5751_v51 = vld [vmem:[%s6729_s23 + $0x28] sm:$0xff]  }
 0xc81   : > { %v5094_v2 = vpack.c.bf16 %v7165_v63, %v7159_v57  ;;  %3509 = vadd.xlane.f32.xlu0 %v7165_v63  ;;  %5219 = vmatprep.subr.bf16.mxu1 %v5730_v21 }
 0xc82   : > { %5111 = vst [vmem:[%s6736_s21 + $0x8] sm:$0xff] %v5104_v1   ;;  %3792 = vmatpush1.bf16.msra.mxu0 %v5723_v50  ;;  %v5750_v50 = vld [vmem:[%s6729_s23 + $0xe8] sm:$0xff]  }
 0xc83   : > { %5095 = vst [vmem:[%s6736_s21] sm:$0xff] %v5094_v2   ;;  %5191 = vmatprep.subr.bf16.mxu0 %v5729_v54 }
 0xc85   : > { %3511 = vadd.xlane.f32.xlu0 %v7161_v60 }
 0xc89   : > { %3513 = vadd.xlane.f32.xlu0 %v7163_v41 }
 0xd0c   : > { %v3508_v34 = vpop.xlane.xlu1 %3507 }
 0xd0d   : > { %v3515_v12 = vmul.f32 0.0078125, %v3508_v34 }
 0xd0e   : > { %v3510_v13 = vpop.xlane.xlu0 %3509 }
 0xd0f   : > { %v7186_v9 = vsub.f32 %v7159_v57, %v3515_v12  ;;  %v3516_v23 = vmul.f32 0.0078125, %v3510_v13 }
 0xd11   : > { %v7189_v14 = vsub.f32 %v7165_v63, %v3516_v23  ;;  %v3523_v15 = vmul.f32 %v7186_v9, %v7186_v9  ;;  %v3562_v23 = vrot.slane %v7156_v44, %v3561_v10 }
 0xd12   : > { %v3512_v16 = vpop.xlane.xlu0 %3511 }
 0xd13   : > { %v3517_v27 = vmul.f32 0.0078125, %v3512_v16  ;;  %3527 = vadd.xlane.f32.xlu1 %v3523_v15  ;;  %v3524_v43 = vmul.f32 %v7189_v14, %v7189_v14 }
 0xd15   : > { %v7196_v42 = vsub.f32 %v7161_v60, %v3517_v27  ;;  %3529 = vadd.xlane.f32.xlu0 %v3524_v43 }
 0xd16   : > { %v3514_v53 = vpop.xlane.xlu0 %3513 }
 0xd17   : > { %v3518_v17 = vmul.f32 0.0078125, %v3514_v53  ;;  %v3525_v20 = vmul.f32 %v7196_v42, %v7196_v42 }
 0xd19   : > { %v7201_v18 = vsub.f32 %v7163_v41, %v3518_v17  ;;  %3531 = vadd.xlane.f32.xlu1 %v3525_v20 }
 0xd1b   : > { %v3526_v55 = vmul.f32 %v7201_v18, %v7201_v18 }
 0xd1d   : > { %3533 = vadd.xlane.f32.xlu0 %v3526_v55 }
 0xda0   : > { %v3528_v39 = vpop.xlane.xlu1 %3527 }
 0xda1   : > { %v3535_v40 = vmul.f32 0.0078125, %v3528_v39  ;;  %v5753_v39 = vld [vmem:[%s6729_s23 + $0x70] sm:$0xff]  }
 0xda2   : > { %v3530_v56 = vpop.xlane.xlu0 %3529 }
 0xda3   : > { %v3539_v58 = vadd.f32 1e-05, %v3535_v40  ;;  %v3536_v59 = vmul.f32 0.0078125, %v3530_v56  ;;  %v5754_v40 = vld [vmem:[%s6729_s23 + $0xf0] sm:$0xff]  }
 0xda4   : > { %v5755_v56 = vld [vmem:[%s6729_s23 + $0x30] sm:$0xff]  }
 0xda5   : > { %5833 = vrsqrt.f32 %v3539_v58  ;;  %v3540_v26 = vadd.f32 1e-05, %v3536_v59  ;;  %v5756_v58 = vld [vmem:[%s6729_s23 + $0xb0] sm:$0xff]   ;;  %v5757_v59 = vld [vmem:[%s6729_s23 + $0x78] sm:$0xff]  }
 0xda6   : > { %v3532_v62 = vpop.xlane.xlu1 %3531 }
 0xda7   : > { %5835 = vrsqrt.f32 %v3540_v26  ;;  %v3537_v1 = vmul.f32 0.0078125, %v3532_v62  ;;  %v5758_v26 = vld [vmem:[%s6729_s23 + $0xf8] sm:$0xff]  }
 0xda8   : > { %v5759_v62 = vld [vmem:[%s6729_s23 + $0x38] sm:$0xff]  }
 0xda9   : > { %v3541_v2 = vadd.f32 1e-05, %v3537_v1  ;;  %v5760_v1 = vld [vmem:[%s6729_s23 + $0xb8] sm:$0xff]  }
 0xdaa   : > { %v3534_v3 = vpop.xlane.xlu0 %3533 }
 0xdab   : > { %5837 = vrsqrt.f32 %v3541_v2  ;;  %v3538_v6 = vmul.f32 0.0078125, %v3534_v3  ;;  %v3603_v2 = vsub.s32 6, %v6776_v5 }
 0xdad   : > { %v3542_v7 = vadd.f32 1e-05, %v3538_v6  ;;  %v7273_v3 = vrot.slane %v7156_v44, %v3603_v2  ;;  %v7276_v6 = vrot.slane %v5878_v4, %v3603_v2 }
 0xdaf   : > { %v5834_v11 = vpop.eup %5833  ;;  %5839 = vrsqrt.f32 %v3542_v7  ;;  %v862_v7 = vld [vmem:[%s6708_s15 + $0x18] sm:$0xff] }
 0xdb0   : > { %v3547_v0 = vmul.f32 %v5834_v11, %v7186_v9  ;;  %v5879_v11 = vld [vmem:[%s6708_s15 + $0x8] sm:$0xff] }
 0xdb1   : > { %v5836_v34 = vpop.eup %5835 }
 0xdb2   : > { %v3548_v12 = vmul.f32 %v5836_v34, %v7189_v14  ;;  %v3555_v13 = vmul.f32 %v3554_v8, %v3547_v0  ;;  %v7280_v0 = vrot.slane %v5879_v11, %v3603_v2 }
 0xdb4   : > { %v3556_v15 = vmul.f32 %v3554_v8, %v3548_v12  ;;  %v3563_v27 = vadd.f32 %v3562_v23, %v3555_v13 }
 0xdb5   : > { %v5838_v16 = vpop.eup %5837 }
 0xdb6   : > { %v3564_v43 = vadd.f32 %v3562_v23, %v3556_v15  ;;  %v3549_v53 = vmul.f32 %v5838_v16, %v7196_v42  ;;  %v7284_v15 = vrot.slane %v862_v7, %v3603_v2 }
 0xdb8   : > { %v3567_v17 = vpack.c.bf16 %v3564_v43, %v3563_v27  ;;  %v3557_v14 = vmul.f32 %v3554_v8, %v3549_v53 }
 0xdb9   : > { %v5840_v20 = vpop.eup %5839 }
 0xdba   : > { %3810 = vmatmul.mubr.bf16.vlgmr.msra.gmra.mrb[44].mxu0 %v3567_v17  ;;  %3863 = vmatmul.mubr.bf16.vlgmr.msra.gmra.mrb[36].mxu1 %v3567_v17  ;;  %v3550_v9 = vmul.f32 %v5840_v20, %v7201_v18  ;;  %v3565_v19 = vadd.f32 %v3562_v23, %v3557_v14  ;;  %v5731_v18 = vld [vmem:[%s6729_s23] sm:$0xff]  }
 0xdbb   : > { %3819 = vmatprep.mubr.bf16.mxu0 %v6246_v49  ;;  %3872 = vmatprep.mubr.bf16.mxu1 %v6246_v49  ;;  %v5733_v49 = vld [vmem:[%s6729_s23 + $0x48] sm:$0xff]  }
 0xdbc   : > { %v3558_v55 = vmul.f32 %v3554_v8, %v3550_v9  ;;  %5192 = vmatpush3.bf16.msra.mxu0 %v5731_v18  ;;  %5220 = vmatpush3.bf16.msra.mxu1 %v5732_v22 }
 0xdbd   : > { %5193 = vmatprep.subr.bf16.mxu0 %v5733_v49  ;;  %5221 = vmatprep.subr.bf16.mxu1 %v5734_v24 }
 0xdbe   : > { %v3566_v42 = vadd.f32 %v3562_v23, %v3558_v55 }
 0xdc0   : > { %v3568_v52 = vpack.c.bf16 %v3566_v42, %v3565_v19  ;;  %5194 = vmatpush3.bf16.msra.mxu0 %v5735_v25  ;;  %5222 = vmatpush3.bf16.msra.mxu1 %v5736_v28 }
 0xdc1   : > { %5195 = vmatprep.subr.bf16.mxu0 %v5737_v29  ;;  %5223 = vmatprep.subr.bf16.mxu1 %v5738_v30 }
 0xdc2   : > { %3820 = vmatmul.mubr.bf16.gmra.mrb[48].mxu0 %v3568_v52  ;;  %3873 = vmatmul.mubr.bf16.gmra.mrb[40].mxu1 %v3568_v52 }
 0xdc4   : > { %5196 = vmatpush3.bf16.msra.mxu0 %v5739_v31  ;;  %5224 = vmatpush3.bf16.msra.mxu1 %v5740_v32 }
 0xdc5   : > { %5197 = vmatprep.subr.bf16.mxu0 %v5741_v33  ;;  %5225 = vmatprep.subr.bf16.mxu1 %v5742_v35 }
 0xdc8   : > { %5198 = vmatpush3.bf16.msra.mxu0 %v5743_v45  ;;  %5226 = vmatpush3.bf16.msra.mxu1 %v5744_v36 }
 0xdc9   : > { %5199 = vmatprep.subr.bf16.mxu0 %v5745_v61  ;;  %5227 = vmatprep.subr.bf16.mxu1 %v5746_v37 }
 0xdcc   : > { %5200 = vmatpush3.bf16.msra.mxu0 %v5747_v46  ;;  %5228 = vmatpush3.bf16.msra.mxu1 %v5748_v47 }
 0xdcd   : > { %5201 = vmatprep.subr.bf16.mxu0 %v5749_v48  ;;  %5229 = vmatprep.subr.bf16.mxu1 %v5750_v50 }
 0xdd0   : > { %5202 = vmatpush3.bf16.msra.mxu0 %v5751_v51  ;;  %5230 = vmatpush3.bf16.msra.mxu1 %v5752_v38 }
 0xdd1   : > { %5203 = vmatprep.subr.bf16.mxu0 %v5753_v39  ;;  %5231 = vmatprep.subr.bf16.mxu1 %v5754_v40 }
 0xdd4   : > { %5204 = vmatpush3.bf16.msra.mxu0 %v5755_v56  ;;  %5232 = vmatpush3.bf16.msra.mxu1 %v5756_v58 }
 0xdd5   : > { %5205 = vmatprep.subr.bf16.mxu0 %v5757_v59  ;;  %5233 = vmatprep.subr.bf16.mxu1 %v5758_v26 }
 0xdd8   : > { %5206 = vmatpush3.bf16.msra.mxu0 %v5759_v62  ;;  %5234 = vmatpush3.bf16.msra.mxu1 %v5760_v1 }
 0xe8d   : > { %v3811_v8 = vpop.f32.mrb[44].mxu0  ;;  %v3864_v10 = vpop.f32.mrb[36].mxu1 }
 0xe8e   : > { %v3812_v34 = vadd.f32 %v3811_v8, %v7273_v3  ;;  %v3865_v12 = vadd.f32 %v3864_v10, %v7276_v6  ;;  %v3813_v13 = vpop.f32.mrb[45].mxu0  ;;  %v3866_v23 = vpop.f32.mrb[37].mxu1 }
 0xe8f   : > { %v3815_v16 = vpop.f32.mrb[46].mxu0  ;;  %v3868_v27 = vpop.f32.mrb[38].mxu1  ;;  %v7287_v17 = vadd.f32 %v3813_v13, %v7280_v0  ;;  %v7297_v54 = vadd.f32 %v3866_v23, %v7284_v15 }
 0xe90   : > { %v3899_v43 = vmul.f32 0.044715, %v3812_v34  ;;  %v3901_v53 = vmul.f32 0.044715, %v3865_v12  ;;  %v3816_v20 = vadd.f32 %v3815_v16, %v7273_v3  ;;  %v7291_v9 = vadd.f32 %v3868_v27, %v7276_v6  ;;  %v3817_v14 = vpop.f32.mrb[47].mxu0  ;;  %v3870_v55 = vpop.f32.mrb[39].mxu1 }
 0xe91   : > { %v7294_v52 = vadd.f32 %v3817_v14, %v7280_v0  ;;  %v7300_v18 = vadd.f32 %v3870_v55, %v7284_v15  ;;  %v7302_v22 = vmul.f32 0.5, %v3812_v34  ;;  %v3900_v28 = vmul.f32 0.044715, %v7287_v17 }
 0xe92   : > { %v3915_v19 = vmul.f32 %v3899_v43, %v3812_v34  ;;  %v3917_v42 = vmul.f32 %v3901_v53, %v3865_v12  ;;  %v3903_v21 = vmul.f32 0.044715, %v3816_v20  ;;  %v3905_v25 = vmul.f32 0.044715, %v7291_v9 }
 0xe93   : > { %v3904_v30 = vmul.f32 0.044715, %v7294_v52  ;;  %v7307_v35 = vmul.f32 0.5, %v3865_v12  ;;  %v3902_v46 = vmul.f32 0.044715, %v7297_v54  ;;  %v3916_v26 = vmul.f32 %v3900_v28, %v7287_v17 }
 0xe94   : > { %v3931_v49 = vmul.f32 %v3915_v19, %v3812_v34  ;;  %v3933_v24 = vmul.f32 %v3917_v42, %v3865_v12  ;;  %v3919_v29 = vmul.f32 %v3903_v21, %v3816_v20  ;;  %v3921_v36 = vmul.f32 %v3905_v25, %v7291_v9 }
 0xe95   : > { %v3821_v31 = vpop.f32.mrb[48].mxu0  ;;  %v3874_v32 = vpop.f32.mrb[40].mxu1  ;;  %v3906_v48 = vmul.f32 0.044715, %v7300_v18  ;;  %v3920_v1 = vmul.f32 %v3904_v30, %v7294_v52  ;;  %v3918_v10 = vmul.f32 %v3902_v46, %v7297_v54  ;;  %v3932_v27 = vmul.f32 %v3916_v26, %v7287_v17 }
 0xe96   : > { %v3947_v33 = vadd.f32 %v3931_v49, %v3812_v34  ;;  %v3949_v45 = vadd.f32 %v3933_v24, %v3865_v12  ;;  %v3823_v61 = vpop.f32.mrb[49].mxu0  ;;  %v3876_v37 = vpop.f32.mrb[41].mxu1  ;;  %v3935_v47 = vmul.f32 %v3919_v29, %v3816_v20  ;;  %v7313_v50 = vadd.f32 %v3821_v31, %v7273_v3 }
 0xe97   : > { %v3825_v51 = vpop.f32.mrb[50].mxu0  ;;  %v3878_v38 = vpop.f32.mrb[42].mxu1  ;;  %v3937_v56 = vmul.f32 %v3921_v36, %v7291_v9  ;;  %v7319_v2 = vadd.f32 %v3874_v32, %v7276_v6  ;;  %v7324_v8 = vadd.f32 %v3823_v61, %v7280_v0  ;;  %v3922_v34 = vmul.f32 %v3906_v48, %v7300_v18 }
 0xe98   : > { %v3963_v39 = vmul.f32 0.7978846, %v3947_v33  ;;  %v3965_v40 = vmul.f32 0.7978846, %v3949_v45  ;;  %v3827_v58 = vpop.f32.mrb[51].mxu0  ;;  %v3880_v59 = vpop.f32.mrb[43].mxu1  ;;  %v3951_v62 = vadd.f32 %v3935_v47, %v3816_v20  ;;  %v7330_v23 = vadd.f32 %v3876_v37, %v7284_v15 }
 0xe99   : > { %v3953_v4 = vadd.f32 %v3937_v56, %v7291_v9  ;;  %v3907_v7 = vmul.f32 0.044715, %v7313_v50  ;;  %v3908_v13 = vmul.f32 0.044715, %v7324_v8  ;;  %v7333_v16 = vadd.f32 %v3825_v51, %v7273_v3 }
 0xe9a   : > { %5841 = vtanh.f32 %v3963_v39  ;;  %v3967_v11 = vmul.f32 0.7978846, %v3951_v62  ;;  %v3936_v43 = vmul.f32 %v3920_v1, %v7294_v52  ;;  %v7338_v53 = vadd.f32 %v3878_v38, %v7276_v6 }
 0xe9b   : > { %5843 = vtanh.f32 %v3965_v40  ;;  %v3969_v12 = vmul.f32 0.7978846, %v3953_v4  ;;  %v3923_v14 = vmul.f32 %v3907_v7, %v7313_v50  ;;  %v3909_v55 = vmul.f32 0.044715, %v7319_v2 }
 0xe9c   : > { %5845 = vtanh.f32 %v3967_v11  ;;  %v3910_v19 = vmul.f32 0.044715, %v7330_v23  ;;  %v3887_v42 = vmul.f32 0.5, %v3816_v20  ;;  %v3924_v21 = vmul.f32 %v3908_v13, %v7324_v8 }
 0xe9d   : > { %5847 = vtanh.f32 %v3969_v12  ;;  %v7345_v3 = vadd.f32 %v3827_v58, %v7280_v0  ;;  %v7348_v49 = vadd.f32 %v3880_v59, %v7284_v15  ;;  %v3934_v24 = vmul.f32 %v3918_v10, %v7297_v54 }
 0xe9e   : > { %v3938_v6 = vmul.f32 %v3922_v34, %v7300_v18  ;;  %v3911_v25 = vmul.f32 0.044715, %v7333_v16  ;;  %v3913_v28 = vmul.f32 0.044715, %v7338_v53  ;;  %v3926_v29 = vmul.f32 %v3910_v19, %v7330_v23 }
 0xe9f   : > { %v3912_v20 = vmul.f32 0.044715, %v7345_v3  ;;  %v3914_v30 = vmul.f32 0.044715, %v7348_v49  ;;  %v3948_v0 = vadd.f32 %v3932_v27, %v7287_v17  ;;  %v3889_v31 = vmul.f32 0.5, %v7291_v9 }
 0xea0   : > { %v3939_v15 = vmul.f32 %v3923_v14, %v7313_v50  ;;  %v3925_v32 = vmul.f32 %v3909_v55, %v7319_v2  ;;  %v3952_v33 = vadd.f32 %v3936_v43, %v7294_v52  ;;  %v3940_v45 = vmul.f32 %v3924_v21, %v7324_v8 }
 0xea1   : > { %v3928_v36 = vmul.f32 %v3912_v20, %v7345_v3  ;;  %v3930_v61 = vmul.f32 %v3914_v30, %v7348_v49  ;;  %v3964_v37 = vmul.f32 0.7978846, %v3948_v0  ;;  %v3927_v47 = vmul.f32 %v3911_v25, %v7333_v16 }
 0xea2   : > { %v3968_v48 = vmul.f32 0.7978846, %v3952_v33  ;;  %v3950_v51 = vadd.f32 %v3934_v24, %v7297_v54  ;;  %v3954_v9 = vadd.f32 %v3938_v6, %v7300_v18  ;;  %v3942_v39 = vmul.f32 %v3926_v29, %v7330_v23 }
 0xea3   : > { %v3929_v40 = vmul.f32 %v3913_v28, %v7338_v53  ;;  %v3944_v56 = vmul.f32 %v3928_v36, %v7345_v3  ;;  %5849 = vtanh.f32 %v3964_v37  ;;  %v3941_v1 = vmul.f32 %v3925_v32, %v7319_v2 }
 0xea4   : > { %v5842_v46 = vpop.eup %5841  ;;  %5851 = vtanh.f32 %v3968_v48  ;;  %v3966_v58 = vmul.f32 0.7978846, %v3950_v51  ;;  %v3970_v59 = vmul.f32 0.7978846, %v3954_v9  ;;  %v3946_v4 = vmul.f32 %v3930_v61, %v7348_v49 }
 0xea5   : > { %v5844_v38 = vpop.eup %5843  ;;  %v3995_v26 = vadd.f32 1.0, %v5842_v46  ;;  %v3956_v10 = vadd.f32 %v3940_v45, %v7324_v8  ;;  %v3943_v34 = vmul.f32 %v3927_v47, %v7333_v16  ;;  %v3960_v13 = vadd.f32 %v3944_v56, %v7345_v3 }
 0xea6   : > { %v5846_v62 = vpop.eup %5845  ;;  %v3997_v7 = vadd.f32 1.0, %v5844_v38  ;;  %5853 = vtanh.f32 %v3966_v58  ;;  %v3945_v27 = vmul.f32 %v3929_v40, %v7338_v53  ;;  %v3958_v24 = vadd.f32 %v3942_v39, %v7330_v23 }
 0xea7   : > { %v5848_v11 = vpop.eup %5847  ;;  %v3999_v12 = vadd.f32 1.0, %v5846_v62  ;;  %5855 = vtanh.f32 %v3970_v59  ;;  %v3972_v14 = vmul.f32 0.7978846, %v3956_v10  ;;  %v4011_v55 = vmul.f32 %v3995_v26, %v7302_v22 }
 0xea8   : > { %v4001_v43 = vadd.f32 1.0, %v5848_v11  ;;  %v3976_v21 = vmul.f32 0.7978846, %v3960_v13  ;;  %v4013_v6 = vmul.f32 %v3997_v7, %v7307_v35  ;;  %v3962_v28 = vadd.f32 %v3946_v4, %v7348_v49 }
 0xea9   : > { %v4015_v19 = vmul.f32 %v3999_v12, %v3887_v42  ;;  %5857 = vtanh.f32 %v3972_v14  ;;  %v3974_v20 = vmul.f32 0.7978846, %v3958_v24  ;;  %v3955_v32 = vadd.f32 %v3939_v15, %v7313_v50 }
 0xeaa   : > { %v4017_v25 = vmul.f32 %v4001_v43, %v3889_v31  ;;  %5859 = vtanh.f32 %v3976_v21  ;;  %v3978_v0 = vmul.f32 0.7978846, %v3962_v28  ;;  %v3959_v33 = vadd.f32 %v3943_v34, %v7333_v16 }
 0xeab   : > { %v4027_v29 = vpack.c.bf16 %v4015_v19, %v4011_v55  ;;  %5861 = vtanh.f32 %v3974_v20  ;;  %v3957_v22 = vadd.f32 %v3941_v1, %v7319_v2  ;;  %v3971_v45 = vmul.f32 0.7978846, %v3955_v32 }
 0xeac   : > { %v4029_v30 = vpack.c.bf16 %v4017_v25, %v4013_v6  ;;  %5863 = vtanh.f32 %v3978_v0  ;;  %v3975_v35 = vmul.f32 0.7978846, %v3959_v33  ;;  %v3961_v31 = vadd.f32 %v3945_v27, %v7338_v53 }
 0xead   : > { %v5850_v42 = vpop.eup %5849  ;;  %v3884_v61 = vmul.f32 0.5, %v7287_v17  ;;  %v3973_v46 = vmul.f32 0.7978846, %v3957_v22  ;;  %v3888_v47 = vmul.f32 0.5, %v7294_v52  ;;  %5865 = vtanh.f32 %v3971_v45 }
 0xeae   : > { %v5852_v36 = vpop.eup %5851  ;;  %v3996_v37 = vadd.f32 1.0, %v5850_v42  ;;  %v3977_v15 = vmul.f32 0.7978846, %v3961_v31  ;;  %5867 = vtanh.f32 %v3975_v35  ;;  %v3886_v56 = vmul.f32 0.5, %v7297_v54 }
 0xeaf   : > { %v4000_v48 = vadd.f32 1.0, %v5852_v36  ;;  %5869 = vtanh.f32 %v3973_v46  ;;  %v3890_v58 = vmul.f32 0.5, %v7300_v18  ;;  %v3892_v7 = vmul.f32 0.5, %v7324_v8 }
 0xeb0   : > { %v5854_v51 = vpop.eup %5853  ;;  %v4012_v38 = vmul.f32 %v3996_v37, %v3884_v61  ;;  %5871 = vtanh.f32 %v3977_v15  ;;  %v3896_v10 = vmul.f32 0.5, %v7345_v3  ;;  %v3894_v43 = vmul.f32 0.5, %v7330_v23 }
 0xeb1   : > { %v5856_v9 = vpop.eup %5855  ;;  %v4016_v39 = vmul.f32 %v4000_v48, %v3888_v47  ;;  %v3998_v40 = vadd.f32 1.0, %v5854_v51  ;;  %v3898_v14 = vmul.f32 0.5, %v7348_v49  ;;  %v3891_v28 = vmul.f32 0.5, %v7313_v50 }
 0xeb2   : > { %v4002_v59 = vadd.f32 1.0, %v5856_v9  ;;  %v3893_v23 = vmul.f32 0.5, %v7319_v2  ;;  %v4101_v50 = vsub.s32 7, %v6776_v5 }
 0xeb3   : > { %v5858_v17 = vpop.eup %5857  ;;  %v4028_v26 = vpack.c.bf16 %v4016_v39, %v4012_v38  ;;  %v4014_v52 = vmul.f32 %v3998_v40, %v3886_v56 }
 0xeb4   : > { %v5860_v62 = vpop.eup %5859  ;;  %v4018_v1 = vmul.f32 %v4002_v59, %v3890_v58  ;;  %v4004_v4 = vadd.f32 1.0, %v5858_v17  ;;  %v4102_v61 = vrot.slane %v7156_v44, %v4101_v50 }
 0xeb5   : > { %4327 = vmatprep.mubr.bf16.mxu0 %v4028_v26  ;;  %v4008_v11 = vadd.f32 1.0, %v5860_v62  ;;  %v5862_v34 = vpop.eup %5861 }
 0xeb6   : > { %v4030_v12 = vpack.c.bf16 %v4018_v1, %v4014_v52  ;;  %4328 = vmatmul.mubr.bf16.vlgmr.msra.gmra.mrb[52].mxu0 %v4027_v29  ;;  %v5864_v54 = vpop.eup %5863  ;;  %v4020_v13 = vmul.f32 %v4004_v4, %v3892_v7  ;;  %v4006_v27 = vadd.f32 1.0, %v5862_v34  ;;  %v3895_v29 = vmul.f32 0.5, %v7333_v16 }
 0xeb7   : > { %v4024_v18 = vmul.f32 %v4008_v11, %v3896_v10  ;;  %v4010_v55 = vadd.f32 1.0, %v5864_v54  ;;  %v5866_v19 = vpop.eup %5865 }
 0xeb8   : > { %4376 = vmatprep.mubr.bf16.mxu1 %v4030_v12  ;;  %v5868_v8 = vpop.eup %5867  ;;  %v4022_v24 = vmul.f32 %v4006_v27, %v3894_v43  ;;  %v4003_v6 = vadd.f32 1.0, %v5866_v19 }
 0xeb9   : > { %4377 = vmatmul.mubr.bf16.vlgmr.msra.gmra.mrb[44].mxu1 %v4029_v30  ;;  %v4032_v21 = vpack.c.bf16 %v4024_v18, %v4020_v13  ;;  %v4026_v3 = vmul.f32 %v4010_v55, %v3898_v14  ;;  %v5870_v25 = vpop.eup %5869  ;;  %v4007_v20 = vadd.f32 1.0, %v5868_v8  ;;  %v3897_v30 = vmul.f32 0.5, %v7338_v53 }
 0xeba   : > { %v5872_v0 = vpop.eup %5871  ;;  %v4005_v49 = vadd.f32 1.0, %v5870_v25  ;;  %v4019_v33 = vmul.f32 %v4003_v6, %v3891_v28 }
 0xebb   : > { %4335 = vmatprep.mubr.bf16.mxu0 %v4032_v21  ;;  %v4034_v32 = vpack.c.bf16 %v4026_v3, %v4022_v24  ;;  %v4023_v22 = vmul.f32 %v4007_v20, %v3895_v29  ;;  %v4009_v42 = vadd.f32 1.0, %v5872_v0 }
 0xebc   : > { %v4021_v35 = vmul.f32 %v4005_v49, %v3893_v23 }
 0xebd   : > { %4384 = vmatprep.mubr.bf16.mxu1 %v4034_v32  ;;  %v4031_v45 = vpack.c.bf16 %v4023_v22, %v4019_v33  ;;  %v4025_v31 = vmul.f32 %v4009_v42, %v3897_v30 }
 0xebf   : > { %4336 = vmatmul.mubr.bf16.gmra.mrb[56].mxu0 %v4031_v45  ;;  %v4033_v36 = vpack.c.bf16 %v4025_v31, %v4021_v35 }
 0xec1   : > { %4385 = vmatmul.mubr.bf16.gmra.mrb[48].mxu1 %v4033_v36 }
 0xf89   : > { %v5207_v16 = vpop.f32.mrb[52].mxu0 }
 0xf8a   : > { %v5208_v37 = vpop.f32.mrb[53].mxu0 }
 0xf8b   : > { %v5209_v2 = vadd.f32 %v5208_v37, %v5207_v16  ;;  %v5210_v46 = vpop.f32.mrb[54].mxu0 }
 0xf8c   : > { %v5235_v47 = vpop.f32.mrb[44].mxu1  ;;  %v5211_v48 = vpop.f32.mrb[55].mxu0 }
 0xf8d   : > { %v4330_v15 = vadd.f32 %v5209_v2, %v4102_v61  ;;  %v5236_v53 = vpop.f32.mrb[45].mxu1  ;;  %v5212_v51 = vadd.f32 %v5211_v48, %v5210_v46  ;;  %v5065_v46 = vld [vmem:[%s7592_s28] ss:$0 sm:$0xff] (!%p5064_p5) }
 0xf8e   : > { %v5237_v9 = vadd.f32 %v5236_v53, %v5235_v47  ;;  %v5238_v38 = vpop.f32.mrb[46].mxu1  ;;  %v5066_v48 = vld [vmem:[%s7593_s4] ss:$0 sm:$0xff] (!%p5064_p5) }
 0xf8f   : > { %v4333_v39 = vadd.f32 %v5212_v51, %v4102_v61  ;;  %v5239_v40 = vpop.f32.mrb[47].mxu1 }
 0xf90   : > { %v4379_v56 = vadd.f32 %v5237_v9, %v4330_v15  ;;  %v5240_v58 = vadd.f32 %v5239_v40, %v5238_v38 }
 0xf92   : > { %v4393_v5 = vadd.f32 %v4379_v56, %v7159_v57  ;;  %v4382_v59 = vadd.f32 %v5240_v58, %v4333_v39  ;;  %v5213_v17 = vpop.f32.mrb[56].mxu0 }
 0xf93   : > { %v5214_v26 = vpop.f32.mrb[57].mxu0 }
 0xf94   : > { %4397 = vst [vmem:[#allocation2] sm:$0xff] %v4393_v5  ;;  %v4394_v44 = vadd.f32 %v4382_v59, %v7165_v63  ;;  %v5241_v52 = vpop.f32.mrb[48].mxu1  ;;  %v5215_v1 = vadd.f32 %v5214_v26, %v5213_v17  ;;  %v5216_v4 = vpop.f32.mrb[58].mxu0  ;;  %4449 = vadd.xlane.f32.xlu0 (!%p5064_p5), %v4393_v5 }
 0xf95   : > { %v5242_v7 = vpop.f32.mrb[49].mxu1  ;;  %v5217_v10 = vpop.f32.mrb[59].mxu0 }
 0xf96   : > { %4398 = vst [vmem:[#allocation2 + $0x8] sm:$0xff] %v4394_v44  ;;  %v5099_v62 = vpack.c.bf16 %v4394_v44, %v4393_v5  ;;  %v4338_v11 = vadd.f32 %v5215_v1, %v4102_v61  ;;  %v5243_v34 = vadd.f32 %v5242_v7, %v5241_v52  ;;  %v5244_v12 = vpop.f32.mrb[50].mxu1  ;;  %v5218_v54 = vadd.f32 %v5217_v10, %v5216_v4 }
 0xf97   : > { %v5245_v57 = vpop.f32.mrb[51].mxu1 }
 0xf98   : > { %5100 = vst [vmem:[%s6738_s6] sm:$0xff] %v5099_v62   ;;  %v4387_v13 = vadd.f32 %v5243_v34, %v4338_v11  ;;  %v4341_v18 = vadd.f32 %v5218_v54, %v4102_v61  ;;  %v5246_v27 = vadd.f32 %v5245_v57, %v5244_v12  ;;  %4451 = vadd.xlane.f32.xlu0 (!%p5064_p5), %v4394_v44 }
 0xf9a   : > { %v4395_v63 = vadd.f32 %v4387_v13, %v7161_v60  ;;  %v4390_v43 = vadd.f32 %v5246_v27, %v4341_v18  ;;  %4446 = sbr.rel (%p5064_p5) target bundleno = 4312 (0x10d8), region = 104 }
 0xf9c   : > { %4399 = vst [vmem:[#allocation2 + $0x10] sm:$0xff] %v4395_v63  ;;  %v4396_v14 = vadd.f32 %v4390_v43, %v7163_v41  ;;  %4453 = vadd.xlane.f32.xlu1 (!%p5064_p5), %v4395_v63 }
 0xf9e   : > { %4400 = vst [vmem:[#allocation2 + $0x18] sm:$0xff] %v4396_v14  ;;  %v5109_v55 = vpack.c.bf16 %v4396_v14, %v4395_v63 }
 0xfa0   : > { %5112 = vst [vmem:[%s6738_s6 + $0x8] sm:$0xff] %v5109_v55   ;;  %4455 = vadd.xlane.f32.xlu1 (!%p5064_p5), %v4396_v14 }
0x1021   : > { %v4450_v19 = vpop.xlane.xlu0 %4449 }
0x1022   : > { %v4457_v8 = vmul.f32 0.0078125, %v4450_v19 }
0x1024   : > { %v4461_v3 = vsub.f32 %v4393_v5, %v4457_v8 }
0x1025   : > { %v4452_v6 = vpop.xlane.xlu0 %4451 }
0x1026   : > { %v4458_v28 = vmul.f32 0.0078125, %v4452_v6  ;;  %v4465_v41 = vmul.f32 %v4461_v3, %v4461_v3 }
0x1028   : > { %v4462_v20 = vsub.f32 %v4394_v44, %v4458_v28  ;;  %4469 = vadd.xlane.f32.xlu0 %v4465_v41 }
0x1029   : > { %v4454_v21 = vpop.xlane.xlu1 %4453 }
0x102a   : > { %v4459_v24 = vmul.f32 0.0078125, %v4454_v21  ;;  %v4466_v23 = vmul.f32 %v4462_v20, %v4462_v20 }
0x102c   : > { %v4463_v60 = vsub.f32 %v4395_v63, %v4459_v24  ;;  %4471 = vadd.xlane.f32.xlu1 %v4466_v23 }
0x102d   : > { %v4456_v25 = vpop.xlane.xlu1 %4455 }
0x102e   : > { %v4460_v29 = vmul.f32 0.0078125, %v4456_v25  ;;  %v4467_v32 = vmul.f32 %v4463_v60, %v4463_v60 }
0x1030   : > { %v4464_v0 = vsub.f32 %v4396_v14, %v4460_v29  ;;  %4473 = vadd.xlane.f32.xlu0 %v4467_v32 }
0x1032   : > { %v4468_v49 = vmul.f32 %v4464_v0, %v4464_v0 }
0x1034   : > { %4475 = vadd.xlane.f32.xlu1 %v4468_v49 }
0x10b5   : > { %v4470_v33 = vpop.xlane.xlu0 %4469 }
0x10b6   : > { %v4477_v22 = vmul.f32 0.0078125, %v4470_v33 }
0x10b8   : > { %v4481_v30 = vadd.f32 1e-05, %v4477_v22 }
0x10b9   : > { %v4472_v42 = vpop.xlane.xlu1 %4471 }
0x10ba   : > { %5880 = vrsqrt.f32 %v4481_v30  ;;  %v4478_v35 = vmul.f32 0.0078125, %v4472_v42 }
0x10bc   : > { %v4482_v36 = vadd.f32 1e-05, %v4478_v35 }
0x10bd   : > { %v4474_v45 = vpop.xlane.xlu0 %4473 }
0x10be   : > { %v4479_v31 = vmul.f32 0.0078125, %v4474_v45  ;;  %5882 = vrsqrt.f32 %v4482_v36 }
0x10c0   : > { %v4483_v50 = vadd.f32 1e-05, %v4479_v31 }
0x10c1   : > { %v4476_v16 = vpop.xlane.xlu1 %4475 }
0x10c2   : > { %v4480_v61 = vmul.f32 0.0078125, %v4476_v16  ;;  %5884 = vrsqrt.f32 %v4483_v50 }
0x10c4   : > { %v4484_v37 = vadd.f32 1e-05, %v4480_v61  ;;  %v5881_v2 = vpop.eup %5880 }
0x10c5   : > { %v4489_v47 = vmul.f32 %v5881_v2, %v4461_v3 }
0x10c6   : > { %5886 = vrsqrt.f32 %v4484_v37 }
0x10c7   : > { %v4499_v15 = vmul.f32 %v5065_v46, %v4489_v47 }
0x10c8   : > { %v5883_v53 = vpop.eup %5882 }
0x10c9   : > { %v4509_v9 = vadd.f32 %v5066_v48, %v4499_v15  ;;  %v4490_v38 = vmul.f32 %v5883_v53, %v4462_v20 }
0x10cb   : > { %4513 = vst [vmem:[#allocation20] sm:$0xff] %v4509_v9  ;;  %v4500_v40 = vmul.f32 %v5065_v46, %v4490_v38 }
0x10cc   : > { %v5885_v51 = vpop.eup %5884 }
0x10cd   : > { %v4491_v39 = vmul.f32 %v5885_v51, %v4463_v60  ;;  %v4510_v5 = vadd.f32 %v5066_v48, %v4500_v40 }
0x10cf   : > { %v4501_v58 = vmul.f32 %v5065_v46, %v4491_v39  ;;  %4514 = vst [vmem:[#allocation20 + $0x8] sm:$0xff] %v4510_v5 }
0x10d0   : > { %v5887_v56 = vpop.eup %5886 }
0x10d1   : > { %v4492_v59 = vmul.f32 %v5887_v56, %v4464_v0  ;;  %v4511_v44 = vadd.f32 %v5066_v48, %v4501_v58 }
0x10d3   : > { %v4502_v17 = vmul.f32 %v5065_v46, %v4492_v59  ;;  %4516 = vst [vmem:[#allocation20 + $0x10] sm:$0xff] %v4511_v44 }
0x10d5   : > { %v4512_v26 = vadd.f32 %v5066_v48, %v4502_v17 }
0x10d7   : > { %4517 = vst [vmem:[#allocation20 + $0x18] sm:$0xff] %v4512_v26 }
0x10d8 PF: > { %s4519_s16 = scalar_lea.sflag [#allocation5], %s6704_s18  ;;  %s4524_s24 = scalar_lea.sflag [#allocation19], %s6701_s17 }
0x10d9   : > { %s7594_s13 = sld [smem:[#allocation35_spill]]  ;;  %s7595_s23 = sld [smem:[#allocation40_spill]] }
0x10da   : > { %s4556_s19 = sshll.u32 %s6736_s21, 4  ;;  %s7596_s25 = sld [smem:[#allocation48_spill]]  ;;  %s4557_s19 = int_to_ptr.vmem [resolvable:$true] %s4556_s19 }
0x10db   : > { %s6254_s20 = smov 128   ;;  %s6255_s18 = smov 256  }
0x10dc   : > { %s6256_s10 = smov 2   ;;  %s6257_s2 = smov 64  }
0x10dd   : > { %s6258_s21 = smov 4   ;;  %s6259_s15 = smov [#allocation21]  }
0x10de   : > { %s6260_s11 = smov 0  }
0x10df   : > { %s5089_s12 = sshll.u32 %s7594_s13, 7  ;;  %p7597_p2 = scmp.ne.s32.totalorder %s7595_s23, 0 }
0x10e0   : > { %s4539_s30 = scalar_lea.hbm %s7596_s25, %s5089_s12 }
0x10e1   : > { %5456 = sst [smem:[#allocation22]] (%p7597_p2), %s6254_s20 }
0x10e2   : > { %5457 = sst [smem:[#allocation22 + $0x1]] (%p7597_p2), %s6255_s18 }
0x10e3   : > { %5458 = sst [smem:[#allocation22 + $0x2]] (%p7597_p2), %s6256_s10 }
0x10e4   : > { %5459 = sst [smem:[#allocation22 + $0x3]] (%p7597_p2), %s6257_s2 }
0x10e5   : > { %5460 = sst [smem:[#allocation22 + $0x4]] (%p7597_p2), %s6257_s2 }
0x10e6   : > { %5461 = sst [smem:[#allocation22 + $0x5]] (%p7597_p2), %s6258_s21 }
0x10e7   : > { %5462 = dma.general (%p7597_p2), %s4557_s19, 256, %s4539_s30, %s4519_s16, %s6259_s15, [#allocation22], %s6260_s11, 0  }
0x10e8   : > { %s7598_s1 = sld [smem:[#allocation49_spill]]  ;;  %s4604_s13 = sshll.u32 %s6738_s6, 4  ;;  %s4605_s13 = int_to_ptr.vmem [resolvable:$true] %s4604_s13 }
0x10e9   : > { %s6261_s9 = smov 128   ;;  %s6262_s22 = smov 256  }
0x10ea   : > { %5463 = sst [smem:[#allocation24]] (%p7597_p2), %s6261_s9  ;;  %s6263_s16 = smov 2  }
0x10eb   : > { %5464 = sst [smem:[#allocation24 + $0x1]] (%p7597_p2), %s6262_s22  ;;  %s6264_s19 = smov 64  }
0x10ec   : > { %5465 = sst [smem:[#allocation24 + $0x2]] (%p7597_p2), %s6263_s16  ;;  %s6265_s25 = smov 4  }
0x10ed   : > { %5466 = sst [smem:[#allocation24 + $0x3]] (%p7597_p2), %s6264_s19  ;;  %s6267_s6 = smov 0  }
0x10ee   : > { %s4587_s4 = scalar_lea.hbm %s7598_s1, %s5089_s12  ;;  %5467 = sst [smem:[#allocation24 + $0x4]] (%p7597_p2), %s6264_s19 }
0x10ef   : > { %5468 = sst [smem:[#allocation24 + $0x5]] (%p7597_p2), %s6265_s25  ;;  %s6266_s12 = smov [#allocation23]  }
0x10f0   : > { %5469 = dma.general (%p7597_p2), %s4605_s13, 256, %s4587_s4, %s4524_s24, %s6266_s12, [#allocation24], %s6267_s6, 0  }
0x10f1   : > { %s6268_s30 = smov [#allocation20]   ;;  %p7599_p10 = scmp.eq.s32.totalorder %s6372_s14, 1 }
0x10f2   : > { %s4634_s20 = sshll.u32 %s6268_s30, 4  ;;  %s4635_s20 = int_to_ptr.vmem [resolvable:$true] %s4634_s20 }
0x10f3   : > { %s6122_s18 = scalar_lea.vmem %s4635_s20, 512  ;;  %p6129_p6 = scmp.lt.s32.totalorder %s4635_s20, %s4635_s20 }
0x10f4   : > { %p6123_p4 = scmp.ne.s32.totalorder %s4635_s20, %s6122_s18  ;;  %p6130_p8 = scmp.lt.s32.totalorder %s6122_s18, %s6122_s18 }
0x10f6   : > { %p6124_p11 = pnand %p6123_p4, %p7599_p10  ;;  %p6131_p13 = por %p6130_p8, %p6129_p6 }
0x10f8   : > { %p6125_p1 = pneg %p6124_p11 }
0x10fa   : > { %p6132_p7 = pnand %p6131_p13, %p6125_p1 }
0x10fc   : > { %6135 = shalt.err (!%p6132_p7)
}
0x10fd   : > { %s7600_s21 = sld [smem:[#allocation50_spill]]  ;;  %p7601_p12 = pmov %p7599_p10 }
0x1103   : > { %s6136_s17 = scalar_lea.hbm %s7600_s21, 512 }
0x1104   : > { %p6137_p3 = scmp.ne.s32.totalorder %s7600_s21, %s6136_s17  ;;  %p6142_p5 = scmp.lt.u32.totalorder %s6136_s17, %s7600_s21 }
0x1106   : > { %p6138_p9 = pnand %p6137_p3, %p7601_p12 }
0x1108   : > { %p6139_p0 = pneg %p6138_p9 }
0x110a   : > { %p6144_p2 = pnand %p6142_p5, %p6139_p0 }
0x110c   : > { %6147 = shalt.err (!%p6144_p2)
}
0x110d   : > { %s6269_s28 = smov 128   ;;  %s6270_s27 = smov 8  }
0x110e   : > { %p7602_p4 = pmov %p7599_p10 }
0x1110   : > { %5471 = dma.vmem_to_hbm [thread:$0]  (%p7602_p4), %s4635_s20, 512, %s7600_s21, [#allocation19], %s6269_s28, %s6269_s28, %s6270_s27  }
0x1111   : > { %p7603_p10 = pmov %p7602_p4 }
0x1112   : > { %p7604_p11 = pmov %p7602_p4 }
0x1113   : > { %6193 = dma.done.wait (%p7603_p10), [#allocation19], 512  }
0x1114   : > { %6195 = vsyncadd (%p7604_p11), [#allocation19], 4294966784 }
0x1115 PF: > { %s7605_s13 = sld [smem:[#allocation33_spill]]  ;;  %s7606_s9 = sld [smem:[#allocation38_spill]] }
0x1116   : > { %s7607_s22 = sld [smem:[#allocation36_spill]] }
0x111b   : > { %s4653_s16 = sand.u32 1, %s7605_s13   ;;  %p7608_p1 = scmp.ne.s32.totalorder %s7606_s9, 0 }
0x111c   : > { %p7609_p6 = scmp.ge.s32.totalorder %s7607_s22, 2  ;;  %s4654_s19 = scalar_lea.sflag [#allocation5], %s4653_s16 }
0x111e   : > { %p5503_p8 = pnand %p7609_p6, %p7608_p1 }
0x1120   : > { %6197 = dma.done.wait (!%p5503_p8), %s4654_s19, 256  }
0x1121   : > { %6199 = vsyncadd (!%p5503_p8), %s4654_s19, 4294967040  ;;  %s7610_s25 = sadd.s32 4294967294, %s7607_s22  }
0x1122   : > { %s4662_s12 = sand.u32 1, %s7610_s25  }
0x1123   : > { %s4663_s6 = scalar_lea.sflag [#allocation19], %s4662_s12 }
0x1124   : > { %6201 = dma.done.wait (!%p5503_p8), %s4663_s6, 256  }
0x1125   : > { %6203 = vsyncadd (!%p5503_p8), %s4663_s6, 4294967040  ;;  %s41_s30 = sadd.s32 1, %s7607_s22   ;;  %s7611_s14 = sld [smem:[#allocation34_spill]] }
0x1126   : > { %p38_p13 = scmp.ge.s32.totalorder %s41_s30, 4   ;;  %s7612_s27 = sld [smem:[#allocation41_spill]] }
0x1127   : > { %s7613_s20 = sld [smem:[#allocation39_spill]]  ;;  %s7614_s25 = smov %s6210_s26 }
0x1128   : > { %s7616_s28 = smov %s6222_s29  ;;  %40 = sbr.rel (!%p38_p13) target bundleno = 24 (0x18), region = 219 }
0x112b   : > { %s7615_s26 = smov %s7611_s14 }
0x112d   : > { %s7617_s29 = smov %s7613_s20 }
0x112f   :  { %4668 = vsyncpa [#allocation4], 1 }
0x1130   :  { %4670 = vsyncpa [#allocation4 + $0x1], 1 }
0x1131   :  { %4671 = vsyncpa [#allocation7], 1 }
0x1132   :  { %4672 = vsyncpa [#allocation10], 1 }
0x1133   :  { %4674 = vsyncpa [#allocation10 + $0x1], 1 }
0x1134   :  { %4675 = vsyncpa [#allocation13], 1 }
0x1135   :  { %4677 = vsyncpa [#allocation13 + $0x1], 1 }
0x1136   :  { %4678 = vsyncpa [#allocation16], 1 }
0x1137   :  { %4680 = vsyncpa [#allocation16 + $0x1], 1 }
0x1138   :  { %4681 = vsyncpa [#allocation5], 1 }
0x1139   :  { %4683 = vsyncpa [#allocation5 + $0x1], 1 }
0x113a   :  { %4684 = vsyncpa [#allocation19], 1 }
0x113b   :  { %4686 = vsyncpa [#allocation19 + $0x1], 1 }

</bundles_post_ra>
